<compile_context>
chip_gen: v6e
topology: v6e:2x2x1
jax: 0.10.0
libtpu: 0.0.40
codegen_flags: <defaults>
</compile_context>

<pallas_src>
import functools

import jax
import jax.numpy as jnp
from jax.experimental import pallas as pl
from jax.experimental.pallas import tpu as pltpu

N_MIRNA = 215   # hardcoded in the PyTorch forward
N_PAD = 256     # padded node count (MXU / sublane aligned)


# --------------------------------------------------------------------------
# Single fused kernel: 6 GCN layers + channel attention + scale + 1x1 conv
# --------------------------------------------------------------------------
def _embedding_m_kernel(x_ref, maskT_ref, af_ref, as_ref, ag_ref,
                        w1_ref, b1_ref, w2_ref, b2_ref,
                        fc1w_ref, fc1b_ref, fc2w_ref, fc2b_ref,
                        cnnw_ref, cnnb_ref, r1_ref, r2_ref, ind_ref,
                        o_ref, *, inv_count, n_real, fm):
    f32, bf16 = jnp.float32, jnp.bfloat16
    adj = (af_ref[...], as_ref[...], ag_ref[...])          # (Np,Np) bf16 each

    def vs(t, v):                                          # lanes of view v in a packed slab
        return t[:, v * fm:(v + 1) * fm]

    def gcn_layer(xw, b):
        # xw: (Np, 3*fm) packed feature transform.  Per-view MXU aggregation,
        # bias + relu.  Padded A rows/cols are zero, so no mask is needed here:
        # padded-row garbage (relu(bias)) never reaches real rows.
        parts = [jnp.maximum(
                     jnp.dot(adj[v], vs(xw, v).astype(bf16),
                             preferred_element_type=f32) + vs(b, v), 0.0)
                 for v in range(3)]
        return jnp.concatenate(parts, axis=1)              # (Np, 3*fm)

    # ---- 2 GCN layers x 3 views; feature matmuls batched across views ------
    xw1 = jnp.dot(x_ref[...], w1_ref[...], preferred_element_type=f32)   # (Np,3fm)
    h1 = gcn_layer(xw1, b1_ref[...])                                     # [f1|s1|g1]
    xw2 = jnp.dot(h1, w2_ref[...], preferred_element_type=f32)          # block-diag W2, K=3fm
    h2 = gcn_layer(xw2, b2_ref[...])                                     # [f2|s2|g2]

    # ---- channel attention: masked column sums (MXU) -> (1,6) channel means
    maskT = maskT_ref[...]                                               # (1, Np)
    cs1 = jnp.dot(maskT, h1, preferred_element_type=f32)                 # (1, 3fm)
    cs2 = jnp.dot(maskT, h2, preferred_element_type=f32)                 # (1, 3fm)
    ca = (jnp.dot(cs1, r1_ref[...], preferred_element_type=f32)
          + jnp.dot(cs2, r2_ref[...], preferred_element_type=f32)) * inv_count  # (1,6)

    # fc1 expanded as a sum of (1,1)*(1,5C) products (exact f32, no tiny MXU op)
    fc1w = fc1w_ref[...]                                                 # (6, 30)
    hid = fc1b_ref[...]                                                  # (1, 30)
    for c in range(6):
        hid = hid + ca[:, c:c + 1] * fc1w[c:c + 1, :]
    hid = jnp.maximum(hid, 0.0)
    attn = jax.nn.sigmoid(jnp.dot(hid, fc2w_ref[...], preferred_element_type=f32)
                          + fc2b_ref[...])                               # (1, 6)

    # ---- relu(attn*E) == attn*E (E>=0, sigmoid>0): fold attention into conv
    coefs = attn * cnnw_ref[...]                                         # (1, 6)
    ind = ind_ref[...]                                                   # (3, 3fm) 0/1 lane-block masks
    rep1 = (coefs[:, 0:1] * ind[0:1] + coefs[:, 2:3] * ind[1:2]
            + coefs[:, 4:5] * ind[2:3])                                  # per-lane coef, layer-1 slab
    rep2 = (coefs[:, 1:2] * ind[0:1] + coefs[:, 3:4] * ind[1:2]
            + coefs[:, 5:6] * ind[2:3])                                  # per-lane coef, layer-2 slab
    mixed = h1 * rep1 + h2 * rep2                                        # (Np, 3fm) full-lane VPU
    out = vs(mixed, 0) + vs(mixed, 1) + vs(mixed, 2) + cnnb_ref[...]     # (Np, fm)
    o_ref[...] = out[:n_real, :]                                         # direct (215, fm) output


# --------------------------------------------------------------------------
# One-time setup: pad / pack / cast everything static (NOT in the call path)
# --------------------------------------------------------------------------
def prepare_embedding_m_inputs(x_m, adjs, params):
    n, fm = x_m.shape
    pad = N_PAD - n
    f32 = jnp.float32

    x_pad = jnp.pad(x_m, ((0, pad), (0, 0))).astype(f32)
    a_pad = tuple(jnp.pad(adjs[v], ((0, pad), (0, pad))).astype(jnp.bfloat16)
                  for v in ("f", "s", "g"))
    maskT = (jnp.arange(N_PAD) < n).astype(f32).reshape(1, N_PAD)

    # batched layer-1 weights: X @ [W1_f | W1_s | W1_g]
    w1cat = jnp.concatenate([params[f"w1_{v}"] for v in ("f", "s", "g")], axis=1)
    b1cat = jnp.concatenate([params[f"b1_{v}"] for v in ("f", "s", "g")]).reshape(1, 3 * fm)
    # batched layer-2 weights: H1_packed @ block_diag(W2_f, W2_s, W2_g)
    w2bd = jnp.zeros((3 * fm, 3 * fm), f32)
    for vi, v in enumerate(("f", "s", "g")):
        w2bd = w2bd.at[vi * fm:(vi + 1) * fm, vi * fm:(vi + 1) * fm].set(params[f"w2_{v}"])
    b2cat = jnp.concatenate([params[f"b2_{v}"] for v in ("f", "s", "g")]).reshape(1, 3 * fm)

    # static selection matrices for the packed-lane channel bookkeeping
    blk = jnp.repeat(jnp.arange(3), fm)                                   # view id per packed lane
    r1 = (jnp.arange(6)[None, :] == (2 * blk)[:, None]).astype(f32)       # (3fm, 6) layer-1 lanes -> channel
    r2 = (jnp.arange(6)[None, :] == (2 * blk + 1)[:, None]).astype(f32)   # (3fm, 6) layer-2 lanes -> channel
    ind = (jnp.arange(3)[:, None] == blk[None, :]).astype(f32)            # (3, 3fm) lane-block indicators

    return (x_pad, maskT, *a_pad, w1cat, b1cat, w2bd, b2cat,
            params["fc1_w"].astype(f32), params["fc1_b"].reshape(1, -1).astype(f32),
            params["fc2_w"].astype(f32), params["fc2_b"].reshape(1, -1).astype(f32),
            params["cnn_w"].reshape(1, -1).astype(f32),
            params["cnn_b"].reshape(1, 1).astype(f32),
            r1, r2, ind)


def embedding_m_forward(prepared, *, n=N_MIRNA):
    fm = prepared[0].shape[1]
    kern = functools.partial(_embedding_m_kernel,
                             inv_count=1.0 / float(n * fm), n_real=n, fm=fm)
    vmem = pl.BlockSpec(memory_space=pltpu.MemorySpace.VMEM)
    return pl.pallas_call(
        kern,
        out_shape=jax.ShapeDtypeStruct((n, fm), jnp.float32),
        in_specs=[vmem] * len(prepared),
        out_specs=vmem,
    )(*prepared)                                   # (215, fm) == PyTorch output shape


# --------------------------------------------------------------------------
# Glue: GCN normalization (PyG-style, dense) and a pure-JAX reference
# --------------------------------------------------------------------------
def make_norm_adj(key, n):
    """Synthetic symmetric weighted adjacency with self loops, GCN-normalized:
       A_norm = D^{-1/2} (A + I) D^{-1/2}."""
    s = jax.random.uniform(key, (n, n), dtype=jnp.float32)
    s = 0.5 * (s + s.T)
    a = jnp.where(s > 0.5, s, 0.0)
    idx = jnp.arange(n)
    a = a.at[idx, idx].set(1.0)
    deg = jnp.sum(a, axis=1)
    dinv = jax.lax.rsqrt(deg)
    return (dinv[:, None] * a * dinv[None, :]).astype(jnp.float32)


def embedding_m_reference(x_m, adjs, params):
    """Pure-JAX reference of the same math (f32 inputs), for verification."""
    feats = []
    for v in ("f", "s", "g"):
        a = adjs[v]
        h1 = jnp.maximum(a @ (x_m @ params[f"w1_{v}"]) + params[f"b1_{v}"], 0.0)
        h2 = jnp.maximum(a @ (h1 @ params[f"w2_{v}"]) + params[f"b2_{v}"], 0.0)
        feats.extend([h1, h2])
    e = jnp.stack(feats, axis=0)                                  # (C, N, fm)
    ca = jnp.mean(e, axis=(1, 2))[None, :]                        # (1, C)
    h = jnp.maximum(ca @ params["fc1_w"] + params["fc1_b"], 0.0)
    attn = jax.nn.sigmoid(h @ params["fc2_w"] + params["fc2_b"])  # (1, C)
    scaled = jnp.maximum(attn[0][:, None, None] * e, 0.0)
    return jnp.einsum("c,cnf->nf", params["cnn_w"], scaled) + params["cnn_b"][0]


if __name__ == "__main__":
    fm, view, gcn_layers = 32, 3, 2          # args.fm, args.view, args.gcn_layers
    C = view * gcn_layers                    # 6 channels
    N = N_MIRNA                              # 215 miRNA nodes (hardcoded)

    key = jax.random.PRNGKey(0)
    ks = jax.random.split(key, 24)

    # node features (the module draws these internally from torch.randn)
    x_m = jax.random.normal(ks[0], (N, fm), dtype=jnp.float32)

    # three views: functional / sequence / gaussian similarity graphs
    adjs = {
        "f": make_norm_adj(ks[1], N),
        "s": make_norm_adj(ks[2], N),
        "g": make_norm_adj(ks[3], N),
    }

    # deterministic synthetic parameters (shapes follow the module __init__)
    params = {}
    i = 4
    for v in ("f", "s", "g"):
        for layer in (1, 2):
            params[f"w{layer}_{v}"] = 0.1 * jax.random.normal(ks[i], (fm, fm), jnp.float32); i += 1
            params[f"b{layer}_{v}"] = 0.1 * jax.random.normal(ks[i], (fm,), jnp.float32); i += 1
    params["fc1_w"] = 0.1 * jax.random.normal(ks[i], (C, 5 * C), jnp.float32); i += 1
    params["fc1_b"] = 0.1 * jax.random.normal(ks[i], (5 * C,), jnp.float32); i += 1
    params["fc2_w"] = 0.1 * jax.random.normal(ks[i], (5 * C, C), jnp.float32); i += 1
    params["fc2_b"] = 0.1 * jax.random.normal(ks[i], (C,), jnp.float32); i += 1
    params["cnn_w"] = 0.1 * jax.random.normal(ks[i], (C,), jnp.float32); i += 1   # Conv2d(6,1,1x1) weight
    params["cnn_b"] = 0.1 * jax.random.normal(ks[i], (1,), jnp.float32); i += 1   # Conv2d bias

    # one-time setup (padding / packing / bf16 cast hoisted out of the call path)
    prepared = jax.block_until_ready(prepare_embedding_m_inputs(x_m, adjs, params))

    out = embedding_m_forward(prepared, n=N)
    out = jax.block_until_ready(out)
    assert out.shape == (N, fm), out.shape

    ref = embedding_m_reference(x_m, adjs, params)
    max_err = float(jnp.max(jnp.abs(out - ref)))
    assert jnp.allclose(out, ref, rtol=1e-3, atol=1e-3), max_err

    print("KERNEL_OK")
</pallas_src>

<mosaic_0001>
module attributes {stable_mosaic.version = 11 : i64} {
  func.func @_embedding_m_kernel(%arg0: memref<256x32xf32, #tpu.memory_space<vmem>>, %arg1: memref<1x256xf32, #tpu.memory_space<vmem>>, %arg2: memref<256x256xbf16, #tpu.memory_space<vmem>>, %arg3: memref<256x256xbf16, #tpu.memory_space<vmem>>, %arg4: memref<256x256xbf16, #tpu.memory_space<vmem>>, %arg5: memref<32x96xf32, #tpu.memory_space<vmem>>, %arg6: memref<1x96xf32, #tpu.memory_space<vmem>>, %arg7: memref<96x96xf32, #tpu.memory_space<vmem>>, %arg8: memref<1x96xf32, #tpu.memory_space<vmem>>, %arg9: memref<6x30xf32, #tpu.memory_space<vmem>>, %arg10: memref<1x30xf32, #tpu.memory_space<vmem>>, %arg11: memref<30x6xf32, #tpu.memory_space<vmem>>, %arg12: memref<1x6xf32, #tpu.memory_space<vmem>>, %arg13: memref<1x6xf32, #tpu.memory_space<vmem>>, %arg14: memref<1x1xf32, #tpu.memory_space<vmem>>, %arg15: memref<96x6xf32, #tpu.memory_space<vmem>>, %arg16: memref<96x6xf32, #tpu.memory_space<vmem>>, %arg17: memref<3x96xf32, #tpu.memory_space<vmem>>, %arg18: memref<215x32xf32, #tpu.memory_space<vmem>>) attributes {dimension_semantics = [], scalar_prefetch = 0 : i64, scratch_operands = 0 : i64, tpu.core_type = #tpu.core_type<tc>} {
    %c0 = arith.constant 0 : index
    %c0_0 = arith.constant 0 : index
    %0 = vector.load %arg2[%c0, %c0_0] : memref<256x256xbf16, #tpu.memory_space<vmem>>, vector<256x256xbf16>
    %c0_1 = arith.constant 0 : index
    %c0_2 = arith.constant 0 : index
    %1 = vector.load %arg3[%c0_1, %c0_2] : memref<256x256xbf16, #tpu.memory_space<vmem>>, vector<256x256xbf16>
    %c0_3 = arith.constant 0 : index
    %c0_4 = arith.constant 0 : index
    %2 = vector.load %arg4[%c0_3, %c0_4] : memref<256x256xbf16, #tpu.memory_space<vmem>>, vector<256x256xbf16>
    %c0_5 = arith.constant 0 : index
    %c0_6 = arith.constant 0 : index
    %3 = vector.load %arg0[%c0_5, %c0_6] : memref<256x32xf32, #tpu.memory_space<vmem>>, vector<256x32xf32>
    %c0_7 = arith.constant 0 : index
    %c0_8 = arith.constant 0 : index
    %4 = vector.load %arg5[%c0_7, %c0_8] : memref<32x96xf32, #tpu.memory_space<vmem>>, vector<32x96xf32>
    %cst = arith.constant dense<0.000000e+00> : vector<256x96xf32>
    %5 = tpu.matmul %3, %4, %cst {dimension_numbers = #tpu.dot_dimension_numbers<[1], [0], [0], [1], [0, 0, 1, 1], [], []>} : vector<256x32xf32>, vector<32x96xf32>, vector<256x96xf32> -> vector<256x96xf32>
    %c0_9 = arith.constant 0 : index
    %c0_10 = arith.constant 0 : index
    %6 = vector.load %arg6[%c0_9, %c0_10] : memref<1x96xf32, #tpu.memory_space<vmem>>, vector<1x96xf32>
    %7 = vector.extract_strided_slice %5 {offsets = [0, 0], sizes = [256, 32], strides = [1, 1]} : vector<256x96xf32> to vector<256x32xf32>
    %8 = arith.truncf %7 : vector<256x32xf32> to vector<256x32xbf16>
    %cst_11 = arith.constant dense<0.000000e+00> : vector<256x32xf32>
    %9 = tpu.matmul %0, %8, %cst_11 {dimension_numbers = #tpu.dot_dimension_numbers<[1], [0], [0], [1], [0, 0, 1, 1], [], []>} : vector<256x256xbf16>, vector<256x32xbf16>, vector<256x32xf32> -> vector<256x32xf32>
    %10 = vector.extract_strided_slice %6 {offsets = [0, 0], sizes = [1, 32], strides = [1, 1]} : vector<1x96xf32> to vector<1x32xf32>
    %11 = vector.broadcast %10 : vector<1x32xf32> to vector<256x32xf32>
    %12 = arith.addf %9, %11 : vector<256x32xf32>
    %cst_12 = arith.constant 0.000000e+00 : f32
    %13 = vector.broadcast %cst_12 : f32 to vector<256x32xf32>
    %14 = arith.maximumf %12, %13 : vector<256x32xf32>
    %15 = vector.extract_strided_slice %5 {offsets = [0, 32], sizes = [256, 32], strides = [1, 1]} : vector<256x96xf32> to vector<256x32xf32>
    %16 = arith.truncf %15 : vector<256x32xf32> to vector<256x32xbf16>
    %cst_13 = arith.constant dense<0.000000e+00> : vector<256x32xf32>
    %17 = tpu.matmul %1, %16, %cst_13 {dimension_numbers = #tpu.dot_dimension_numbers<[1], [0], [0], [1], [0, 0, 1, 1], [], []>} : vector<256x256xbf16>, vector<256x32xbf16>, vector<256x32xf32> -> vector<256x32xf32>
    %18 = vector.extract_strided_slice %6 {offsets = [0, 32], sizes = [1, 32], strides = [1, 1]} : vector<1x96xf32> to vector<1x32xf32>
    %19 = vector.broadcast %18 : vector<1x32xf32> to vector<256x32xf32>
    %20 = arith.addf %17, %19 : vector<256x32xf32>
    %cst_14 = arith.constant 0.000000e+00 : f32
    %21 = vector.broadcast %cst_14 : f32 to vector<256x32xf32>
    %22 = arith.maximumf %20, %21 : vector<256x32xf32>
    %23 = vector.extract_strided_slice %5 {offsets = [0, 64], sizes = [256, 32], strides = [1, 1]} : vector<256x96xf32> to vector<256x32xf32>
    %24 = arith.truncf %23 : vector<256x32xf32> to vector<256x32xbf16>
    %cst_15 = arith.constant dense<0.000000e+00> : vector<256x32xf32>
    %25 = tpu.matmul %2, %24, %cst_15 {dimension_numbers = #tpu.dot_dimension_numbers<[1], [0], [0], [1], [0, 0, 1, 1], [], []>} : vector<256x256xbf16>, vector<256x32xbf16>, vector<256x32xf32> -> vector<256x32xf32>
    %26 = vector.extract_strided_slice %6 {offsets = [0, 64], sizes = [1, 32], strides = [1, 1]} : vector<1x96xf32> to vector<1x32xf32>
    %27 = vector.broadcast %26 : vector<1x32xf32> to vector<256x32xf32>
    %28 = arith.addf %25, %27 : vector<256x32xf32>
    %cst_16 = arith.constant 0.000000e+00 : f32
    %29 = vector.broadcast %cst_16 : f32 to vector<256x32xf32>
    %30 = arith.maximumf %28, %29 : vector<256x32xf32>
    %31 = tpu.concatenate %14, %22, %30 in 1 : vector<256x32xf32>, vector<256x32xf32>, vector<256x32xf32> -> vector<256x96xf32>
    %c0_17 = arith.constant 0 : index
    %c0_18 = arith.constant 0 : index
    %32 = vector.load %arg7[%c0_17, %c0_18] : memref<96x96xf32, #tpu.memory_space<vmem>>, vector<96x96xf32>
    %cst_19 = arith.constant dense<0.000000e+00> : vector<256x96xf32>
    %33 = tpu.matmul %31, %32, %cst_19 {dimension_numbers = #tpu.dot_dimension_numbers<[1], [0], [0], [1], [0, 0, 1, 1], [], []>} : vector<256x96xf32>, vector<96x96xf32>, vector<256x96xf32> -> vector<256x96xf32>
    %c0_20 = arith.constant 0 : index
    %c0_21 = arith.constant 0 : index
    %34 = vector.load %arg8[%c0_20, %c0_21] : memref<1x96xf32, #tpu.memory_space<vmem>>, vector<1x96xf32>
    %35 = vector.extract_strided_slice %33 {offsets = [0, 0], sizes = [256, 32], strides = [1, 1]} : vector<256x96xf32> to vector<256x32xf32>
    %36 = arith.truncf %35 : vector<256x32xf32> to vector<256x32xbf16>
    %cst_22 = arith.constant dense<0.000000e+00> : vector<256x32xf32>
    %37 = tpu.matmul %0, %36, %cst_22 {dimension_numbers = #tpu.dot_dimension_numbers<[1], [0], [0], [1], [0, 0, 1, 1], [], []>} : vector<256x256xbf16>, vector<256x32xbf16>, vector<256x32xf32> -> vector<256x32xf32>
    %38 = vector.extract_strided_slice %34 {offsets = [0, 0], sizes = [1, 32], strides = [1, 1]} : vector<1x96xf32> to vector<1x32xf32>
    %39 = vector.broadcast %38 : vector<1x32xf32> to vector<256x32xf32>
    %40 = arith.addf %37, %39 : vector<256x32xf32>
    %cst_23 = arith.constant 0.000000e+00 : f32
    %41 = vector.broadcast %cst_23 : f32 to vector<256x32xf32>
    %42 = arith.maximumf %40, %41 : vector<256x32xf32>
    %43 = vector.extract_strided_slice %33 {offsets = [0, 32], sizes = [256, 32], strides = [1, 1]} : vector<256x96xf32> to vector<256x32xf32>
    %44 = arith.truncf %43 : vector<256x32xf32> to vector<256x32xbf16>
    %cst_24 = arith.constant dense<0.000000e+00> : vector<256x32xf32>
    %45 = tpu.matmul %1, %44, %cst_24 {dimension_numbers = #tpu.dot_dimension_numbers<[1], [0], [0], [1], [0, 0, 1, 1], [], []>} : vector<256x256xbf16>, vector<256x32xbf16>, vector<256x32xf32> -> vector<256x32xf32>
    %46 = vector.extract_strided_slice %34 {offsets = [0, 32], sizes = [1, 32], strides = [1, 1]} : vector<1x96xf32> to vector<1x32xf32>
    %47 = vector.broadcast %46 : vector<1x32xf32> to vector<256x32xf32>
    %48 = arith.addf %45, %47 : vector<256x32xf32>
    %cst_25 = arith.constant 0.000000e+00 : f32
    %49 = vector.broadcast %cst_25 : f32 to vector<256x32xf32>
    %50 = arith.maximumf %48, %49 : vector<256x32xf32>
    %51 = vector.extract_strided_slice %33 {offsets = [0, 64], sizes = [256, 32], strides = [1, 1]} : vector<256x96xf32> to vector<256x32xf32>
    %52 = arith.truncf %51 : vector<256x32xf32> to vector<256x32xbf16>
    %cst_26 = arith.constant dense<0.000000e+00> : vector<256x32xf32>
    %53 = tpu.matmul %2, %52, %cst_26 {dimension_numbers = #tpu.dot_dimension_numbers<[1], [0], [0], [1], [0, 0, 1, 1], [], []>} : vector<256x256xbf16>, vector<256x32xbf16>, vector<256x32xf32> -> vector<256x32xf32>
    %54 = vector.extract_strided_slice %34 {offsets = [0, 64], sizes = [1, 32], strides = [1, 1]} : vector<1x96xf32> to vector<1x32xf32>
    %55 = vector.broadcast %54 : vector<1x32xf32> to vector<256x32xf32>
    %56 = arith.addf %53, %55 : vector<256x32xf32>
    %cst_27 = arith.constant 0.000000e+00 : f32
    %57 = vector.broadcast %cst_27 : f32 to vector<256x32xf32>
    %58 = arith.maximumf %56, %57 : vector<256x32xf32>
    %59 = tpu.concatenate %42, %50, %58 in 1 : vector<256x32xf32>, vector<256x32xf32>, vector<256x32xf32> -> vector<256x96xf32>
    %c0_28 = arith.constant 0 : index
    %c0_29 = arith.constant 0 : index
    %60 = vector.load %arg1[%c0_28, %c0_29] : memref<1x256xf32, #tpu.memory_space<vmem>>, vector<1x256xf32>
    %cst_30 = arith.constant dense<0.000000e+00> : vector<1x96xf32>
    %61 = tpu.matmul %60, %31, %cst_30 {dimension_numbers = #tpu.dot_dimension_numbers<[1], [0], [0], [1], [0, 0, 1, 1], [], []>} : vector<1x256xf32>, vector<256x96xf32>, vector<1x96xf32> -> vector<1x96xf32>
    %cst_31 = arith.constant dense<0.000000e+00> : vector<1x96xf32>
    %62 = tpu.matmul %60, %59, %cst_31 {dimension_numbers = #tpu.dot_dimension_numbers<[1], [0], [0], [1], [0, 0, 1, 1], [], []>} : vector<1x256xf32>, vector<256x96xf32>, vector<1x96xf32> -> vector<1x96xf32>
    %c0_32 = arith.constant 0 : index
    %c0_33 = arith.constant 0 : index
    %63 = vector.load %arg15[%c0_32, %c0_33] : memref<96x6xf32, #tpu.memory_space<vmem>>, vector<96x6xf32>
    %cst_34 = arith.constant dense<0.000000e+00> : vector<1x6xf32>
    %64 = tpu.matmul %61, %63, %cst_34 {dimension_numbers = #tpu.dot_dimension_numbers<[1], [0], [0], [1], [0, 0, 1, 1], [], []>} : vector<1x96xf32>, vector<96x6xf32>, vector<1x6xf32> -> vector<1x6xf32>
    %c0_35 = arith.constant 0 : index
    %c0_36 = arith.constant 0 : index
    %65 = vector.load %arg16[%c0_35, %c0_36] : memref<96x6xf32, #tpu.memory_space<vmem>>, vector<96x6xf32>
    %cst_37 = arith.constant dense<0.000000e+00> : vector<1x6xf32>
    %66 = tpu.matmul %62, %65, %cst_37 {dimension_numbers = #tpu.dot_dimension_numbers<[1], [0], [0], [1], [0, 0, 1, 1], [], []>} : vector<1x96xf32>, vector<96x6xf32>, vector<1x6xf32> -> vector<1x6xf32>
    %67 = arith.addf %64, %66 : vector<1x6xf32>
    %cst_38 = arith.constant 1.45348837E-4 : f32
    %68 = vector.broadcast %cst_38 : f32 to vector<1x6xf32>
    %69 = arith.mulf %67, %68 : vector<1x6xf32>
    %c0_39 = arith.constant 0 : index
    %c0_40 = arith.constant 0 : index
    %70 = vector.load %arg9[%c0_39, %c0_40] : memref<6x30xf32, #tpu.memory_space<vmem>>, vector<6x30xf32>
    %c0_41 = arith.constant 0 : index
    %c0_42 = arith.constant 0 : index
    %71 = vector.load %arg10[%c0_41, %c0_42] : memref<1x30xf32, #tpu.memory_space<vmem>>, vector<1x30xf32>
    %72 = vector.extract_strided_slice %69 {offsets = [0, 0], sizes = [1, 1], strides = [1, 1]} : vector<1x6xf32> to vector<1x1xf32>
    %73 = vector.extract_strided_slice %70 {offsets = [0, 0], sizes = [1, 30], strides = [1, 1]} : vector<6x30xf32> to vector<1x30xf32>
    %74 = vector.broadcast %72 : vector<1x1xf32> to vector<1x30xf32>
    %75 = arith.mulf %74, %73 : vector<1x30xf32>
    %76 = arith.addf %71, %75 : vector<1x30xf32>
    %77 = vector.extract_strided_slice %69 {offsets = [0, 1], sizes = [1, 1], strides = [1, 1]} : vector<1x6xf32> to vector<1x1xf32>
    %78 = vector.extract_strided_slice %70 {offsets = [1, 0], sizes = [1, 30], strides = [1, 1]} : vector<6x30xf32> to vector<1x30xf32>
    %79 = vector.broadcast %77 : vector<1x1xf32> to vector<1x30xf32>
    %80 = arith.mulf %79, %78 : vector<1x30xf32>
    %81 = arith.addf %76, %80 : vector<1x30xf32>
    %82 = vector.extract_strided_slice %69 {offsets = [0, 2], sizes = [1, 1], strides = [1, 1]} : vector<1x6xf32> to vector<1x1xf32>
    %83 = vector.extract_strided_slice %70 {offsets = [2, 0], sizes = [1, 30], strides = [1, 1]} : vector<6x30xf32> to vector<1x30xf32>
    %84 = vector.broadcast %82 : vector<1x1xf32> to vector<1x30xf32>
    %85 = arith.mulf %84, %83 : vector<1x30xf32>
    %86 = arith.addf %81, %85 : vector<1x30xf32>
    %87 = vector.extract_strided_slice %69 {offsets = [0, 3], sizes = [1, 1], strides = [1, 1]} : vector<1x6xf32> to vector<1x1xf32>
    %88 = vector.extract_strided_slice %70 {offsets = [3, 0], sizes = [1, 30], strides = [1, 1]} : vector<6x30xf32> to vector<1x30xf32>
    %89 = vector.broadcast %87 : vector<1x1xf32> to vector<1x30xf32>
    %90 = arith.mulf %89, %88 : vector<1x30xf32>
    %91 = arith.addf %86, %90 : vector<1x30xf32>
    %92 = vector.extract_strided_slice %69 {offsets = [0, 4], sizes = [1, 1], strides = [1, 1]} : vector<1x6xf32> to vector<1x1xf32>
    %93 = vector.extract_strided_slice %70 {offsets = [4, 0], sizes = [1, 30], strides = [1, 1]} : vector<6x30xf32> to vector<1x30xf32>
    %94 = vector.broadcast %92 : vector<1x1xf32> to vector<1x30xf32>
    %95 = arith.mulf %94, %93 : vector<1x30xf32>
    %96 = arith.addf %91, %95 : vector<1x30xf32>
    %97 = vector.extract_strided_slice %69 {offsets = [0, 5], sizes = [1, 1], strides = [1, 1]} : vector<1x6xf32> to vector<1x1xf32>
    %98 = vector.extract_strided_slice %70 {offsets = [5, 0], sizes = [1, 30], strides = [1, 1]} : vector<6x30xf32> to vector<1x30xf32>
    %99 = vector.broadcast %97 : vector<1x1xf32> to vector<1x30xf32>
    %100 = arith.mulf %99, %98 : vector<1x30xf32>
    %101 = arith.addf %96, %100 : vector<1x30xf32>
    %cst_43 = arith.constant 0.000000e+00 : f32
    %102 = vector.broadcast %cst_43 : f32 to vector<1x30xf32>
    %103 = arith.maximumf %101, %102 : vector<1x30xf32>
    %c0_44 = arith.constant 0 : index
    %c0_45 = arith.constant 0 : index
    %104 = vector.load %arg11[%c0_44, %c0_45] : memref<30x6xf32, #tpu.memory_space<vmem>>, vector<30x6xf32>
    %cst_46 = arith.constant dense<0.000000e+00> : vector<1x6xf32>
    %105 = tpu.matmul %103, %104, %cst_46 {dimension_numbers = #tpu.dot_dimension_numbers<[1], [0], [0], [1], [0, 0, 1, 1], [], []>} : vector<1x30xf32>, vector<30x6xf32>, vector<1x6xf32> -> vector<1x6xf32>
    %c0_47 = arith.constant 0 : index
    %c0_48 = arith.constant 0 : index
    %106 = vector.load %arg12[%c0_47, %c0_48] : memref<1x6xf32, #tpu.memory_space<vmem>>, vector<1x6xf32>
    %107 = arith.addf %105, %106 : vector<1x6xf32>
    %108 = arith.negf %107 : vector<1x6xf32>
    %109 = math.exp %108 : vector<1x6xf32>
    %cst_49 = arith.constant 1.000000e+00 : f32
    %110 = vector.broadcast %cst_49 : f32 to vector<1x6xf32>
    %111 = arith.addf %110, %109 : vector<1x6xf32>
    %112 = arith.divf %110, %111 : vector<1x6xf32>
    %c0_50 = arith.constant 0 : index
    %c0_51 = arith.constant 0 : index
    %113 = vector.load %arg13[%c0_50, %c0_51] : memref<1x6xf32, #tpu.memory_space<vmem>>, vector<1x6xf32>
    %114 = arith.mulf %112, %113 : vector<1x6xf32>
    %c0_52 = arith.constant 0 : index
    %c0_53 = arith.constant 0 : index
    %115 = vector.load %arg17[%c0_52, %c0_53] : memref<3x96xf32, #tpu.memory_space<vmem>>, vector<3x96xf32>
    %116 = vector.extract_strided_slice %114 {offsets = [0, 0], sizes = [1, 1], strides = [1, 1]} : vector<1x6xf32> to vector<1x1xf32>
    %117 = vector.extract_strided_slice %115 {offsets = [0, 0], sizes = [1, 96], strides = [1, 1]} : vector<3x96xf32> to vector<1x96xf32>
    %118 = vector.broadcast %116 : vector<1x1xf32> to vector<1x96xf32>
    %119 = arith.mulf %118, %117 : vector<1x96xf32>
    %120 = vector.extract_strided_slice %114 {offsets = [0, 2], sizes = [1, 1], strides = [1, 1]} : vector<1x6xf32> to vector<1x1xf32>
    %121 = vector.extract_strided_slice %115 {offsets = [1, 0], sizes = [1, 96], strides = [1, 1]} : vector<3x96xf32> to vector<1x96xf32>
    %122 = vector.broadcast %120 : vector<1x1xf32> to vector<1x96xf32>
    %123 = arith.mulf %122, %121 : vector<1x96xf32>
    %124 = arith.addf %119, %123 : vector<1x96xf32>
    %125 = vector.extract_strided_slice %114 {offsets = [0, 4], sizes = [1, 1], strides = [1, 1]} : vector<1x6xf32> to vector<1x1xf32>
    %126 = vector.extract_strided_slice %115 {offsets = [2, 0], sizes = [1, 96], strides = [1, 1]} : vector<3x96xf32> to vector<1x96xf32>
    %127 = vector.broadcast %125 : vector<1x1xf32> to vector<1x96xf32>
    %128 = arith.mulf %127, %126 : vector<1x96xf32>
    %129 = arith.addf %124, %128 : vector<1x96xf32>
    %130 = vector.extract_strided_slice %114 {offsets = [0, 1], sizes = [1, 1], strides = [1, 1]} : vector<1x6xf32> to vector<1x1xf32>
    %131 = vector.extract_strided_slice %115 {offsets = [0, 0], sizes = [1, 96], strides = [1, 1]} : vector<3x96xf32> to vector<1x96xf32>
    %132 = vector.broadcast %130 : vector<1x1xf32> to vector<1x96xf32>
    %133 = arith.mulf %132, %131 : vector<1x96xf32>
    %134 = vector.extract_strided_slice %114 {offsets = [0, 3], sizes = [1, 1], strides = [1, 1]} : vector<1x6xf32> to vector<1x1xf32>
    %135 = vector.extract_strided_slice %115 {offsets = [1, 0], sizes = [1, 96], strides = [1, 1]} : vector<3x96xf32> to vector<1x96xf32>
    %136 = vector.broadcast %134 : vector<1x1xf32> to vector<1x96xf32>
    %137 = arith.mulf %136, %135 : vector<1x96xf32>
    %138 = arith.addf %133, %137 : vector<1x96xf32>
    %139 = vector.extract_strided_slice %114 {offsets = [0, 5], sizes = [1, 1], strides = [1, 1]} : vector<1x6xf32> to vector<1x1xf32>
    %140 = vector.extract_strided_slice %115 {offsets = [2, 0], sizes = [1, 96], strides = [1, 1]} : vector<3x96xf32> to vector<1x96xf32>
    %141 = vector.broadcast %139 : vector<1x1xf32> to vector<1x96xf32>
    %142 = arith.mulf %141, %140 : vector<1x96xf32>
    %143 = arith.addf %138, %142 : vector<1x96xf32>
    %144 = vector.broadcast %129 : vector<1x96xf32> to vector<256x96xf32>
    %145 = arith.mulf %31, %144 : vector<256x96xf32>
    %146 = vector.broadcast %143 : vector<1x96xf32> to vector<256x96xf32>
    %147 = arith.mulf %59, %146 : vector<256x96xf32>
    %148 = arith.addf %145, %147 : vector<256x96xf32>
    %149 = vector.extract_strided_slice %148 {offsets = [0, 0], sizes = [256, 32], strides = [1, 1]} : vector<256x96xf32> to vector<256x32xf32>
    %150 = vector.extract_strided_slice %148 {offsets = [0, 32], sizes = [256, 32], strides = [1, 1]} : vector<256x96xf32> to vector<256x32xf32>
    %151 = arith.addf %149, %150 : vector<256x32xf32>
    %152 = vector.extract_strided_slice %148 {offsets = [0, 64], sizes = [256, 32], strides = [1, 1]} : vector<256x96xf32> to vector<256x32xf32>
    %153 = arith.addf %151, %152 : vector<256x32xf32>
    %c0_54 = arith.constant 0 : index
    %c0_55 = arith.constant 0 : index
    %154 = vector.load %arg14[%c0_54, %c0_55] : memref<1x1xf32, #tpu.memory_space<vmem>>, vector<1x1xf32>
    %155 = vector.broadcast %154 : vector<1x1xf32> to vector<256x32xf32>
    %156 = arith.addf %153, %155 : vector<256x32xf32>
    %157 = vector.extract_strided_slice %156 {offsets = [0, 0], sizes = [215, 32], strides = [1, 1]} : vector<256x32xf32> to vector<215x32xf32>
    %c0_56 = arith.constant 0 : index
    %c0_57 = arith.constant 0 : index
    %158 = vector.load %arg18[%c0_56, %c0_57] : memref<215x32xf32, #tpu.memory_space<vmem>>, vector<215x32xf32>
    tpu.vector_store %arg18[%c0_56, %c0_57], %157 {strides = array<i32>} : memref<215x32xf32, #tpu.memory_space<vmem>>, vector<215x32xf32>,
    return
  }
}

</mosaic_0001>

<bundles_post_ra>
// kernel: tpu_custom_call.1
= control target key start
LH: loop header
LB: loop body
LE: loop exit
PB: predicated region body
PF: predicated region fallthrough
CT: control target
= control target key end

     0   :  { %s8471_s0 = inlined_call_operand.vmem [shape: f32[256,32], index: 0, kind: input, shape index: {}]   ;;  %s8472_s1 = inlined_call_operand.hbm [shape: f32[1,256], index: 1, kind: input, shape index: {}]   ;;  %s8473_s2 = inlined_call_operand.vmem [shape: bf16[256,256], index: 2, kind: input, shape index: {}]   ;;  %s8474_s3 = inlined_call_operand.vmem [shape: bf16[256,256], index: 3, kind: input, shape index: {}]   ;;  %s8475_s4 = inlined_call_operand.hbm [shape: bf16[256,256], index: 4, kind: input, shape index: {}]   ;;  %s8476_s5 = inlined_call_operand.vmem [shape: f32[32,96], index: 5, kind: input, shape index: {}]   ;;  %s8477_s6 = inlined_call_operand.vmem [shape: f32[1,96], index: 6, kind: input, shape index: {}]   ;;  %s8478_s7 = inlined_call_operand.hbm [shape: f32[96,96], index: 7, kind: input, shape index: {}]   ;;  %s8479_s8 = inlined_call_operand.vmem [shape: f32[1,96], index: 8, kind: input, shape index: {}]   ;;  %s8480_s9 = inlined_call_operand.vmem [shape: f32[6,30], index: 9, kind: input, shape index: {}]   ;;  %s8481_s10 = inlined_call_operand.vmem [shape: f32[1,30], index: 10, kind: input, shape index: {}]   ;;  %s8482_s11 = inlined_call_operand.vmem [shape: f32[30,6], index: 11, kind: input, shape index: {}]   ;;  %s8483_s12 = inlined_call_operand.vmem [shape: f32[1,6], index: 12, kind: input, shape index: {}]   ;;  %s8484_s13 = inlined_call_operand.vmem [shape: f32[1,6], index: 13, kind: input, shape index: {}]   ;;  %s8485_s14 = inlined_call_operand.<no memory space> [shape: f32[1,1], index: 14, kind: input, shape index: {}]   ;;  %s8486_s15 = inlined_call_operand.vmem [shape: f32[96,6], index: 15, kind: input, shape index: {}]   ;;  %s8487_s16 = inlined_call_operand.vmem [shape: f32[96,6], index: 16, kind: input, shape index: {}]   ;;  %s8488_s17 = inlined_call_operand.vmem [shape: f32[3,96], index: 17, kind: input, shape index: {}]   ;;  %s8489_s18 = inlined_call_operand.vmem [shape: f32[215,32], index: 18, kind: output, shape index: {}]  }
   0x1   :  { %8522 = sst [smem:[#allocation69_spill]] %s8471_s0  ;;  %v23_v0 = vstv %s8485_s14 }
   0x2   :  { %8523 = sst [smem:[#allocation70_spill]] %s8472_s1  ;;  %24 = vst [vmem:[#allocation2] sm:$0x1] %v23_v0 }
   0x3   :  { %8524 = sst [smem:[#allocation71_spill]] %s8473_s2 }
   0x4   :  { %25 = vsyncpa [#allocation4], 0 }
   0x5   :  { %26 = vsyncpa [#allocation6], 0  ;;  %s5919_s29 = smov [#allocation5]  }
   0x6   :  { %s48_s30 = sshll.u32 %s5919_s29, 4  ;;  %s49_s30 = int_to_ptr.vmem [resolvable:$true] %s48_s30 }
   0x7   :  { %s5863_s0 = scalar_lea.vmem %s49_s30, 4096  ;;  %p5868_p1 = scmp.lt.s32.totalorder %s49_s30, %s49_s30 }
   0x8   :  { %p5864_p0 = scmp.ne.s32.totalorder %s49_s30, %s5863_s0  ;;  %p5869_p2 = scmp.lt.s32.totalorder %s5863_s0, %s5863_s0 }
   0xa   :  { %p5870_p3 = por %p5869_p2, %p5868_p1 }
   0xc   :  { %p5871_p4 = pnand %p5870_p3, %p5864_p0 }
   0xe   :  { %5874 = shalt.err (!%p5871_p4)
}
   0xf   :  { %s5920_s19 = smov 128   ;;  %s5921_s1 = smov 8  }
  0x10   :  { %54 = dma.hbm_to_vmem [thread:$0]  %s8475_s4, 4096, %s49_s30, [#allocation6], %s5920_s19, %s5920_s19, %s5921_s1  }
  0x11   :  { %s5922_s14 = smov [#allocation3]   ;;  %s5923_s2 = smov [#allocation7]  }
  0x12   :  { %s35_s22 = sshll.u32 %s5922_s14, 4  ;;  %s64_s23 = sshll.u32 %s5923_s2, 4  ;;  %s36_s22 = int_to_ptr.vmem [resolvable:$true] %s35_s22  ;;  %s65_s23 = int_to_ptr.vmem [resolvable:$true] %s64_s23 }
  0x13   :  { %s5883_s24 = scalar_lea.vmem %s36_s22, 32  ;;  %p5888_p6 = scmp.lt.s32.totalorder %s36_s22, %s36_s22 }
  0x14   :  { %p5884_p5 = scmp.ne.s32.totalorder %s36_s22, %s5883_s24  ;;  %p5889_p7 = scmp.lt.s32.totalorder %s5883_s24, %s5883_s24 }
  0x16   :  { %p5890_p8 = por %p5889_p7, %p5888_p6 }
  0x18   :  { %p5891_p9 = pnand %p5890_p8, %p5884_p5 }
  0x1a   :  { %5894 = shalt.err (!%p5891_p9)
}
  0x1b   :  { %s8525_s27 = sld [smem:[#allocation70_spill]]  ;;  %s5903_s28 = scalar_lea.vmem %s65_s23, 1536 }
  0x1c   :  { %p5904_p10 = scmp.ne.s32.totalorder %s65_s23, %s5903_s28  ;;  %p5908_p11 = scmp.lt.s32.totalorder %s65_s23, %s65_s23 }
  0x1d   :  { %p5909_p12 = scmp.lt.s32.totalorder %s5903_s28, %s5903_s28 }
  0x1f   :  { %p5910_p13 = por %p5909_p12, %p5908_p11 }
  0x21   :  { %38 = dma.hbm_to_vmem [thread:$0]  %s8525_s27, 32, %s36_s22, [#allocation4]  }
  0x22   :  { %p5911_p0 = pnand %p5910_p13, %p5904_p10 }
  0x24   :  { %5914 = shalt.err (!%p5911_p0)
}
  0x25   :  { %70 = dma.hbm_to_vmem [thread:$0]  %s8478_s7, 1536, %s65_s23, [#allocation6], %s5920_s19, %s5920_s19, %s5921_s1  }
  0x26   :  { %5915 = dma.done.wait [#allocation4], 32  }
  0x27   :  { %5916 = vsyncadd [#allocation4], 4294967264 }
  0x28   :  { %5917 = dma.done.wait [#allocation6], 5632  }
  0x29   :  { %5918 = vsyncadd [#allocation6], 4294961664  ;;  %v232_v1 = vld [vmem:[%s8476_s5 + $0x18] sm:$0xff]  ;;  %v231_v2 = vld [vmem:[%s8476_s5 + $0x10] sm:$0xff]  ;;  %s8526_s23 = sld [smem:[#allocation69_spill]]  ;;  %vm233_vm0 = vcmask 261120  }
  0x2a   :  { %5380 = vmatprep.subr.mxu0 %v232_v1  ;;  %5573 = vmatprep.subr.mxu1 %v232_v1  ;;  %v230_v3 = vld [vmem:[%s8476_s5 + $0x8] sm:$0xff]  ;;  %v229_v4 = vld [vmem:[%s8476_s5] sm:$0xff]  ;;  %s8527_s20 = sld [smem:[#allocation71_spill]]  ;;  %s5925_s21 = smov 64   ;;  %vm2043_vm1 = vcmask 523264   ;;  %vm2088_vm2 = vcmask 785408  }
  0x2b   :  { %5381 = vmatpush3.msra.mxu0 %v232_v1  ;;  %5577 = vmatpush3.msra.mxu1 %v232_v1  ;;  %s5926_s14 = smov 32   ;;  %vm5928_vm3 = vmmov 0   ;;  %vm3833_vm4 = vcmask 1045504   ;;  %vm3829_vm5 = vcmask 244736   ;;  %vm4351_vm6 = vcmask 260096  }
  0x2c   :  { %5382 = vmatprep.subr.mxu0 %v231_v2  ;;  %5574 = vmatprep.subr.mxu1 %v231_v2 }
  0x2d   :  { %5383 = vmatpush3.msra.mxu0 %v231_v2  ;;  %5578 = vmatpush3.msra.mxu1 %v231_v2 }
  0x2e   :  { %5384 = vmatprep.subr.mxu0 %v230_v3  ;;  %5575 = vmatprep.subr.mxu1 %v230_v3 }
  0x2f   :  { %5385 = vmatpush3.msra.mxu0 %v230_v3  ;;  %5579 = vmatpush3.msra.mxu1 %v230_v3  ;;  %v197_v5 = vld [vmem:[%s8526_s23] sm:$0xff]  ;;  %v198_v7 = vld [vmem:[%s8526_s23 + $0x8] sm:$0xff]  ;;  %v199_v9 = vld [vmem:[%s8526_s23 + $0x10] sm:$0xff] }
  0x30   :  { %v213_v6 = vld [vmem:[%s8526_s23 + $0x80] sm:$0xff]  ;;  %5386 = vmatprep.subr.mxu0 %v229_v4  ;;  %5576 = vmatprep.subr.mxu1 %v229_v4  ;;  %v214_v8 = vld [vmem:[%s8526_s23 + $0x88] sm:$0xff]  ;;  %v215_v10 = vld [vmem:[%s8526_s23 + $0x90] sm:$0xff] }
  0x31   :  { %5387 = vmatpush3.msra.mxu0 %v229_v4  ;;  %5580 = vmatpush3.msra.mxu1 %v229_v4  ;;  %v200_v11 = vld [vmem:[%s8526_s23 + $0x18] sm:$0xff]  ;;  %v201_v13 = vld [vmem:[%s8526_s23 + $0x20] sm:$0xff]  ;;  %v202_v15 = vld [vmem:[%s8526_s23 + $0x28] sm:$0xff] }
  0x32   :  { %5388 = vmatprep.mubr.msk.f32.mxu0 %vm233_vm0, %v197_v5  ;;  %5412 = vmatprep.mubr.msk.f32.mxu1 %vm233_vm0, %v213_v6  ;;  %v216_v12 = vld [vmem:[%s8526_s23 + $0x98] sm:$0xff]  ;;  %v217_v14 = vld [vmem:[%s8526_s23 + $0xa0] sm:$0xff]  ;;  %v218_v16 = vld [vmem:[%s8526_s23 + $0xa8] sm:$0xff] }
  0x33   :  { %5389 = vmatmul.mubr.msk.f32.vlgmr.msra.gmra.mxu0 %vm233_vm0, %v198_v7  ;;  %5413 = vmatmul.mubr.msk.f32.vlgmr.msra.gmra.mxu1 %vm233_vm0, %v214_v8  ;;  %v203_v17 = vld [vmem:[%s8526_s23 + $0x30] sm:$0xff]  ;;  %v204_v19 = vld [vmem:[%s8526_s23 + $0x38] sm:$0xff]  ;;  %v205_v21 = vld [vmem:[%s8526_s23 + $0x40] sm:$0xff] }
  0x34   :  { %5391 = vmatprep.mubr.msk.f32.mxu0 %vm233_vm0, %v199_v9  ;;  %5415 = vmatprep.mubr.msk.f32.mxu1 %vm233_vm0, %v215_v10  ;;  %v219_v18 = vld [vmem:[%s8526_s23 + $0xb0] sm:$0xff]  ;;  %v220_v20 = vld [vmem:[%s8526_s23 + $0xb8] sm:$0xff]  ;;  %v221_v22 = vld [vmem:[%s8526_s23 + $0xc0] sm:$0xff] }
  0x35   :  { %v206_v23 = vld [vmem:[%s8526_s23 + $0x48] sm:$0xff]  ;;  %v223_v25 = vld [vmem:[%s8526_s23 + $0xd0] sm:$0xff]  ;;  %v224_v27 = vld [vmem:[%s8526_s23 + $0xd8] sm:$0xff] }
  0x36   :  { %v222_v24 = vld [vmem:[%s8526_s23 + $0xc8] sm:$0xff]  ;;  %v207_v26 = vld [vmem:[%s8526_s23 + $0x50] sm:$0xff]  ;;  %v208_v28 = vld [vmem:[%s8526_s23 + $0x58] sm:$0xff] }
  0x37   :  { %5392 = vmatmul.mubr.msk.f32.gmra.mxu0 %vm233_vm0, %v200_v11  ;;  %5416 = vmatmul.mubr.msk.f32.gmra.mxu1 %vm233_vm0, %v216_v12  ;;  %v225_v29 = vld [vmem:[%s8526_s23 + $0xe0] sm:$0xff]  ;;  %v226_v31 = vld [vmem:[%s8526_s23 + $0xe8] sm:$0xff]  ;;  %v227_v33 = vld [vmem:[%s8526_s23 + $0xf0] sm:$0xff] }
  0x38   :  { %5394 = vmatprep.mubr.msk.f32.mxu0 %vm233_vm0, %v201_v13  ;;  %5418 = vmatprep.mubr.msk.f32.mxu1 %vm233_vm0, %v217_v14  ;;  %v209_v30 = vld [vmem:[%s8526_s23 + $0x60] sm:$0xff]  ;;  %v210_v32 = vld [vmem:[%s8526_s23 + $0x68] sm:$0xff]  ;;  %v211_v34 = vld [vmem:[%s8526_s23 + $0x70] sm:$0xff] }
  0x39   :  { %v228_v35 = vld [vmem:[%s8526_s23 + $0xf8] sm:$0xff]  ;;  %v5612_v37 = vld [vmem:[%s8527_s20 + $0x4] ss:$8 sps:$4 sm:$0xff]  }
  0x3a   :  { %v212_v36 = vld [vmem:[%s8526_s23 + $0x78] sm:$0xff]  ;;  %s5924_s23 = smov 96  }
  0x3b   :  { %5395 = vmatmul.mubr.msk.f32.gmra.mxu0 %vm233_vm0, %v202_v15  ;;  %5419 = vmatmul.mubr.msk.f32.gmra.mxu1 %vm233_vm0, %v218_v16 }
  0x3c   :  { %5397 = vmatprep.mubr.msk.f32.mxu0 %vm233_vm0, %v203_v17  ;;  %5421 = vmatprep.mubr.msk.f32.mxu1 %vm233_vm0, %v219_v18 }
  0x3f   :  { %5398 = vmatmul.mubr.msk.f32.gmra.mxu0 %vm233_vm0, %v204_v19  ;;  %5422 = vmatmul.mubr.msk.f32.gmra.mxu1 %vm233_vm0, %v220_v20 }
  0x40   :  { %5400 = vmatprep.mubr.msk.f32.mxu0 %vm233_vm0, %v205_v21  ;;  %5424 = vmatprep.mubr.msk.f32.mxu1 %vm233_vm0, %v221_v22  ;;  %v5610_v22 = vld [vmem:[%s8527_s20] ss:$8 sps:$4 sm:$0xff]  }
  0x43   :  { %5401 = vmatmul.mubr.msk.f32.gmra.mxu0 %vm233_vm0, %v206_v23  ;;  %5425 = vmatmul.mubr.msk.f32.gmra.mxu1 %vm233_vm0, %v222_v24  ;;  %v5613_v23 = vld [vmem:[%s8527_s20 + $0x14] ss:$8 sps:$4 sm:$0xff]   ;;  %v6249_v24 = vld [vmem:[%s8474_s3 + $0x4] ss:$8 sps:$4 sm:$0xff]  }
  0x44   :  { %5427 = vmatprep.mubr.msk.f32.mxu1 %vm233_vm0, %v223_v25  ;;  %5403 = vmatprep.mubr.msk.f32.mxu0 %vm233_vm0, %v207_v26  ;;  %v5615_v25 = vld [vmem:[%s8527_s20 + $0x10] ss:$8 sps:$4 sm:$0xff]   ;;  %v5616_v26 = vld [vmem:[%s8527_s20 + $0x24] ss:$8 sps:$4 sm:$0xff]  }
  0x47   :  { %5428 = vmatmul.mubr.msk.f32.gmra.mxu1 %vm233_vm0, %v224_v27  ;;  %5404 = vmatmul.mubr.msk.f32.gmra.mxu0 %vm233_vm0, %v208_v28  ;;  %v5618_v27 = vld [vmem:[%s8527_s20 + $0x20] ss:$8 sps:$4 sm:$0xff]   ;;  %v5619_v28 = vld [vmem:[%s8527_s20 + $0x34] ss:$8 sps:$4 sm:$0xff]  }
  0x48   :  { %5430 = vmatprep.mubr.msk.f32.mxu1 %vm233_vm0, %v225_v29  ;;  %5406 = vmatprep.mubr.msk.f32.mxu0 %vm233_vm0, %v209_v30  ;;  %v5621_v29 = vld [vmem:[%s8527_s20 + $0x30] ss:$8 sps:$4 sm:$0xff]   ;;  %v5622_v30 = vld [vmem:[%s8527_s20 + $0x44] ss:$8 sps:$4 sm:$0xff]  }
  0x4b   :  { %5431 = vmatmul.mubr.msk.f32.gmra.mxu1 %vm233_vm0, %v226_v31  ;;  %5407 = vmatmul.mubr.msk.f32.gmra.mxu0 %vm233_vm0, %v210_v32  ;;  %v5624_v31 = vld [vmem:[%s8527_s20 + $0x40] ss:$8 sps:$4 sm:$0xff]   ;;  %v5625_v32 = vld [vmem:[%s8527_s20 + $0x54] ss:$8 sps:$4 sm:$0xff]  }
  0x4c   :  { %5433 = vmatprep.mubr.msk.f32.mxu1 %vm233_vm0, %v227_v33  ;;  %5409 = vmatprep.mubr.msk.f32.mxu0 %vm233_vm0, %v211_v34  ;;  %v5627_v33 = vld [vmem:[%s8527_s20 + $0x50] ss:$8 sps:$4 sm:$0xff]   ;;  %v5628_v34 = vld [vmem:[%s8527_s20 + $0x64] ss:$8 sps:$4 sm:$0xff]  }
  0x4f   :  { %5434 = vmatmul.mubr.msk.f32.gmra.mxu1 %vm233_vm0, %v228_v35  ;;  %5410 = vmatmul.mubr.msk.f32.gmra.mxu0 %vm233_vm0, %v212_v36  ;;  %v5630_v35 = vld [vmem:[%s8527_s20 + $0x60] ss:$8 sps:$4 sm:$0xff]   ;;  %v5631_v36 = vld [vmem:[%s8527_s20 + $0x74] ss:$8 sps:$4 sm:$0xff]  }
  0x50   :  { %770 = vmatprep.mubr.bf16.mxu1 %v5612_v37  ;;  %1190 = vmatprep.mubr.bf16.mxu0 %v6249_v24  ;;  %v5633_v37 = vld [vmem:[%s8527_s20 + $0x70] ss:$8 sps:$4 sm:$0xff]  }
  0xf3   :  { %v6185_v38 = vpop.f32.mrf.mxu0  ;;  %v6187_v39 = vpop.f32.mrf.mxu1 }
  0xf5   :  { %v6189_v40 = vpop.f32.mrf.mxu0  ;;  %v6191_v41 = vpop.f32.mrf.mxu1 }
  0xf6   :  { %v564_v20 = vpack.c.bf16 %v6187_v39, %v6191_v41  ;;  %v556_v21 = vpack.c.bf16 %v6185_v38, %v6189_v40  ;;  %v5634_v38 = vld [vmem:[%s8527_s20 + $0x84] ss:$8 sps:$4 sm:$0xff]   ;;  %v5636_v39 = vld [vmem:[%s8527_s20 + $0x80] ss:$8 sps:$4 sm:$0xff]   ;;  %v5637_v40 = vld [vmem:[%s8527_s20 + $0x94] ss:$8 sps:$4 sm:$0xff]  }
  0xf7   :  { %v6193_v42 = vpop.f32.mrf.mxu0  ;;  %v6195_v43 = vpop.f32.mrf.mxu1 }
  0xf9   :  { %v6197_v44 = vpop.f32.mrf.mxu0  ;;  %v6199_v45 = vpop.f32.mrf.mxu1 }
  0xfa   :  { %v565_v18 = vpack.c.bf16 %v6195_v43, %v6199_v45  ;;  %v557_v19 = vpack.c.bf16 %v6193_v42, %v6197_v44  ;;  %v4391_v43 = vld [vmem:[%s8477_s6] ss:$0 sm:$0xff]  ;;  %v5639_v44 = vld [vmem:[%s8527_s20 + $0x90] ss:$8 sps:$4 sm:$0xff]   ;;  %v5640_v45 = vld [vmem:[%s8527_s20 + $0xa4] ss:$8 sps:$4 sm:$0xff]  }
  0xfb   :  { %v6201_v46 = vpop.f32.mrf.mxu0  ;;  %v5420_v47 = vpop.f32.mrf.mxu1 }
  0xfd   :  { %v6203_v48 = vpop.f32.mrf.mxu0  ;;  %v496_v49 = vpop.f32.mrf.mxu1 }
  0xfe   :  { %v566_v16 = vpack.c.bf16 %v5420_v47, %v496_v49  ;;  %v558_v17 = vpack.c.bf16 %v6201_v46, %v6203_v48 }
  0xff   :  { %v5399_v50 = vpop.f32.mrf.mxu0  ;;  %v5423_v51 = vpop.f32.mrf.mxu1 }
 0x101   :  { %v426_v52 = vpop.f32.mrf.mxu0  ;;  %v506_v53 = vpop.f32.mrf.mxu1 }
 0x102   :  { %v559_v54 = vpack.c.bf16 %v5399_v50, %v426_v52  ;;  %v567_v55 = vpack.c.bf16 %v5423_v51, %v506_v53  ;;  %v5642_v50 = vld [vmem:[%s8527_s20 + $0xa0] ss:$8 sps:$4 sm:$0xff]   ;;  %v5643_v51 = vld [vmem:[%s8527_s20 + $0xb4] ss:$8 sps:$4 sm:$0xff]  }
 0x103   :  { %v5402_v56 = vpop.f32.mrf.mxu0  ;;  %v5426_v57 = vpop.f32.mrf.mxu1 }
 0x104   :  { %1129 = vrot.lane.b32.xlu0 %v567_v55, %s5924_s23  ;;  %1113 = vrot.lane.b32.xlu1 %v559_v54, %s5924_s23 }
 0x105   :  { %v436_v58 = vpop.f32.mrf.mxu0  ;;  %v516_v59 = vpop.f32.mrf.mxu1 }
 0x106   :  { %v560_v60 = vpack.c.bf16 %v5402_v56, %v436_v58  ;;  %v568_v61 = vpack.c.bf16 %v5426_v57, %v516_v59  ;;  %v5645_v56 = vld [vmem:[%s8527_s20 + $0xb0] ss:$8 sps:$4 sm:$0xff]   ;;  %v5646_v57 = vld [vmem:[%s8527_s20 + $0xc4] ss:$8 sps:$4 sm:$0xff]  }
 0x107   :  { %v5429_v62 = vpop.f32.mrf.mxu1  ;;  %v5405_v63 = vpop.f32.mrf.mxu0 }
 0x108   :  { %1131 = vrot.lane.b32.xlu0 %v568_v61, %s5924_s23  ;;  %1115 = vrot.lane.b32.xlu1 %v560_v60, %s5924_s23 }
 0x109   :  { %v526_v0 = vpop.f32.mrf.mxu1  ;;  %v446_v1 = vpop.f32.mrf.mxu0 }
 0x10a   :  { %v561_v4 = vpack.c.bf16 %v5405_v63, %v446_v1  ;;  %v569_v7 = vpack.c.bf16 %v5429_v62, %v526_v0  ;;  %v5648_v62 = vld [vmem:[%s8527_s20 + $0xc0] ss:$8 sps:$4 sm:$0xff]   ;;  %v5649_v63 = vld [vmem:[%s8527_s20 + $0xd4] ss:$8 sps:$4 sm:$0xff]  }
 0x10b   :  { %v5432_v2 = vpop.f32.mrf.mxu1  ;;  %v5408_v3 = vpop.f32.mrf.mxu0 }
 0x10c   :  { %1535 = vrot.lane.b32.xlu0 %v568_v61, %s5925_s21  ;;  %1519 = vrot.lane.b32.xlu1 %v560_v60, %s5925_s21 }
 0x10d   :  { %v536_v5 = vpop.f32.mrf.mxu1  ;;  %v456_v6 = vpop.f32.mrf.mxu0 }
 0x10e   :  { %v570_v12 = vpack.c.bf16 %v5432_v2, %v536_v5  ;;  %v562_v15 = vpack.c.bf16 %v5408_v3, %v456_v6  ;;  %v5652_v6 = vld [vmem:[%s8527_s20 + $0xe4] ss:$8 sps:$4 sm:$0xff]  }
 0x10f   :  { %v5435_v8 = vpop.f32.mrf.mxu1  ;;  %v5411_v9 = vpop.f32.mrf.mxu0 }
 0x110   :  { %1133 = vrot.lane.b32.xlu0 %v569_v7, %s5924_s23  ;;  %1117 = vrot.lane.b32.xlu1 %v561_v4, %s5924_s23 }
 0x111   :  { %v546_v10 = vpop.f32.mrf.mxu1  ;;  %v466_v11 = vpop.f32.mrf.mxu0 }
 0x112   :  { %v571_v13 = vpack.c.bf16 %v5435_v8, %v546_v10  ;;  %v563_v14 = vpack.c.bf16 %v5411_v9, %v466_v11  ;;  %v5654_v10 = vld [vmem:[%s8527_s20 + $0xe0] ss:$8 sps:$4 sm:$0xff]  }
 0x114   :  { %1537 = vrot.lane.b32.xlu0 %v569_v7, %s5925_s21  ;;  %4563 = vmatprep.subr.bf16.mxu1 %v571_v13 }
 0x115   :  { %1521 = vrot.lane.b32.xlu1 %v561_v4, %s5925_s21  ;;  %4564 = vmatpush3.bf16.msra.mxu1 %v563_v14 }
 0x116   :  { %4565 = vmatprep.subr.bf16.mxu1 %v570_v12 }
 0x118   :  { %1135 = vrot.lane.b32.xlu0 %v570_v12, %s5924_s23 }
 0x119   :  { %1119 = vrot.lane.b32.xlu1 %v562_v15, %s5924_s23  ;;  %4566 = vmatpush3.bf16.msra.mxu1 %v562_v15 }
 0x11a   :  { %4567 = vmatprep.subr.bf16.mxu1 %v569_v7 }
 0x11c   :  { %1539 = vrot.lane.b32.xlu0 %v570_v12, %s5925_s21  ;;  %v5655_v12 = vld [vmem:[%s8527_s20 + $0xf4] ss:$8 sps:$4 sm:$0xff]  }
 0x11d   :  { %1523 = vrot.lane.b32.xlu1 %v562_v15, %s5925_s21  ;;  %4568 = vmatpush3.bf16.msra.mxu1 %v561_v4  ;;  %v5651_v4 = vld [vmem:[%s8527_s20 + $0xd0] ss:$8 sps:$4 sm:$0xff]  }
 0x11e   :  { %4569 = vmatprep.subr.bf16.mxu1 %v568_v61 }
 0x120   :  { %1137 = vrot.lane.b32.xlu0 %v571_v13, %s5924_s23 }
 0x121   :  { %1541 = vrot.lane.b32.xlu1 %v571_v13, %s5925_s21  ;;  %4570 = vmatpush3.bf16.msra.mxu1 %v560_v60 }
 0x122   :  { %4571 = vmatprep.subr.bf16.mxu1 %v567_v55 }
 0x124   :  { %1121 = vrot.lane.b32.xlu0 %v563_v14, %s5924_s23 }
 0x125   :  { %1525 = vrot.lane.b32.xlu1 %v563_v14, %s5925_s21  ;;  %4572 = vmatpush3.bf16.msra.mxu1 %v559_v54 }
 0x126   :  { %4573 = vmatprep.subr.bf16.mxu1 %v566_v16 }
 0x128   :  { %1533 = vrot.lane.b32.xlu0 %v567_v55, %s5925_s21 }
 0x129   :  { %1517 = vrot.lane.b32.xlu1 %v559_v54, %s5925_s21  ;;  %4574 = vmatpush3.bf16.msra.mxu1 %v558_v17 }
 0x12a   :  { %4575 = vmatprep.subr.bf16.mxu1 %v565_v18 }
 0x12c   :  { %1127 = vrot.lane.b32.xlu0 %v566_v16, %s5924_s23 }
 0x12d   :  { %1111 = vrot.lane.b32.xlu1 %v558_v17, %s5924_s23  ;;  %4576 = vmatpush3.bf16.msra.mxu1 %v557_v19 }
 0x12e   :  { %4577 = vmatprep.subr.bf16.mxu1 %v564_v20 }
 0x130   :  { %1531 = vrot.lane.b32.xlu0 %v566_v16, %s5925_s21  ;;  %v5657_v16 = vld [vmem:[%s8527_s20 + $0xf0] ss:$8 sps:$4 sm:$0xff]  }
 0x131   :  { %1515 = vrot.lane.b32.xlu1 %v558_v17, %s5925_s21  ;;  %4578 = vmatpush3.bf16.msra.mxu1 %v556_v21 }
 0x134   :  { %1125 = vrot.lane.b32.xlu0 %v565_v18, %s5924_s23  ;;  %771 = vmatmul.mubr.bf16.vlgmr.msra.gmra.mxu1 %v5610_v22 }
 0x135   :  { %1109 = vrot.lane.b32.xlu1 %v557_v19, %s5924_s23  ;;  %778 = vmatprep.mubr.bf16.mxu1 %v5613_v23  ;;  %v5658_v23 = vld [vmem:[%s8474_s3] ss:$8 sps:$4 sm:$0xff]  }
 0x138   :  { %1529 = vrot.lane.b32.xlu0 %v565_v18, %s5925_s21  ;;  %v5663_v18 = vld [vmem:[#allocation5 + $0x4] ss:$8 sps:$4 sm:$0xff]  }
 0x139   :  { %1513 = vrot.lane.b32.xlu1 %v557_v19, %s5925_s21 }
 0x13c   :  { %1123 = vrot.lane.b32.xlu0 %v564_v20, %s5924_s23  ;;  %779 = vmatmul.mubr.bf16.gmra.mxu1 %v5615_v25 }
 0x13d   :  { %1107 = vrot.lane.b32.xlu1 %v556_v21, %s5924_s23  ;;  %786 = vmatprep.mubr.bf16.mxu1 %v5616_v26  ;;  %v5661_v26 = vld [vmem:[#allocation5] ss:$8 sps:$4 sm:$0xff]  }
 0x140   :  { %1527 = vrot.lane.b32.xlu0 %v564_v20, %s5925_s21 }
 0x141   :  { %1511 = vrot.lane.b32.xlu1 %v556_v21, %s5925_s21 }
 0x144   :  { %787 = vmatmul.mubr.bf16.gmra.mxu1 %v5618_v27  ;;  %1155 = vrot.lane.b32.xlu0 %v4391_v43, %s5924_s23  ;;  %v5664_v27 = vld [vmem:[%s8474_s3 + $0x14] ss:$8 sps:$4 sm:$0xff]  }
 0x145   :  { %794 = vmatprep.mubr.bf16.mxu1 %v5619_v28  ;;  %1559 = vrot.lane.b32.xlu1 %v4391_v43, %s5925_s21  ;;  %v5667_v28 = vld [vmem:[#allocation5 + $0x14] ss:$8 sps:$4 sm:$0xff]  }
 0x146   :  { %v5688_v43 = vld [vmem:[%s8474_s3 + $0x54] ss:$8 sps:$4 sm:$0xff]  }
 0x14c   :  { %795 = vmatmul.mubr.bf16.gmra.mxu1 %v5621_v29  ;;  %v5666_v29 = vld [vmem:[%s8474_s3 + $0x10] ss:$8 sps:$4 sm:$0xff]  }
 0x14d   :  { %802 = vmatprep.mubr.bf16.mxu1 %v5622_v30  ;;  %v5669_v30 = vld [vmem:[#allocation5 + $0x10] ss:$8 sps:$4 sm:$0xff]  }
 0x154   :  { %803 = vmatmul.mubr.bf16.gmra.mxu1 %v5624_v31  ;;  %v5670_v31 = vld [vmem:[%s8474_s3 + $0x24] ss:$8 sps:$4 sm:$0xff]  }
 0x155   :  { %810 = vmatprep.mubr.bf16.mxu1 %v5625_v32  ;;  %v5673_v32 = vld [vmem:[#allocation5 + $0x24] ss:$8 sps:$4 sm:$0xff]  }
 0x15c   :  { %811 = vmatmul.mubr.bf16.gmra.mxu1 %v5627_v33  ;;  %v5672_v33 = vld [vmem:[%s8474_s3 + $0x20] ss:$8 sps:$4 sm:$0xff]  }
 0x15d   :  { %818 = vmatprep.mubr.bf16.mxu1 %v5628_v34  ;;  %v5675_v34 = vld [vmem:[#allocation5 + $0x20] ss:$8 sps:$4 sm:$0xff]  }
 0x164   :  { %819 = vmatmul.mubr.bf16.gmra.mxu1 %v5630_v35  ;;  %v5676_v35 = vld [vmem:[%s8474_s3 + $0x34] ss:$8 sps:$4 sm:$0xff]  }
 0x165   :  { %826 = vmatprep.mubr.bf16.mxu1 %v5631_v36  ;;  %v5679_v36 = vld [vmem:[#allocation5 + $0x34] ss:$8 sps:$4 sm:$0xff]  }
 0x16c   :  { %827 = vmatmul.mubr.bf16.gmra.mxu1 %v5633_v37  ;;  %v5678_v37 = vld [vmem:[%s8474_s3 + $0x30] ss:$8 sps:$4 sm:$0xff]  }
 0x16d   :  { %834 = vmatprep.mubr.bf16.mxu1 %v5634_v38  ;;  %v5681_v38 = vld [vmem:[#allocation5 + $0x30] ss:$8 sps:$4 sm:$0xff]  }
 0x174   :  { %835 = vmatmul.mubr.bf16.gmra.mxu1 %v5636_v39  ;;  %v5682_v39 = vld [vmem:[%s8474_s3 + $0x44] ss:$8 sps:$4 sm:$0xff]  }
 0x175   :  { %842 = vmatprep.mubr.bf16.mxu1 %v5637_v40  ;;  %v5685_v40 = vld [vmem:[#allocation5 + $0x44] ss:$8 sps:$4 sm:$0xff]  }
 0x176   :  { %v6307_v41 = vpop.permute.xlu0 %1129  ;;  %v6309_v42 = vpop.permute.xlu1 %1113 }
 0x17a   :  { %v1132_v46 = vpop.permute.xlu0 %1131  ;;  %v1116_v47 = vpop.permute.xlu1 %1115 }
 0x17c   :  { %843 = vmatmul.mubr.bf16.gmra.mxu1 %v5639_v44  ;;  %v5691_v44 = vld [vmem:[#allocation5 + $0x54] ss:$8 sps:$4 sm:$0xff]  }
 0x17d   :  { %850 = vmatprep.mubr.bf16.mxu1 %v5640_v45  ;;  %v5690_v45 = vld [vmem:[%s8474_s3 + $0x50] ss:$8 sps:$4 sm:$0xff]  }
 0x17e   :  { %v1536_v48 = vpop.permute.xlu0 %1535  ;;  %v1520_v49 = vpop.permute.xlu1 %1519 }
 0x182   :  { %v1134_v52 = vpop.permute.xlu0 %1133  ;;  %v1118_v53 = vpop.permute.xlu1 %1117 }
 0x184   :  { %851 = vmatmul.mubr.bf16.gmra.mxu1 %v5642_v50  ;;  %v5699_v50 = vld [vmem:[#allocation5 + $0x60] ss:$8 sps:$4 sm:$0xff]  }
 0x185   :  { %858 = vmatprep.mubr.bf16.mxu1 %v5643_v51  ;;  %v5700_v51 = vld [vmem:[%s8474_s3 + $0x74] ss:$8 sps:$4 sm:$0xff]  }
 0x186   :  { %v1538_v54 = vpop.permute.xlu0 %1537 }
 0x187   :  { %v1522_v55 = vpop.permute.xlu1 %1521 }
 0x18a   :  { %v1136_v58 = vpop.permute.xlu0 %1135 }
 0x18b   :  { %v1120_v59 = vpop.permute.xlu1 %1119 }
 0x18c   :  { %859 = vmatmul.mubr.bf16.gmra.mxu1 %v5645_v56  ;;  %v5711_v56 = vld [vmem:[#allocation5 + $0x84] ss:$8 sps:$4 sm:$0xff]  }
 0x18d   :  { %866 = vmatprep.mubr.bf16.mxu1 %v5646_v57  ;;  %v5708_v57 = vld [vmem:[%s8474_s3 + $0x80] ss:$8 sps:$4 sm:$0xff]  }
 0x18e   :  { %v1540_v60 = vpop.permute.xlu0 %1539 }
 0x18f   :  { %v1524_v61 = vpop.permute.xlu1 %1523 }
 0x192   :  { %v1138_v0 = vpop.permute.xlu0 %1137 }
 0x193   :  { %v1542_v1 = vpop.permute.xlu1 %1541  ;;  %4675 = vmatprep.subr.bf16.mxu0 %v1138_v0 }
 0x194   :  { %4787 = vmatprep.subr.bf16.mxu1 %v1542_v1  ;;  %867 = vmatmul.mubr.bf16.gmra.mxu1 %v5648_v62 }
 0x195   :  { %874 = vmatprep.mubr.bf16.mxu1 %v5649_v63 }
 0x196   :  { %v1122_v2 = vpop.permute.xlu0 %1121 }
 0x197   :  { %v1526_v3 = vpop.permute.xlu1 %1525  ;;  %4676 = vmatpush3.bf16.msra.mxu0 %v1122_v2  ;;  %v5714_v2 = vld [vmem:[%s8474_s3 + $0x90] ss:$8 sps:$4 sm:$0xff]  }
 0x198   :  { %4788 = vmatpush3.bf16.msra.mxu1 %v1526_v3  ;;  %4677 = vmatprep.subr.bf16.mxu0 %v1136_v58  ;;  %v5709_v58 = vld [vmem:[#allocation5 + $0x80] ss:$8 sps:$4 sm:$0xff]  }
 0x199   :  { %4789 = vmatprep.subr.bf16.mxu1 %v1540_v60 }
 0x19a   :  { %v1534_v5 = vpop.permute.xlu0 %1533 }
 0x19b   :  { %v1518_v7 = vpop.permute.xlu1 %1517  ;;  %4678 = vmatpush3.bf16.msra.mxu0 %v1120_v59  ;;  %v5712_v59 = vld [vmem:[%s8474_s3 + $0x94] ss:$8 sps:$4 sm:$0xff]  }
 0x19c   :  { %4790 = vmatpush3.bf16.msra.mxu1 %v1524_v61  ;;  %4679 = vmatprep.subr.bf16.mxu0 %v1134_v52  ;;  %v5703_v52 = vld [vmem:[#allocation5 + $0x74] ss:$8 sps:$4 sm:$0xff]  }
 0x19d   :  { %4791 = vmatprep.subr.bf16.mxu1 %v1538_v54  ;;  %875 = vmatmul.mubr.bf16.gmra.mxu1 %v5651_v4  ;;  %v5705_v54 = vld [vmem:[#allocation5 + $0x70] ss:$8 sps:$4 sm:$0xff]   ;;  %v5717_v61 = vld [vmem:[#allocation5 + $0x94] ss:$8 sps:$4 sm:$0xff]  }
 0x19e   :  { %v1128_v8 = vpop.permute.xlu0 %1127  ;;  %882 = vmatprep.mubr.bf16.mxu1 %v5652_v6  ;;  %v5715_v4 = vld [vmem:[#allocation5 + $0x90] ss:$8 sps:$4 sm:$0xff]  }
 0x19f   :  { %v1112_v9 = vpop.permute.xlu1 %1111  ;;  %4680 = vmatpush3.bf16.msra.mxu0 %v1118_v53  ;;  %v5702_v53 = vld [vmem:[%s8474_s3 + $0x70] ss:$8 sps:$4 sm:$0xff]  }
 0x1a0   :  { %4792 = vmatpush3.bf16.msra.mxu1 %v1522_v55  ;;  %4681 = vmatprep.subr.bf16.mxu0 %v1132_v46  ;;  %v5693_v46 = vld [vmem:[#allocation5 + $0x50] ss:$8 sps:$4 sm:$0xff]   ;;  %v5706_v55 = vld [vmem:[%s8474_s3 + $0x84] ss:$8 sps:$4 sm:$0xff]  }
 0x1a1   :  { %4793 = vmatprep.subr.bf16.mxu1 %v1536_v48  ;;  %v5697_v48 = vld [vmem:[#allocation5 + $0x64] ss:$8 sps:$4 sm:$0xff]  }
 0x1a2   :  { %v1532_v11 = vpop.permute.xlu0 %1531 }
 0x1a3   :  { %v1516_v13 = vpop.permute.xlu1 %1515  ;;  %4682 = vmatpush3.bf16.msra.mxu0 %v1116_v47  ;;  %v5694_v47 = vld [vmem:[%s8474_s3 + $0x64] ss:$8 sps:$4 sm:$0xff]  }
 0x1a4   :  { %4794 = vmatpush3.bf16.msra.mxu1 %v1520_v49  ;;  %4683 = vmatprep.subr.bf16.mxu0 %v6307_v41  ;;  %v5684_v41 = vld [vmem:[%s8474_s3 + $0x40] ss:$8 sps:$4 sm:$0xff]  }
 0x1a5   :  { %4795 = vmatprep.subr.bf16.mxu1 %v1534_v5  ;;  %883 = vmatmul.mubr.bf16.gmra.mxu1 %v5654_v10  ;;  %v5696_v49 = vld [vmem:[%s8474_s3 + $0x60] ss:$8 sps:$4 sm:$0xff]   ;;  %v5718_v5 = vld [vmem:[%s8474_s3 + $0xa4] ss:$8 sps:$4 sm:$0xff]  }
 0x1a6   :  { %v1126_v14 = vpop.permute.xlu0 %1125  ;;  %890 = vmatprep.mubr.bf16.mxu1 %v5655_v12  ;;  %v5720_v12 = vld [vmem:[%s8474_s3 + $0xa0] ss:$8 sps:$4 sm:$0xff]  }
 0x1a7   :  { %v1110_v15 = vpop.permute.xlu1 %1109  ;;  %4684 = vmatpush3.bf16.msra.mxu0 %v6309_v42  ;;  %v5687_v42 = vld [vmem:[#allocation5 + $0x40] ss:$8 sps:$4 sm:$0xff]  }
 0x1a8   :  { %4796 = vmatpush3.bf16.msra.mxu1 %v1518_v7  ;;  %4685 = vmatprep.subr.bf16.mxu0 %v1128_v8  ;;  %v5723_v7 = vld [vmem:[#allocation5 + $0xa4] ss:$8 sps:$4 sm:$0xff]  }
 0x1a9   :  { %4797 = vmatprep.subr.bf16.mxu1 %v1532_v11 }
 0x1aa   :  { %v1530_v17 = vpop.permute.xlu0 %1529 }
 0x1ab   :  { %v1514_v19 = vpop.permute.xlu1 %1513  ;;  %4686 = vmatpush3.bf16.msra.mxu0 %v1112_v9 }
 0x1ac   :  { %4798 = vmatpush3.bf16.msra.mxu1 %v1516_v13  ;;  %4687 = vmatprep.subr.bf16.mxu0 %v1126_v14  ;;  %v5721_v14 = vld [vmem:[#allocation5 + $0xa0] ss:$8 sps:$4 sm:$0xff]  }
 0x1ad   :  { %4799 = vmatprep.subr.bf16.mxu1 %v1530_v17  ;;  %891 = vmatmul.mubr.bf16.gmra.mxu1 %v5657_v16  ;;  %v5729_v17 = vld [vmem:[#allocation5 + $0xb4] ss:$8 sps:$4 sm:$0xff]  }
 0x1ae   :  { %v1124_v20 = vpop.permute.xlu0 %1123  ;;  %1594 = vmatprep.mubr.bf16.mxu1 %v5663_v18 }
 0x1af   :  { %v1108_v21 = vpop.permute.xlu1 %1107  ;;  %4688 = vmatpush3.bf16.msra.mxu0 %v1110_v15  ;;  %v5724_v15 = vld [vmem:[%s8474_s3 + $0xb4] ss:$8 sps:$4 sm:$0xff]  }
 0x1b0   :  { %4800 = vmatpush3.bf16.msra.mxu1 %v1514_v19  ;;  %4689 = vmatprep.subr.bf16.mxu0 %v1124_v20 }
 0x1b2   :  { %v1528_v22 = vpop.permute.xlu0 %1527 }
 0x1b3   :  { %v1512_v25 = vpop.permute.xlu1 %1511  ;;  %4690 = vmatpush3.bf16.msra.mxu0 %v1108_v21  ;;  %4801 = vmatprep.subr.bf16.mxu1 %v1528_v22  ;;  %v5726_v22 = vld [vmem:[%s8474_s3 + $0xb0] ss:$8 sps:$4 sm:$0xff]  }
 0x1b4   :  { %4802 = vmatpush3.bf16.msra.mxu1 %v1512_v25  ;;  %v5727_v25 = vld [vmem:[#allocation5 + $0xb0] ss:$8 sps:$4 sm:$0xff]  }
 0x1b6   :  { %1191 = vmatmul.mubr.bf16.vlgmr.msra.gmra.mxu0 %v5658_v23 }
 0x1b7   :  { %1595 = vmatmul.mubr.bf16.vlgmr.msra.gmra.mxu1 %v5661_v26  ;;  %1198 = vmatprep.mubr.bf16.mxu0 %v5664_v27  ;;  %v5730_v26 = vld [vmem:[%s8474_s3 + $0xc4] ss:$8 sps:$4 sm:$0xff]  }
 0x1b8   :  { %1602 = vmatprep.mubr.bf16.mxu1 %v5667_v28  ;;  %v5735_v28 = vld [vmem:[#allocation5 + $0xc4] ss:$8 sps:$4 sm:$0xff]  }
 0x1be   :  { %1199 = vmatmul.mubr.bf16.gmra.mxu0 %v5666_v29 }
 0x1bf   :  { %1603 = vmatmul.mubr.bf16.gmra.mxu1 %v5669_v30  ;;  %1206 = vmatprep.mubr.bf16.mxu0 %v5670_v31 }
 0x1c0   :  { %1610 = vmatprep.mubr.bf16.mxu1 %v5673_v32 }
 0x1c6   :  { %1207 = vmatmul.mubr.bf16.gmra.mxu0 %v5672_v33  ;;  %v5732_v33 = vld [vmem:[%s8474_s3 + $0xc0] ss:$8 sps:$4 sm:$0xff]  }
 0x1c7   :  { %1611 = vmatmul.mubr.bf16.gmra.mxu1 %v5675_v34  ;;  %1214 = vmatprep.mubr.bf16.mxu0 %v5676_v35  ;;  %v5733_v35 = vld [vmem:[#allocation5 + $0xc0] ss:$8 sps:$4 sm:$0xff]  }
 0x1c8   :  { %1618 = vmatprep.mubr.bf16.mxu1 %v5679_v36  ;;  %v5736_v36 = vld [vmem:[%s8474_s3 + $0xd4] ss:$8 sps:$4 sm:$0xff]  }
 0x1ce   :  { %1215 = vmatmul.mubr.bf16.gmra.mxu0 %v5678_v37 }
 0x1cf   :  { %1619 = vmatmul.mubr.bf16.gmra.mxu1 %v5681_v38  ;;  %1222 = vmatprep.mubr.bf16.mxu0 %v5682_v39  ;;  %v5741_v38 = vld [vmem:[#allocation5 + $0xd4] ss:$8 sps:$4 sm:$0xff]  }
 0x1d0   :  { %1626 = vmatprep.mubr.bf16.mxu1 %v5685_v40 }
 0x1d6   :  { %1223 = vmatmul.mubr.bf16.gmra.mxu0 %v5684_v41 }
 0x1d7   :  { %1627 = vmatmul.mubr.bf16.gmra.mxu1 %v5687_v42  ;;  %1230 = vmatprep.mubr.bf16.mxu0 %v5688_v43  ;;  %v5738_v43 = vld [vmem:[%s8474_s3 + $0xd0] ss:$8 sps:$4 sm:$0xff]  }
 0x1d8   :  { %1634 = vmatprep.mubr.bf16.mxu1 %v5691_v44  ;;  %v5739_v44 = vld [vmem:[#allocation5 + $0xd0] ss:$8 sps:$4 sm:$0xff]  }
 0x1de   :  { %1231 = vmatmul.mubr.bf16.gmra.mxu0 %v5690_v45  ;;  %v5742_v45 = vld [vmem:[%s8474_s3 + $0xe4] ss:$8 sps:$4 sm:$0xff]  }
 0x1df   :  { %1635 = vmatmul.mubr.bf16.gmra.mxu1 %v5693_v46  ;;  %1238 = vmatprep.mubr.bf16.mxu0 %v5694_v47  ;;  %v5747_v47 = vld [vmem:[#allocation5 + $0xe4] ss:$8 sps:$4 sm:$0xff]  }
 0x1e0   :  { %1642 = vmatprep.mubr.bf16.mxu1 %v5697_v48 }
 0x1e6   :  { %1239 = vmatmul.mubr.bf16.gmra.mxu0 %v5696_v49 }
 0x1e7   :  { %1643 = vmatmul.mubr.bf16.gmra.mxu1 %v5699_v50  ;;  %1246 = vmatprep.mubr.bf16.mxu0 %v5700_v51 }
 0x1e8   :  { %1650 = vmatprep.mubr.bf16.mxu1 %v5703_v52  ;;  %v5744_v52 = vld [vmem:[%s8474_s3 + $0xe0] ss:$8 sps:$4 sm:$0xff]  }
 0x1ee   :  { %1247 = vmatmul.mubr.bf16.gmra.mxu0 %v5702_v53  ;;  %v5745_v53 = vld [vmem:[#allocation5 + $0xe0] ss:$8 sps:$4 sm:$0xff]  }
 0x1ef   :  { %1651 = vmatmul.mubr.bf16.gmra.mxu1 %v5705_v54  ;;  %1254 = vmatprep.mubr.bf16.mxu0 %v5706_v55  ;;  %v5748_v54 = vld [vmem:[%s8474_s3 + $0xf4] ss:$8 sps:$4 sm:$0xff]  }
 0x1f0   :  { %1658 = vmatprep.mubr.bf16.mxu1 %v5711_v56  ;;  %v5753_v56 = vld [vmem:[#allocation5 + $0xf4] ss:$8 sps:$4 sm:$0xff]  }
 0x1f4   :  { %v4579_v60 = vpop.f32.mrf.mxu1 }
 0x1f6   :  { %1255 = vmatmul.mubr.bf16.gmra.mxu0 %v5708_v57  ;;  %v4580_v62 = vpop.f32.mrf.mxu1 }
 0x1f7   :  { %1659 = vmatmul.mubr.bf16.gmra.mxu1 %v5709_v58  ;;  %v6411_v63 = vadd.f32 %v4580_v62, %v4579_v60  ;;  %1262 = vmatprep.mubr.bf16.mxu0 %v5712_v59  ;;  %v5751_v62 = vld [vmem:[#allocation5 + $0xf0] ss:$8 sps:$4 sm:$0xff]  }
 0x1f8   :  { %v4582_v0 = vpop.f32.mrf.mxu1  ;;  %1666 = vmatprep.mubr.bf16.mxu1 %v5717_v61  ;;  %v5750_v61 = vld [vmem:[%s8474_s3 + $0xf0] ss:$8 sps:$4 sm:$0xff]  }
 0x1fa   :  { %v4583_v1 = vpop.f32.mrf.mxu1 }
 0x1fb   :  { %v6416_v3 = vadd.f32 %v4583_v1, %v4582_v0 }
 0x1fc   :  { %v4585_v6 = vpop.f32.mrf.mxu1 }
 0x1fe   :  { %1263 = vmatmul.mubr.bf16.gmra.mxu0 %v5714_v2  ;;  %v4586_v8 = vpop.f32.mrf.mxu1 }
 0x1ff   :  { %1667 = vmatmul.mubr.bf16.gmra.mxu1 %v5715_v4  ;;  %v6421_v9 = vadd.f32 %v4586_v8, %v4585_v6  ;;  %1270 = vmatprep.mubr.bf16.mxu0 %v5718_v5 }
 0x200   :  { %v4588_v10 = vpop.f32.mrf.mxu1  ;;  %1674 = vmatprep.mubr.bf16.mxu1 %v5723_v7 }
 0x202   :  { %v4589_v11 = vpop.f32.mrf.mxu1 }
 0x203   :  { %v6426_v13 = vadd.f32 %v4589_v11, %v4588_v10 }
 0x204   :  { %v4591_v16 = vpop.f32.mrf.mxu1 }
 0x206   :  { %1271 = vmatmul.mubr.bf16.gmra.mxu0 %v5720_v12  ;;  %v4592_v18 = vpop.f32.mrf.mxu1 }
 0x207   :  { %1675 = vmatmul.mubr.bf16.gmra.mxu1 %v5721_v14  ;;  %v6431_v19 = vadd.f32 %v4592_v18, %v4591_v16  ;;  %1278 = vmatprep.mubr.bf16.mxu0 %v5724_v15 }
 0x208   :  { %v4594_v20 = vpop.f32.mrf.mxu1  ;;  %1682 = vmatprep.mubr.bf16.mxu1 %v5729_v17 }
 0x20a   :  { %v4595_v21 = vpop.f32.mrf.mxu1 }
 0x20b   :  { %v6436_v23 = vadd.f32 %v4595_v21, %v4594_v20 }
 0x20c   :  { %v4597_v27 = vpop.f32.mrf.mxu1 }
 0x20e   :  { %1279 = vmatmul.mubr.bf16.gmra.mxu0 %v5726_v22  ;;  %v4598_v29 = vpop.f32.mrf.mxu1 }
 0x20f   :  { %1683 = vmatmul.mubr.bf16.gmra.mxu1 %v5727_v25  ;;  %v6441_v30 = vadd.f32 %v4598_v29, %v4597_v27  ;;  %1286 = vmatprep.mubr.bf16.mxu0 %v5730_v26 }
 0x210   :  { %v4600_v31 = vpop.f32.mrf.mxu1  ;;  %1690 = vmatprep.mubr.bf16.mxu1 %v5735_v28 }
 0x212   :  { %v4601_v32 = vpop.f32.mrf.mxu1 }
 0x213   :  { %v6446_v34 = vadd.f32 %v4601_v32, %v4600_v31 }
 0x214   :  { %v4603_v37 = vpop.f32.mrf.mxu1 }
 0x216   :  { %1287 = vmatmul.mubr.bf16.gmra.mxu0 %v5732_v33  ;;  %v4604_v39 = vpop.f32.mrf.mxu1 }
 0x217   :  { %1691 = vmatmul.mubr.bf16.gmra.mxu1 %v5733_v35  ;;  %v6451_v40 = vadd.f32 %v4604_v39, %v4603_v37  ;;  %1294 = vmatprep.mubr.bf16.mxu0 %v5736_v36 }
 0x218   :  { %v6453_v41 = vpop.f32.mrf.mxu1  ;;  %1698 = vmatprep.mubr.bf16.mxu1 %v5741_v38 }
 0x21a   :  { %v6455_v42 = vpop.f32.mrf.mxu1 }
 0x21c   :  { %v4609_v46 = vpop.f32.mrf.mxu1 }
 0x21e   :  { %1295 = vmatmul.mubr.bf16.gmra.mxu0 %v5738_v43  ;;  %v4610_v48 = vpop.f32.mrf.mxu1 }
 0x21f   :  { %1699 = vmatmul.mubr.bf16.gmra.mxu1 %v5739_v44  ;;  %v6463_v49 = vadd.f32 %v4610_v48, %v4609_v46  ;;  %1302 = vmatprep.mubr.bf16.mxu0 %v5742_v45 }
 0x220   :  { %v6465_v50 = vpop.f32.mrf.mxu1  ;;  %1706 = vmatprep.mubr.bf16.mxu1 %v5747_v47 }
 0x222   :  { %v6467_v51 = vpop.f32.mrf.mxu1 }
 0x224   :  { %v4615_v55 = vpop.f32.mrf.mxu1 }
 0x226   :  { %1303 = vmatmul.mubr.bf16.gmra.mxu0 %v5744_v52  ;;  %v4616_v57 = vpop.f32.mrf.mxu1 }
 0x227   :  { %1707 = vmatmul.mubr.bf16.gmra.mxu1 %v5745_v53  ;;  %v6475_v58 = vadd.f32 %v4616_v57, %v4615_v55  ;;  %1310 = vmatprep.mubr.bf16.mxu0 %v5748_v54  ;;  %v2087_v53 = vld [vmem:[#allocation7 + $0x58] sm:$0xff]  ;;  %v2086_v55 = vld [vmem:[#allocation7 + $0x50] sm:$0xff]  ;;  %v2085_v57 = vld [vmem:[#allocation7 + $0x48] sm:$0xff] }
 0x228   :  { %v6477_v59 = vpop.f32.mrf.mxu1  ;;  %1714 = vmatprep.mubr.bf16.mxu1 %v5753_v56  ;;  %5436 = vmatprep.subr.mxu0 %v2087_v53 }
 0x229   :  { %5437 = vmatpush3.msra.mxu0 %v2087_v53  ;;  %v2078_v53 = vld [vmem:[#allocation7 + $0x10] sm:$0xff] }
 0x22a   :  { %v6479_v60 = vpop.f32.mrf.mxu1  ;;  %5438 = vmatprep.subr.mxu0 %v2086_v55 }
 0x22b   :  { %5439 = vmatpush3.msra.mxu0 %v2086_v55 }
 0x22c   :  { %v4621_v0 = vpop.f32.mrf.mxu1  ;;  %5440 = vmatprep.subr.mxu0 %v2085_v57 }
 0x22d   :  { %5441 = vmatpush3.msra.mxu0 %v2085_v57 }
 0x22e   :  { %1311 = vmatmul.mubr.bf16.gmra.mxu0 %v5750_v61  ;;  %v4622_v1 = vpop.f32.mrf.mxu1 }
 0x22f   :  { %1715 = vmatmul.mubr.bf16.gmra.mxu1 %v5751_v62  ;;  %v6484_v2 = vadd.f32 %v4622_v1, %v4621_v0  ;;  %v2084_v0 = vld [vmem:[#allocation7 + $0x40] sm:$0xff] }
 0x230   :  { %v6486_v4 = vpop.f32.mrf.mxu1  ;;  %2725 = vmatprep.mubr.bf16.mxu1 %v6249_v24  ;;  %5442 = vmatprep.subr.mxu0 %v2084_v0 }
 0x231   :  { %5443 = vmatpush3.msra.mxu0 %v2084_v0 }
 0x232   :  { %v6489_v5 = vpop.f32.mrf.mxu1 }
 0x234   :  { %v4627_v6 = vpop.f32.mrf.mxu1 }
 0x236   :  { %v4628_v7 = vpop.f32.mrf.mxu1 }
 0x237   :  { %v6491_v8 = vadd.f32 %v4628_v7, %v4627_v6  ;;  %v2083_v6 = vld [vmem:[#allocation7 + $0x38] sm:$0xff]  ;;  %v2082_v7 = vld [vmem:[#allocation7 + $0x30] sm:$0xff] }
 0x238   :  { %v6493_v10 = vpop.f32.mrf.mxu1  ;;  %5444 = vmatprep.subr.mxu0 %v2083_v6 }
 0x239   :  { %5445 = vmatpush3.msra.mxu0 %v2083_v6  ;;  %v2077_v6 = vld [vmem:[#allocation7 + $0x8] sm:$0xff] }
 0x23a   :  { %v6495_v11 = vpop.f32.mrf.mxu1  ;;  %5446 = vmatprep.subr.mxu0 %v2082_v7 }
 0x23b   :  { %5447 = vmatpush3.msra.mxu0 %v2082_v7 }
 0x23c   :  { %v4633_v12 = vpop.f32.mrf.mxu1 }
 0x23e   :  { %v4634_v14 = vpop.f32.mrf.mxu1 }
 0x23f   :  { %v6497_v15 = vadd.f32 %v4634_v14, %v4633_v12 }
 0x240   :  { %v6499_v16 = vpop.f32.mrf.mxu1 }
 0x242   :  { %v6501_v17 = vpop.f32.mrf.mxu1 }
 0x244   :  { %v4639_v18 = vpop.f32.mrf.mxu1 }
 0x246   :  { %v4640_v24 = vpop.f32.mrf.mxu1 }
 0x247   :  { %v6503_v20 = vadd.f32 %v4640_v24, %v4639_v18  ;;  %v2081_v18 = vld [vmem:[#allocation7 + $0x28] sm:$0xff] }
 0x248   :  { %v6505_v21 = vpop.f32.mrf.mxu1  ;;  %5448 = vmatprep.subr.mxu0 %v2081_v18 }
 0x249   :  { %5449 = vmatpush3.msra.mxu0 %v2081_v18 }
 0x24a   :  { %v6507_v22 = vpop.f32.mrf.mxu1 }
 0x24c   :  { %v4645_v25 = vpop.f32.mrf.mxu1 }
 0x24e   :  { %v4646_v26 = vpop.f32.mrf.mxu1 }
 0x24f   :  { %v6509_v27 = vadd.f32 %v4646_v26, %v4645_v25  ;;  %v6539_v25 = vpop.permute.xlu0 %1155 }
 0x250   :  { %v6511_v28 = vpop.f32.mrf.mxu1 }
 0x252   :  { %v6513_v29 = vpop.f32.mrf.mxu1 }
 0x254   :  { %v4651_v31 = vpop.f32.mrf.mxu1 }
 0x256   :  { %v4652_v32 = vpop.f32.mrf.mxu1 }
 0x257   :  { %v6515_v33 = vadd.f32 %v4652_v32, %v4651_v31  ;;  %v2080_v32 = vld [vmem:[#allocation7 + $0x20] sm:$0xff] }
 0x258   :  { %v6517_v35 = vpop.f32.mrf.mxu1  ;;  %5450 = vmatprep.subr.mxu0 %v2080_v32 }
 0x259   :  { %5451 = vmatpush3.msra.mxu0 %v2080_v32 }
 0x25a   :  { %v6519_v36 = vpop.f32.mrf.mxu1 }
 0x25d   :  { %v4657_v37 = vpop.f32.mrf.mxu1 }
 0x25f   :  { %v4658_v38 = vpop.f32.mrf.mxu1 }
 0x260   :  { %v6521_v39 = vadd.f32 %v4658_v38, %v4657_v37  ;;  %v2079_v38 = vld [vmem:[#allocation7 + $0x18] sm:$0xff] }
 0x261   :  { %v6523_v43 = vpop.f32.mrf.mxu1  ;;  %5452 = vmatprep.subr.mxu0 %v2079_v38 }
 0x262   :  { %5453 = vmatpush3.msra.mxu0 %v2079_v38 }
 0x263   :  { %v6525_v44 = vpop.f32.mrf.mxu1  ;;  %5454 = vmatprep.subr.mxu0 %v2078_v53 }
 0x264   :  { %8528 = vst [vmem:[#allocation10_spill] sm:$0xff] %v6525_v44  ;;  %5455 = vmatpush3.msra.mxu0 %v2078_v53 }
 0x265   :  { %v4663_v45 = vpop.f32.mrf.mxu1  ;;  %5456 = vmatprep.subr.mxu0 %v2077_v6 }
 0x266   :  { %5457 = vmatpush3.msra.mxu0 %v2077_v6 }
 0x267   :  { %v4664_v46 = vpop.f32.mrf.mxu1 }
 0x268   :  { %v6527_v47 = vadd.f32 %v4664_v46, %v4663_v45 }
 0x269   :  { %v6529_v48 = vpop.f32.mrf.mxu1 }
 0x26a   :  { %8529 = vst [vmem:[#allocation11_spill] sm:$0xff] %v6527_v47  ;;  %8530 = vst [vmem:[#allocation12_spill] sm:$0xff] %v6529_v48 }
 0x26b   :  { %v6531_v52 = vpop.f32.mrf.mxu1 }
 0x26c   :  { %8531 = vst [vmem:[#allocation13_spill] sm:$0xff] %v6531_v52 }
 0x26d   :  { %v4669_v54 = vpop.f32.mrf.mxu1 }
 0x26f   :  { %v4670_v56 = vpop.f32.mrf.mxu1 }
 0x270   :  { %v6533_v61 = vadd.f32 %v4670_v56, %v4669_v54 }
 0x271   :  { %v6535_v62 = vpop.f32.mrf.mxu1 }
 0x272   :  { %8532 = vst [vmem:[#allocation14_spill] sm:$0xff] %v6533_v61  ;;  %8533 = vst [vmem:[#allocation15_spill] sm:$0xff] %v6535_v62 }
 0x273   :  { %v6537_v1 = vpop.f32.mrf.mxu1 }
 0x274   :  { %8534 = vst [vmem:[#allocation16_spill] sm:$0xff] %v6537_v1 }
 0x276   :  { %v4691_v12 = vpop.f32.mrf.mxu0 }
 0x277   :  { %v4803_v14 = vpop.f32.mrf.mxu1 }
 0x278   :  { %v4692_v24 = vpop.f32.mrf.mxu0 }
 0x279   :  { %v4693_v26 = vadd.f32 %v4692_v24, %v4691_v12  ;;  %v4804_v31 = vpop.f32.mrf.mxu1 }
 0x27a   :  { %v4694_v37 = vpop.f32.mrf.mxu0  ;;  %v4805_v18 = vadd.f32 %v4804_v31, %v4803_v14 }
 0x27b   :  { %v4806_v45 = vpop.f32.mrf.mxu1  ;;  %v1193_v46 = vadd.f32 %v4693_v26, %v6539_v25  ;;  %v2076_v26 = vld [vmem:[#allocation7] sm:$0xff] }
 0x27c   :  { %v4695_v54 = vpop.f32.mrf.mxu0  ;;  %5458 = vmatprep.subr.mxu0 %v2076_v26 }
 0x27d   :  { %v4696_v55 = vadd.f32 %v4695_v54, %v4694_v37  ;;  %v4807_v56 = vpop.f32.mrf.mxu1  ;;  %v1319_v57 = vmax.f32 %v1193_v46, 0.0  ;;  %v6544_v54 = vpop.permute.xlu1 %1559  ;;  %5459 = vmatpush3.msra.mxu0 %v2076_v26 }
 0x27e   :  { %v4697_v0 = vpop.f32.mrf.mxu0  ;;  %v1597_v14 = vadd.f32 %v4805_v18, %v6544_v54  ;;  %v4808_v31 = vadd.f32 %v4807_v56, %v4806_v45 }
 0x27f   :  { %v1196_v7 = vadd.f32 %v4696_v55, %v6539_v25  ;;  %1787 = vrot.lane.b32.xlu0 %v1319_v57, %s5926_s14  ;;  %v4809_v12 = vpop.f32.mrf.mxu1 }
 0x280   :  { %v4698_v24 = vpop.f32.mrf.mxu0  ;;  %v1723_v52 = vmax.f32 %v1597_v14, 0.0  ;;  %v1600_v26 = vadd.f32 %v4808_v31, %v6544_v54 }
 0x281   :  { %v4699_v32 = vadd.f32 %v4698_v24, %v4697_v0  ;;  %v4810_v1 = vpop.f32.mrf.mxu1  ;;  %v1320_v37 = vmax.f32 %v1196_v7, 0.0 }
 0x282   :  { %v4700_v38 = vpop.f32.mrf.mxu0  ;;  %v1724_v14 = vmax.f32 %v1600_v26, 0.0 }
 0x283   :  { %v1201_v46 = vadd.f32 %v4699_v32, %v6539_v25  ;;  %1789 = vrot.lane.b32.xlu1 %v1320_v37, %s5926_s14  ;;  %v4812_v55 = vpop.f32.mrf.mxu1  ;;  %v4811_v32 = vadd.f32 %v4810_v1, %v4809_v12 }
 0x284   :  { %v4701_v57 = vpop.f32.mrf.mxu0 }
 0x285   :  { %v1321_v53 = vmax.f32 %v1201_v46, 0.0  ;;  %v4702_v62 = vadd.f32 %v4701_v57, %v4700_v38  ;;  %v4813_v0 = vpop.f32.mrf.mxu1 }
 0x286   :  { %v4703_v24 = vpop.f32.mrf.mxu0 }
 0x287   :  { %v1204_v7 = vadd.f32 %v4702_v62, %v6539_v25  ;;  %1791 = vrot.lane.b32.xlu0 %v1321_v53, %s5926_s14  ;;  %v4815_v6 = vpop.f32.mrf.mxu1  ;;  %v4814_v62 = vadd.f32 %v4813_v0, %v4812_v55 }
 0x288   :  { %v4704_v61 = vpop.f32.mrf.mxu0 }
 0x289   :  { %v4705_v48 = vadd.f32 %v4704_v61, %v4703_v24  ;;  %v4816_v37 = vpop.f32.mrf.mxu1  ;;  %v1322_v47 = vmax.f32 %v1204_v7, 0.0  ;;  %v1605_v61 = vadd.f32 %v4811_v32, %v6544_v54 }
 0x28a   :  { %v4706_v44 = vpop.f32.mrf.mxu0 }
 0x28b   :  { %v1209_v45 = vadd.f32 %v4705_v48, %v6539_v25  ;;  %1793 = vrot.lane.b32.xlu1 %v1322_v47, %s5926_s14  ;;  %v4818_v56 = vpop.f32.mrf.mxu1  ;;  %1915 = vrot.lane.b32.xlu0 %v1723_v52, %s5925_s21  ;;  %v1608_v47 = vadd.f32 %v4814_v62, %v6544_v54  ;;  %v4817_v52 = vadd.f32 %v4816_v37, %v4815_v6 }
 0x28c   :  { %v4707_v18 = vpop.f32.mrf.mxu0 }
 0x28d   :  { %v1323_v38 = vmax.f32 %v1209_v45, 0.0  ;;  %v4708_v46 = vadd.f32 %v4707_v18, %v4706_v44  ;;  %v4819_v57 = vpop.f32.mrf.mxu1  ;;  %v1725_v44 = vmax.f32 %v1605_v61, 0.0  ;;  %v1726_v45 = vmax.f32 %v1608_v47, 0.0 }
 0x28e   :  { %v4709_v1 = vpop.f32.mrf.mxu0  ;;  %v1613_v18 = vadd.f32 %v4817_v52, %v6544_v54 }
 0x28f   :  { %v1212_v12 = vadd.f32 %v4708_v46, %v6539_v25  ;;  %v4821_v31 = vpop.f32.mrf.mxu1  ;;  %1917 = vrot.lane.b32.xlu1 %v1724_v14, %s5925_s21  ;;  %1795 = vrot.lane.b32.xlu0 %v1323_v38, %s5926_s14  ;;  %v4820_v38 = vadd.f32 %v4819_v57, %v4818_v56 }
 0x290   :  { %v4710_v48 = vpop.f32.mrf.mxu0 }
 0x291   :  { %v4711_v55 = vadd.f32 %v4710_v48, %v4709_v1  ;;  %v4822_v53 = vpop.f32.mrf.mxu1  ;;  %v1324_v0 = vmax.f32 %v1212_v12, 0.0  ;;  %v1727_v48 = vmax.f32 %v1613_v18, 0.0 }
 0x292   :  { %v4712_v24 = vpop.f32.mrf.mxu0  ;;  %v4823_v1 = vadd.f32 %v4822_v53, %v4821_v31 }
 0x293   :  { %v1217_v7 = vadd.f32 %v4711_v55, %v6539_v25  ;;  %v4824_v32 = vpop.f32.mrf.mxu1  ;;  %1797 = vrot.lane.b32.xlu1 %v1324_v0, %s5926_s14  ;;  %1919 = vrot.lane.b32.xlu0 %v1725_v44, %s5925_s21  ;;  %v1616_v55 = vadd.f32 %v4820_v38, %v6544_v54 }
 0x294   :  { %v4713_v26 = vpop.f32.mrf.mxu0 }
 0x295   :  { %v1325_v62 = vmax.f32 %v1217_v7, 0.0  ;;  %v4714_v46 = vadd.f32 %v4713_v26, %v4712_v24  ;;  %v4825_v6 = vpop.f32.mrf.mxu1  ;;  %v1621_v24 = vadd.f32 %v4823_v1, %v6544_v54  ;;  %v1728_v18 = vmax.f32 %v1616_v55, 0.0 }
 0x296   :  { %v4715_v37 = vpop.f32.mrf.mxu0  ;;  %v4826_v26 = vadd.f32 %v4825_v6, %v4824_v32 }
 0x297   :  { %v1220_v14 = vadd.f32 %v4714_v46, %v6539_v25  ;;  %v4827_v61 = vpop.f32.mrf.mxu1  ;;  %1921 = vrot.lane.b32.xlu1 %v1726_v45, %s5925_s21  ;;  %1799 = vrot.lane.b32.xlu0 %v1325_v62, %s5926_s14 }
 0x298   :  { %v4716_v12 = vpop.f32.mrf.mxu0 }
 0x299   :  { %v4717_v47 = vadd.f32 %v4716_v12, %v4715_v37  ;;  %v4828_v0 = vpop.f32.mrf.mxu1  ;;  %v1326_v52 = vmax.f32 %v1220_v14, 0.0  ;;  %v1729_v37 = vmax.f32 %v1621_v24, 0.0  ;;  %v1624_v12 = vadd.f32 %v4826_v26, %v6544_v54 }
 0x29a   :  { %v4718_v56 = vpop.f32.mrf.mxu0 }
 0x29b   :  { %v1225_v57 = vadd.f32 %v4717_v47, %v6539_v25  ;;  %v4830_v44 = vpop.f32.mrf.mxu1  ;;  %1801 = vrot.lane.b32.xlu1 %v1326_v52, %s5926_s14  ;;  %1923 = vrot.lane.b32.xlu0 %v1727_v48, %s5925_s21  ;;  %v4829_v48 = vadd.f32 %v4828_v0, %v4827_v61  ;;  %v1730_v26 = vmax.f32 %v1624_v12, 0.0 }
 0x29c   :  { %v4719_v7 = vpop.f32.mrf.mxu0 }
 0x29d   :  { %v1327_v31 = vmax.f32 %v1225_v57, 0.0  ;;  %v4720_v53 = vadd.f32 %v4719_v7, %v4718_v56  ;;  %v4831_v45 = vpop.f32.mrf.mxu1  ;;  %v1629_v7 = vadd.f32 %v4829_v48, %v6544_v54 }
 0x29e   :  { %v4721_v38 = vpop.f32.mrf.mxu0  ;;  %v4832_v56 = vadd.f32 %v4831_v45, %v4830_v44 }
 0x29f   :  { %v1228_v62 = vadd.f32 %v4720_v53, %v6539_v25  ;;  %v4833_v46 = vpop.f32.mrf.mxu1  ;;  %1925 = vrot.lane.b32.xlu1 %v1728_v18, %s5925_s21  ;;  %1803 = vrot.lane.b32.xlu0 %v1327_v31, %s5926_s14  ;;  %v1731_v48 = vmax.f32 %v1629_v7, 0.0 }
 0x2a0   :  { %v4722_v14 = vpop.f32.mrf.mxu0 }
 0x2a1   :  { %v4723_v1 = vadd.f32 %v4722_v14, %v4721_v38  ;;  %v4834_v47 = vpop.f32.mrf.mxu1  ;;  %v1328_v32 = vmax.f32 %v1228_v62, 0.0  ;;  %v1632_v38 = vadd.f32 %v4832_v56, %v6544_v54 }
 0x2a2   :  { %v4724_v6 = vpop.f32.mrf.mxu0 }
 0x2a3   :  { %v1233_v52 = vadd.f32 %v4723_v1, %v6539_v25  ;;  %v4836_v55 = vpop.f32.mrf.mxu1  ;;  %1805 = vrot.lane.b32.xlu1 %v1328_v32, %s5926_s14  ;;  %1927 = vrot.lane.b32.xlu0 %v1729_v37, %s5925_s21  ;;  %v4835_v37 = vadd.f32 %v4834_v47, %v4833_v46 }
 0x2a4   :  { %v4725_v57 = vpop.f32.mrf.mxu0 }
 0x2a5   :  { %v1329_v24 = vmax.f32 %v1233_v52, 0.0  ;;  %v4726_v31 = vadd.f32 %v4725_v57, %v4724_v6  ;;  %v4837_v53 = vpop.f32.mrf.mxu1  ;;  %v1732_v52 = vmax.f32 %v1632_v38, 0.0  ;;  %v1637_v57 = vadd.f32 %v4835_v37, %v6544_v54 }
 0x2a6   :  { %v4727_v61 = vpop.f32.mrf.mxu0 }
 0x2a7   :  { %v1236_v0 = vadd.f32 %v4726_v31, %v6539_v25  ;;  %v4839_v18 = vpop.f32.mrf.mxu1  ;;  %1929 = vrot.lane.b32.xlu1 %v1730_v26, %s5925_s21  ;;  %1807 = vrot.lane.b32.xlu0 %v1329_v24, %s5926_s14  ;;  %v4838_v24 = vadd.f32 %v4837_v53, %v4836_v55  ;;  %v1733_v37 = vmax.f32 %v1637_v57, 0.0 }
 0x2a8   :  { %v4728_v62 = vpop.f32.mrf.mxu0 }
 0x2a9   :  { %v4729_v44 = vadd.f32 %v4728_v62, %v4727_v61  ;;  %v4840_v45 = vpop.f32.mrf.mxu1  ;;  %v1330_v14 = vmax.f32 %v1236_v0, 0.0  ;;  %v1640_v62 = vadd.f32 %v4838_v24, %v6544_v54 }
 0x2aa   :  { %v4730_v1 = vpop.f32.mrf.mxu0  ;;  %v4841_v61 = vadd.f32 %v4840_v45, %v4839_v18 }
 0x2ab   :  { %v1241_v32 = vadd.f32 %v4729_v44, %v6539_v25  ;;  %v4842_v12 = vpop.f32.mrf.mxu1  ;;  %1809 = vrot.lane.b32.xlu1 %v1330_v14, %s5926_s14  ;;  %1931 = vrot.lane.b32.xlu0 %v1731_v48, %s5925_s21  ;;  %v1734_v24 = vmax.f32 %v1640_v62, 0.0 }
 0x2ac   :  { %v4731_v6 = vpop.f32.mrf.mxu0 }
 0x2ad   :  { %v1331_v56 = vmax.f32 %v1241_v32, 0.0  ;;  %v4732_v31 = vadd.f32 %v4731_v6, %v4730_v1  ;;  %v4843_v46 = vpop.f32.mrf.mxu1  ;;  %v1645_v1 = vadd.f32 %v4841_v61, %v6544_v54 }
 0x2ae   :  { %v4733_v47 = vpop.f32.mrf.mxu0  ;;  %v4844_v6 = vadd.f32 %v4843_v46, %v4842_v12 }
 0x2af   :  { %v1244_v26 = vadd.f32 %v4732_v31, %v6539_v25  ;;  %v4845_v7 = vpop.f32.mrf.mxu1  ;;  %1933 = vrot.lane.b32.xlu1 %v1732_v52, %s5925_s21  ;;  %1811 = vrot.lane.b32.xlu0 %v1331_v56, %s5926_s14 }
 0x2b0   :  { %v4734_v0 = vpop.f32.mrf.mxu0 }
 0x2b1   :  { %v4735_v44 = vadd.f32 %v4734_v0, %v4733_v47  ;;  %v4846_v38 = vpop.f32.mrf.mxu1  ;;  %v1332_v14 = vmax.f32 %v1244_v26, 0.0  ;;  %v1735_v47 = vmax.f32 %v1645_v1, 0.0  ;;  %v1648_v0 = vadd.f32 %v4844_v6, %v6544_v54 }
 0x2b2   :  { %v4736_v55 = vpop.f32.mrf.mxu0 }
 0x2b3   :  { %v1249_v53 = vadd.f32 %v4735_v44, %v6539_v25  ;;  %v4848_v48 = vpop.f32.mrf.mxu1  ;;  %1813 = vrot.lane.b32.xlu1 %v1332_v14, %s5926_s14  ;;  %1935 = vrot.lane.b32.xlu0 %v1733_v37, %s5925_s21  ;;  %v4847_v44 = vadd.f32 %v4846_v38, %v4845_v7 }
 0x2b4   :  { %v4737_v32 = vpop.f32.mrf.mxu0 }
 0x2b5   :  { %v1333_v18 = vmax.f32 %v1249_v53, 0.0  ;;  %v4738_v45 = vadd.f32 %v4737_v32, %v4736_v55  ;;  %v4849_v52 = vpop.f32.mrf.mxu1  ;;  %v1736_v32 = vmax.f32 %v1648_v0, 0.0  ;;  %v1653_v1 = vadd.f32 %v4847_v44, %v6544_v54 }
 0x2b6   :  { %v4739_v56 = vpop.f32.mrf.mxu0  ;;  %v4850_v55 = vadd.f32 %v4849_v52, %v4848_v48 }
 0x2b7   :  { %v1252_v31 = vadd.f32 %v4738_v45, %v6539_v25  ;;  %v4851_v57 = vpop.f32.mrf.mxu1  ;;  %1937 = vrot.lane.b32.xlu1 %v1734_v24, %s5925_s21  ;;  %1815 = vrot.lane.b32.xlu0 %v1333_v18, %s5926_s14 }
 0x2b8   :  { %v4740_v26 = vpop.f32.mrf.mxu0 }
 0x2b9   :  { %v4741_v61 = vadd.f32 %v4740_v26, %v4739_v56  ;;  %v4852_v14 = vpop.f32.mrf.mxu1  ;;  %v1334_v12 = vmax.f32 %v1252_v31, 0.0  ;;  %v1656_v56 = vadd.f32 %v4850_v55, %v6544_v54 }
 0x2ba   :  { %v4742_v46 = vpop.f32.mrf.mxu0  ;;  %v4853_v48 = vadd.f32 %v4852_v14, %v4851_v57 }
 0x2bb   :  { %v1257_v37 = vadd.f32 %v4741_v61, %v6539_v25  ;;  %v4854_v62 = vpop.f32.mrf.mxu1  ;;  %1817 = vrot.lane.b32.xlu1 %v1334_v12, %s5926_s14  ;;  %1939 = vrot.lane.b32.xlu0 %v1735_v47, %s5925_s21  ;;  %v1737_v47 = vmax.f32 %v1653_v1, 0.0 }
 0x2bc   :  { %v4743_v53 = vpop.f32.mrf.mxu0 }
 0x2bd   :  { %v1335_v18 = vmax.f32 %v1257_v37, 0.0  ;;  %v4744_v45 = vadd.f32 %v4743_v53, %v4742_v46  ;;  %v4855_v6 = vpop.f32.mrf.mxu1  ;;  %v1738_v46 = vmax.f32 %v1656_v56, 0.0  ;;  %v1661_v53 = vadd.f32 %v4853_v48, %v6544_v54 }
 0x2be   :  { %v4745_v7 = vpop.f32.mrf.mxu0 }
 0x2bf   :  { %v1260_v38 = vadd.f32 %v4744_v45, %v6539_v25  ;;  %v4857_v24 = vpop.f32.mrf.mxu1  ;;  %1941 = vrot.lane.b32.xlu1 %v1736_v32, %s5925_s21  ;;  %1819 = vrot.lane.b32.xlu0 %v1335_v18, %s5926_s14  ;;  %v4856_v32 = vadd.f32 %v4855_v6, %v4854_v62 }
 0x2c0   :  { %v4746_v31 = vpop.f32.mrf.mxu0 }
 0x2c1   :  { %v4747_v52 = vadd.f32 %v4746_v31, %v4745_v7  ;;  %v4858_v26 = vpop.f32.mrf.mxu1  ;;  %v1336_v0 = vmax.f32 %v1260_v38, 0.0  ;;  %v1739_v31 = vmax.f32 %v1661_v53, 0.0  ;;  %v1664_v56 = vadd.f32 %v4856_v32, %v6544_v54 }
 0x2c2   :  { %v4748_v44 = vpop.f32.mrf.mxu0  ;;  %v4859_v7 = vadd.f32 %v4858_v26, %v4857_v24 }
 0x2c3   :  { %v1265_v61 = vadd.f32 %v4747_v52, %v6539_v25  ;;  %v4860_v12 = vpop.f32.mrf.mxu1  ;;  %1821 = vrot.lane.b32.xlu1 %v1336_v0, %s5926_s14  ;;  %1943 = vrot.lane.b32.xlu0 %v1737_v47, %s5925_s21 }
 0x2c4   :  { %v4749_v37 = vpop.f32.mrf.mxu0 }
 0x2c5   :  { %v1337_v55 = vmax.f32 %v1265_v61, 0.0  ;;  %v4750_v18 = vadd.f32 %v4749_v37, %v4748_v44  ;;  %v4861_v1 = vpop.f32.mrf.mxu1  ;;  %v1669_v44 = vadd.f32 %v4859_v7, %v6544_v54 }
 0x2c6   :  { %v4751_v57 = vpop.f32.mrf.mxu0  ;;  %v4862_v24 = vadd.f32 %v4861_v1, %v4860_v12 }
 0x2c7   :  { %v1268_v14 = vadd.f32 %v4750_v18, %v6539_v25  ;;  %v4863_v45 = vpop.f32.mrf.mxu1  ;;  %1945 = vrot.lane.b32.xlu1 %v1738_v46, %s5925_s21  ;;  %1823 = vrot.lane.b32.xlu0 %v1337_v55, %s5926_s14  ;;  %v1740_v46 = vmax.f32 %v1664_v56, 0.0 }
 0x2c8   :  { %v4752_v38 = vpop.f32.mrf.mxu0 }
 0x2c9   :  { %v4753_v47 = vadd.f32 %v4752_v38, %v4751_v57  ;;  %v4864_v52 = vpop.f32.mrf.mxu1  ;;  %v1338_v48 = vmax.f32 %v1268_v14, 0.0  ;;  %v1741_v57 = vmax.f32 %v1669_v44, 0.0  ;;  %v1672_v38 = vadd.f32 %v4862_v24, %v6544_v54 }
 0x2ca   :  { %v4754_v62 = vpop.f32.mrf.mxu0 }
 0x2cb   :  { %v1273_v6 = vadd.f32 %v4753_v47, %v6539_v25  ;;  %v4866_v0 = vpop.f32.mrf.mxu1  ;;  %1825 = vrot.lane.b32.xlu1 %v1338_v48, %s5926_s14  ;;  %1947 = vrot.lane.b32.xlu0 %v1739_v31, %s5925_s21  ;;  %v4865_v31 = vadd.f32 %v4864_v52, %v4863_v45 }
 0x2cc   :  { %v4755_v61 = vpop.f32.mrf.mxu0 }
 0x2cd   :  { %v1339_v26 = vmax.f32 %v1273_v6, 0.0  ;;  %v4756_v37 = vadd.f32 %v4755_v61, %v4754_v62  ;;  %v4867_v53 = vpop.f32.mrf.mxu1  ;;  %v1742_v61 = vmax.f32 %v1672_v38, 0.0  ;;  %v1677_v44 = vadd.f32 %v4865_v31, %v6544_v54 }
 0x2ce   :  { %v4757_v32 = vpop.f32.mrf.mxu0  ;;  %v4868_v62 = vadd.f32 %v4867_v53, %v4866_v0 }
 0x2cf   :  { %v1276_v55 = vadd.f32 %v4756_v37, %v6539_v25  ;;  %v4869_v18 = vpop.f32.mrf.mxu1  ;;  %1949 = vrot.lane.b32.xlu1 %v1740_v46, %s5925_s21  ;;  %1827 = vrot.lane.b32.xlu0 %v1339_v26, %s5926_s14 }
 0x2d0   :  { %v4758_v14 = vpop.f32.mrf.mxu0 }
 0x2d1   :  { %v4759_v7 = vadd.f32 %v4758_v14, %v4757_v32  ;;  %v4870_v47 = vpop.f32.mrf.mxu1  ;;  %v1340_v56 = vmax.f32 %v1276_v55, 0.0  ;;  %v1680_v32 = vadd.f32 %v4868_v62, %v6544_v54 }
 0x2d2   :  { %v4760_v12 = vpop.f32.mrf.mxu0  ;;  %v4871_v0 = vadd.f32 %v4870_v47, %v4869_v18 }
 0x2d3   :  { %v1281_v1 = vadd.f32 %v4759_v7, %v6539_v25  ;;  %v4872_v48 = vpop.f32.mrf.mxu1  ;;  %1829 = vrot.lane.b32.xlu1 %v1340_v56, %s5926_s14  ;;  %1951 = vrot.lane.b32.xlu0 %v1741_v57, %s5925_s21  ;;  %v1743_v57 = vmax.f32 %v1677_v44, 0.0 }
 0x2d4   :  { %v4761_v6 = vpop.f32.mrf.mxu0 }
 0x2d5   :  { %v1341_v46 = vmax.f32 %v1281_v1, 0.0  ;;  %v4762_v26 = vadd.f32 %v4761_v6, %v4760_v12  ;;  %v4873_v24 = vpop.f32.mrf.mxu1  ;;  %v1744_v12 = vmax.f32 %v1680_v32, 0.0  ;;  %v1685_v6 = vadd.f32 %v4871_v0, %v6544_v54 }
 0x2d6   :  { %v4763_v45 = vpop.f32.mrf.mxu0 }
 0x2d7   :  { %v1284_v52 = vadd.f32 %v4762_v26, %v6539_v25  ;;  %v4875_v37 = vpop.f32.mrf.mxu1  ;;  %1953 = vrot.lane.b32.xlu1 %v1742_v61, %s5925_s21  ;;  %1831 = vrot.lane.b32.xlu0 %v1341_v46, %s5926_s14  ;;  %v4874_v61 = vadd.f32 %v4873_v24, %v4872_v48 }
 0x2d8   :  { %v4764_v55 = vpop.f32.mrf.mxu0 }
 0x2d9   :  { %v4765_v53 = vadd.f32 %v4764_v55, %v4763_v45  ;;  %v4876_v14 = vpop.f32.mrf.mxu1  ;;  %v1342_v38 = vmax.f32 %v1284_v52, 0.0  ;;  %v1745_v55 = vmax.f32 %v1685_v6, 0.0  ;;  %v1688_v32 = vadd.f32 %v4874_v61, %v6544_v54 }
 0x2da   :  { %v4766_v31 = vpop.f32.mrf.mxu0  ;;  %v4877_v45 = vadd.f32 %v4876_v14, %v4875_v37 }
 0x2db   :  { %v1289_v7 = vadd.f32 %v4765_v53, %v6539_v25  ;;  %v4878_v56 = vpop.f32.mrf.mxu1  ;;  %1833 = vrot.lane.b32.xlu1 %v1342_v38, %s5926_s14  ;;  %1955 = vrot.lane.b32.xlu0 %v1743_v57, %s5925_s21 }
 0x2dc   :  { %v4767_v1 = vpop.f32.mrf.mxu0 }
 0x2dd   :  { %v1343_v62 = vmax.f32 %v1289_v7, 0.0  ;;  %v4768_v46 = vadd.f32 %v4767_v1, %v4766_v31  ;;  %v4879_v44 = vpop.f32.mrf.mxu1  ;;  %v1693_v31 = vadd.f32 %v4877_v45, %v6544_v54 }
 0x2de   :  { %v4769_v18 = vpop.f32.mrf.mxu0  ;;  %v4880_v37 = vadd.f32 %v4879_v44, %v4878_v56 }
 0x2df   :  { %v1292_v47 = vadd.f32 %v4768_v46, %v6539_v25  ;;  %v4881_v26 = vpop.f32.mrf.mxu1  ;;  %1957 = vrot.lane.b32.xlu1 %v1744_v12, %s5925_s21  ;;  %1835 = vrot.lane.b32.xlu0 %v1343_v62, %s5926_s14  ;;  %v1746_v12 = vmax.f32 %v1688_v32, 0.0 }
 0x2e0   :  { %v4770_v52 = vpop.f32.mrf.mxu0 }
 0x2e1   :  { %v4771_v57 = vadd.f32 %v4770_v52, %v4769_v18  ;;  %v4882_v53 = vpop.f32.mrf.mxu1  ;;  %v1344_v0 = vmax.f32 %v1292_v47, 0.0  ;;  %v1747_v18 = vmax.f32 %v1693_v31, 0.0  ;;  %v1696_v52 = vadd.f32 %v4880_v37, %v6544_v54 }
 0x2e2   :  { %v4772_v48 = vpop.f32.mrf.mxu0 }
 0x2e3   :  { %v1297_v24 = vadd.f32 %v4771_v57, %v6539_v25  ;;  %v4884_v38 = vpop.f32.mrf.mxu1  ;;  %1837 = vrot.lane.b32.xlu1 %v1344_v0, %s5926_s14  ;;  %1959 = vrot.lane.b32.xlu0 %v1745_v55, %s5925_s21  ;;  %v4883_v55 = vadd.f32 %v4882_v53, %v4881_v26 }
 0x2e4   :  { %v4773_v7 = vpop.f32.mrf.mxu0 }
 0x2e5   :  { %v1345_v14 = vmax.f32 %v1297_v24, 0.0  ;;  %v4774_v1 = vadd.f32 %v4773_v7, %v4772_v48  ;;  %v4885_v6 = vpop.f32.mrf.mxu1  ;;  %v1748_v7 = vmax.f32 %v1696_v52, 0.0  ;;  %v1701_v31 = vadd.f32 %v4883_v55, %v6544_v54 }
 0x2e6   :  { %v4775_v61 = vpop.f32.mrf.mxu0  ;;  %v4886_v48 = vadd.f32 %v4885_v6, %v4884_v38 }
 0x2e7   :  { %v1300_v62 = vadd.f32 %v4774_v1, %v6539_v25  ;;  %v4887_v46 = vpop.f32.mrf.mxu1  ;;  %1961 = vrot.lane.b32.xlu1 %v1746_v12, %s5925_s21  ;;  %1839 = vrot.lane.b32.xlu0 %v1345_v14, %s5926_s14  ;;  %v1749_v38 = vmax.f32 %v1701_v31, 0.0 }
 0x2e8   :  { %v4776_v47 = vpop.f32.mrf.mxu0 }
 0x2e9   :  { %v4777_v45 = vadd.f32 %v4776_v47, %v4775_v61  ;;  %v4888_v57 = vpop.f32.mrf.mxu1  ;;  %v1346_v32 = vmax.f32 %v1300_v62, 0.0  ;;  %v1704_v61 = vadd.f32 %v4886_v48, %v6544_v54 }
 0x2ea   :  { %v4778_v56 = vpop.f32.mrf.mxu0  ;;  %v4889_v62 = vadd.f32 %v4888_v57, %v4887_v46 }
 0x2eb   :  { %v1305_v44 = vadd.f32 %v4777_v45, %v6539_v25  ;;  %v4890_v0 = vpop.f32.mrf.mxu1  ;;  %1841 = vrot.lane.b32.xlu1 %v1346_v32, %s5926_s14  ;;  %1963 = vrot.lane.b32.xlu0 %v1747_v18, %s5925_s21 }
 0x2ec   :  { %v4779_v24 = vpop.f32.mrf.mxu0 }
 0x2ed   :  { %v1347_v12 = vmax.f32 %v1305_v44, 0.0  ;;  %v4780_v14 = vadd.f32 %v4779_v24, %v4778_v56  ;;  %v4891_v37 = vpop.f32.mrf.mxu1  ;;  %v1750_v56 = vmax.f32 %v1704_v61, 0.0  ;;  %v1709_v44 = vadd.f32 %v4889_v62, %v6544_v54 }
 0x2ee   :  { %v4781_v26 = vpop.f32.mrf.mxu0 }
 0x2ef   :  { %v1308_v53 = vadd.f32 %v4780_v14, %v6539_v25  ;;  %v4893_v1 = vpop.f32.mrf.mxu1  ;;  %1965 = vrot.lane.b32.xlu1 %v1748_v7, %s5925_s21  ;;  %1843 = vrot.lane.b32.xlu0 %v1347_v12, %s5926_s14  ;;  %v4892_v7 = vadd.f32 %v4891_v37, %v4890_v0  ;;  %v6663_v14 = vld [vmem:[%s8477_s6] ss:$0 sm:$0xff]  ;;  %v1751_v0 = vmax.f32 %v1709_v44, 0.0 }
 0x2f0   :  { %v4782_v18 = vpop.f32.mrf.mxu0 }
 0x2f1   :  { %v4783_v6 = vadd.f32 %v4782_v18, %v4781_v26  ;;  %v4894_v47 = vpop.f32.mrf.mxu1  ;;  %v1348_v52 = vmax.f32 %v1308_v53, 0.0  ;;  %v1788_v46 = vpop.permute.xlu0 %1787  ;;  %v773_v26 = vadd.f32 %v6663_v14, %v6411_v63  ;;  %v1712_v37 = vadd.f32 %v4892_v7, %v6544_v54 }
 0x2f2   :  { %v4784_v55 = vpop.f32.mrf.mxu0  ;;  %v4895_v57 = vadd.f32 %v4894_v47, %v4893_v1  ;;  %v776_v47 = vadd.f32 %v6663_v14, %v6416_v3  ;;  %v781_v3 = vadd.f32 %v6663_v14, %v6421_v9 }
 0x2f3   :  { %v1313_v45 = vadd.f32 %v4783_v6, %v6539_v25  ;;  %v4896_v32 = vpop.f32.mrf.mxu1  ;;  %1845 = vrot.lane.b32.xlu1 %v1348_v52, %s5926_s14  ;;  %1967 = vrot.lane.b32.xlu0 %v1749_v38, %s5925_s21  ;;  %v899_v6 = vmax.f32 %v773_v26, 0.0  ;;  %v1752_v63 = vmax.f32 %v1712_v37, 0.0  ;;  %v789_v37 = vadd.f32 %v6663_v14, %v6431_v19 }
 0x2f4   :  { %v4785_v24 = vpop.f32.mrf.mxu0  ;;  %v1717_v1 = vadd.f32 %v4895_v57, %v6544_v54  ;;  %v900_v44 = vmax.f32 %v776_v47, 0.0  ;;  %v901_v57 = vmax.f32 %v781_v3, 0.0  ;;  %v800_v3 = vadd.f32 %v6663_v14, %v6446_v34 }
 0x2f5   :  { %v1349_v48 = vmax.f32 %v1313_v45, 0.0  ;;  %v4786_v31 = vadd.f32 %v4785_v24, %v4784_v55  ;;  %v4897_v12 = vpop.f32.mrf.mxu1  ;;  %v1790_v61 = vpop.permute.xlu1 %1789 }
 0x2f6   :  { %v4898_v62 = vadd.f32 %v4897_v12, %v4896_v32  ;;  %v1753_v52 = vmax.f32 %v1717_v1, 0.0  ;;  %v2012_v24 = vsel %vm233_vm0, %v900_v44, %v1790_v61 }
 0x2f7   :  { %v1316_v53 = vadd.f32 %v4786_v31, %v6539_v25  ;;  %1969 = vrot.lane.b32.xlu1 %v1750_v56, %s5925_s21  ;;  %1847 = vrot.lane.b32.xlu0 %v1349_v48, %s5926_s14  ;;  %v2011_v25 = vsel %vm233_vm0, %v899_v6, %v1788_v46  ;;  %v784_v31 = vadd.f32 %v6663_v14, %v6426_v13 }
 0x2f8   :  { %v1720_v55 = vadd.f32 %v4898_v62, %v6544_v54 }
 0x2f9   :  { %v1792_v18 = vpop.permute.xlu0 %1791  ;;  %v1350_v38 = vmax.f32 %v1316_v53, 0.0 }
 0x2fa   :  { %v1754_v7 = vmax.f32 %v1720_v55, 0.0  ;;  %v2013_v9 = vsel %vm233_vm0, %v901_v57, %v1792_v18  ;;  %v903_v18 = vmax.f32 %v789_v37, 0.0  ;;  %v805_v57 = vadd.f32 %v6663_v14, %v6451_v40 }
 0x2fb   :  { %1849 = vrot.lane.b32.xlu1 %v1350_v38, %s5926_s14  ;;  %1971 = vrot.lane.b32.xlu0 %v1751_v0, %s5925_s21  ;;  %v902_v0 = vmax.f32 %v784_v31, 0.0  ;;  %v792_v38 = vadd.f32 %v6663_v14, %v6436_v23  ;;  %v4608_v31 = vadd.f32 %v6455_v42, %v6453_v41 }
 0x2fd   :  { %v1794_v45 = vpop.permute.xlu1 %1793  ;;  %v1916_v32 = vpop.permute.xlu0 %1915  ;;  %v808_v37 = vadd.f32 %v6663_v14, %v4608_v31 }
 0x2fe   :  { %v6679_v56 = vsel %vm2043_vm1, %v2011_v25, %v1916_v32  ;;  %v2014_v13 = vsel %vm233_vm0, %v902_v0, %v1794_v45  ;;  %v904_v25 = vmax.f32 %v792_v38, 0.0  ;;  %v907_v0 = vmax.f32 %v805_v57, 0.0 }
 0x2ff   :  { %8535 = vst [vmem:[#allocation17_spill] sm:$0xff] %v6679_v56  ;;  %1973 = vrot.lane.b32.xlu1 %v1752_v63, %s5925_s21  ;;  %1975 = vrot.lane.b32.xlu0 %v1753_v52, %s5925_s21  ;;  %v797_v52 = vadd.f32 %v6663_v14, %v6441_v30 }
 0x300   :  { %5460 = vmatprep.mubr.msk.f32.mxu0 %vm2088_vm2, %v6679_v56 }
 0x301   :  { %v1918_v54 = vpop.permute.xlu1 %1917  ;;  %v1796_v48 = vpop.permute.xlu0 %1795  ;;  %v905_v44 = vmax.f32 %v797_v52, 0.0 }
 0x302   :  { %v6689_v46 = vsel %vm2043_vm1, %v2012_v24, %v1918_v54  ;;  %v2015_v6 = vsel %vm233_vm0, %v903_v18, %v1796_v48  ;;  %v906_v48 = vmax.f32 %v800_v3, 0.0  ;;  %v4614_v18 = vadd.f32 %v6467_v51, %v6465_v50 }
 0x303   :  { %8536 = vst [vmem:[#allocation18_spill] sm:$0xff] %v6689_v46  ;;  %1977 = vrot.lane.b32.xlu1 %v1754_v7, %s5925_s21  ;;  %5461 = vmatmul.mubr.msk.f32.vlgmr.msra.gmra.mxu0 %vm2088_vm2, %v6689_v46 }
 0x304   :  { %v816_v52 = vadd.f32 %v6663_v14, %v4614_v18 }
 0x305   :  { %v1798_v12 = vpop.permute.xlu1 %1797  ;;  %v1920_v26 = vpop.permute.xlu0 %1919 }
 0x306   :  { %v6698_v53 = vsel %vm2043_vm1, %v2013_v9, %v1920_v26  ;;  %v2016_v55 = vsel %vm233_vm0, %v904_v25, %v1798_v12 }
 0x307   :  { %8537 = vst [vmem:[#allocation19_spill] sm:$0xff] %v6698_v53  ;;  %5463 = vmatprep.mubr.msk.f32.mxu0 %vm2088_vm2, %v6698_v53 }
 0x309   :  { %v1922_v1 = vpop.permute.xlu1 %1921  ;;  %v1800_v61 = vpop.permute.xlu0 %1799 }
 0x30a   :  { %v6706_v62 = vsel %vm2043_vm1, %v2014_v13, %v1922_v1  ;;  %v2017_v24 = vsel %vm233_vm0, %v905_v44, %v1800_v61  ;;  %v908_v1 = vmax.f32 %v808_v37, 0.0  ;;  %v813_v61 = vadd.f32 %v6663_v14, %v6463_v49 }
 0x30b   :  { %8538 = vst [vmem:[#allocation20_spill] sm:$0xff] %v6706_v62  ;;  %5464 = vmatmul.mubr.msk.f32.gmra.mxu0 %vm2088_vm2, %v6706_v62  ;;  %v4620_v44 = vadd.f32 %v6479_v60, %v6477_v59 }
 0x30c   :  { %v909_v25 = vmax.f32 %v813_v61, 0.0 }
 0x30d   :  { %v1802_v19 = vpop.permute.xlu1 %1801  ;;  %v1924_v47 = vpop.permute.xlu0 %1923  ;;  %v824_v57 = vadd.f32 %v6663_v14, %v4620_v44  ;;  %v845_v44 = vadd.f32 %v6663_v14, %v6497_v15 }
 0x30e   :  { %v6714_v63 = vsel %vm2043_vm1, %v2015_v6, %v1924_v47  ;;  %v2018_v34 = vsel %vm233_vm0, %v906_v48, %v1802_v19 }
 0x30f   :  { %8539 = vst [vmem:[#allocation21_spill] sm:$0xff] %v6714_v63  ;;  %5466 = vmatprep.mubr.msk.f32.mxu0 %vm2088_vm2, %v6714_v63 }
 0x311   :  { %v1926_v23 = vpop.permute.xlu1 %1925  ;;  %v1804_v45 = vpop.permute.xlu0 %1803 }
 0x312   :  { %v6722_v32 = vsel %vm2043_vm1, %v2016_v55, %v1926_v23  ;;  %v2019_v40 = vsel %vm233_vm0, %v907_v0, %v1804_v45  ;;  %v910_v23 = vmax.f32 %v816_v52, 0.0  ;;  %v821_v45 = vadd.f32 %v6663_v14, %v6475_v58 }
 0x313   :  { %8540 = vst [vmem:[#allocation22_spill] sm:$0xff] %v6722_v32  ;;  %5467 = vmatmul.mubr.msk.f32.gmra.mxu0 %vm2088_vm2, %v6722_v32 }
 0x314   :  { %v911_v48 = vmax.f32 %v821_v45, 0.0 }
 0x315   :  { %v1806_v30 = vpop.permute.xlu1 %1805  ;;  %v1928_v7 = vpop.permute.xlu0 %1927 }
 0x316   :  { %v6730_v54 = vsel %vm2043_vm1, %v2017_v24, %v1928_v7  ;;  %v2020_v38 = vsel %vm233_vm0, %v908_v1, %v1806_v30 }
 0x317   :  { %8541 = vst [vmem:[#allocation23_spill] sm:$0xff] %v6730_v54  ;;  %5469 = vmatprep.mubr.msk.f32.mxu0 %vm2088_vm2, %v6730_v54 }
 0x319   :  { %v1930_v9 = vpop.permute.xlu1 %1929  ;;  %v1808_v12 = vpop.permute.xlu0 %1807 }
 0x31a   :  { %v6740_v26 = vsel %vm2043_vm1, %v2018_v34, %v1930_v9  ;;  %v2021_v49 = vsel %vm233_vm0, %v909_v25, %v1808_v12  ;;  %v912_v34 = vmax.f32 %v824_v57, 0.0  ;;  %v829_v9 = vadd.f32 %v6663_v14, %v6484_v2 }
 0x31b   :  { %8542 = vst [vmem:[#allocation24_spill] sm:$0xff] %v6740_v26  ;;  %5470 = vmatmul.mubr.msk.f32.gmra.mxu0 %vm2088_vm2, %v6740_v26  ;;  %v4626_v12 = vadd.f32 %v6489_v5, %v6486_v4 }
 0x31d   :  { %v1810_v13 = vpop.permute.xlu1 %1809  ;;  %v1932_v41 = vpop.permute.xlu0 %1931  ;;  %v832_v1 = vadd.f32 %v6663_v14, %v4626_v12  ;;  %v4644_v12 = vadd.f32 %v6507_v22, %v6505_v21 }
 0x31e   :  { %v6747_v42 = vsel %vm2043_vm1, %v2019_v40, %v1932_v41  ;;  %v2022_v3 = vsel %vm233_vm0, %v910_v23, %v1810_v13  ;;  %v913_v41 = vmax.f32 %v829_v9, 0.0  ;;  %v853_v9 = vadd.f32 %v6663_v14, %v6503_v20 }
 0x31f   :  { %8543 = vst [vmem:[#allocation25_spill] sm:$0xff] %v6747_v42  ;;  %5472 = vmatprep.mubr.msk.f32.mxu0 %vm2088_vm2, %v6747_v42  ;;  %v914_v18 = vmax.f32 %v832_v1, 0.0 }
 0x320   :  { %v919_v1 = vmax.f32 %v853_v9, 0.0 }
 0x321   :  { %v1934_v6 = vpop.permute.xlu1 %1933  ;;  %v1812_v19 = vpop.permute.xlu0 %1811 }
 0x322   :  { %v6757_v47 = vsel %vm2043_vm1, %v2020_v38, %v1934_v6  ;;  %v2023_v58 = vsel %vm233_vm0, %v911_v48, %v1812_v19  ;;  %v837_v38 = vadd.f32 %v6663_v14, %v6491_v8  ;;  %v4632_v6 = vadd.f32 %v6495_v11, %v6493_v10 }
 0x323   :  { %8544 = vst [vmem:[#allocation26_spill] sm:$0xff] %v6757_v47  ;;  %5473 = vmatmul.mubr.msk.f32.gmra.mxu0 %vm2088_vm2, %v6757_v47 }
 0x325   :  { %v1814_v55 = vpop.permute.xlu1 %1813  ;;  %v1936_v50 = vpop.permute.xlu0 %1935 }
 0x326   :  { %v6764_v51 = vsel %vm2043_vm1, %v2021_v49, %v1936_v50  ;;  %v2024_v0 = vsel %vm233_vm0, %v912_v34, %v1814_v55  ;;  %v915_v55 = vmax.f32 %v837_v38, 0.0  ;;  %v840_v50 = vadd.f32 %v6663_v14, %v4632_v6 }
 0x327   :  { %8545 = vst [vmem:[#allocation27_spill] sm:$0xff] %v6764_v51  ;;  %5475 = vmatprep.mubr.msk.f32.mxu0 %vm2088_vm2, %v6764_v51  ;;  %v4650_v38 = vadd.f32 %v6513_v29, %v6511_v28 }
 0x328   :  { %v916_v45 = vmax.f32 %v840_v50, 0.0 }
 0x329   :  { %v1938_v24 = vpop.permute.xlu1 %1937  ;;  %v1816_v30 = vpop.permute.xlu0 %1815  ;;  %v864_v50 = vadd.f32 %v6663_v14, %v4650_v38  ;;  %v8565_v38 = vld [vmem:[#allocation13_spill] sm:$0xff] }
 0x32a   :  { %v6774_v7 = vsel %vm2043_vm1, %v2022_v3, %v1938_v24  ;;  %v2025_v2 = vsel %vm233_vm0, %v913_v41, %v1816_v30  ;;  %v4638_v3 = vadd.f32 %v6501_v17, %v6499_v16 }
 0x32b   :  { %8546 = vst [vmem:[#allocation28_spill] sm:$0xff] %v6774_v7  ;;  %5476 = vmatmul.mubr.msk.f32.gmra.mxu0 %vm2088_vm2, %v6774_v7 }
 0x32d   :  { %v1818_v31 = vpop.permute.xlu1 %1817  ;;  %v1940_v59 = vpop.permute.xlu0 %1939 }
 0x32e   :  { %v6781_v60 = vsel %vm2043_vm1, %v2023_v58, %v1940_v59  ;;  %v2026_v19 = vsel %vm233_vm0, %v914_v18, %v1818_v31  ;;  %v917_v58 = vmax.f32 %v845_v44, 0.0  ;;  %v848_v31 = vadd.f32 %v6663_v14, %v4638_v3 }
 0x32f   :  { %8547 = vst [vmem:[#allocation29_spill] sm:$0xff] %v6781_v60  ;;  %5478 = vmatprep.mubr.msk.f32.mxu0 %vm2088_vm2, %v6781_v60  ;;  %v861_v18 = vadd.f32 %v6663_v14, %v6509_v27 }
 0x330   :  { %v918_v34 = vmax.f32 %v848_v31, 0.0 }
 0x331   :  { %v1942_v37 = vpop.permute.xlu1 %1941  ;;  %v1820_v40 = vpop.permute.xlu0 %1819 }
 0x332   :  { %v6791_v13 = vsel %vm2043_vm1, %v2024_v0, %v1942_v37  ;;  %v2027_v8 = vsel %vm233_vm0, %v915_v55, %v1820_v40  ;;  %v921_v55 = vmax.f32 %v861_v18, 0.0  ;;  %v8564_v18 = vld [vmem:[#allocation12_spill] sm:$0xff] }
 0x333   :  { %8548 = vst [vmem:[#allocation30_spill] sm:$0xff] %v6791_v13  ;;  %5479 = vmatmul.mubr.msk.f32.gmra.mxu0 %vm2088_vm2, %v6791_v13 }
 0x335   :  { %v1822_v61 = vpop.permute.xlu1 %1821  ;;  %v1944_v4 = vpop.permute.xlu0 %1943 }
 0x336   :  { %v6798_v5 = vsel %vm2043_vm1, %v2025_v2, %v1944_v4  ;;  %v2028_v24 = vsel %vm233_vm0, %v916_v45, %v1822_v61  ;;  %v856_v2 = vadd.f32 %v6663_v14, %v4644_v12  ;;  %v4656_v45 = vadd.f32 %v6519_v36, %v6517_v35 }
 0x337   :  { %8549 = vst [vmem:[#allocation31_spill] sm:$0xff] %v6798_v5  ;;  %5481 = vmatprep.mubr.msk.f32.mxu0 %vm2088_vm2, %v6798_v5 }
 0x338   :  { %v920_v4 = vmax.f32 %v856_v2, 0.0 }
 0x339   :  { %v1946_v25 = vpop.permute.xlu1 %1945  ;;  %v1824_v52 = vpop.permute.xlu0 %1823 }
 0x33a   :  { %v6808_v49 = vsel %vm2043_vm1, %v2026_v19, %v1946_v25  ;;  %v2029_v15 = vsel %vm233_vm0, %v917_v58, %v1824_v52  ;;  %v872_v58 = vadd.f32 %v6663_v14, %v4656_v45  ;;  %v8568_v45 = vld [vmem:[#allocation16_spill] sm:$0xff] }
 0x33b   :  { %8550 = vst [vmem:[#allocation32_spill] sm:$0xff] %v6808_v49  ;;  %5482 = vmatmul.mubr.msk.f32.gmra.mxu0 %vm2088_vm2, %v6808_v49 }
 0x33d   :  { %v1826_v23 = vpop.permute.xlu1 %1825  ;;  %v1948_v10 = vpop.permute.xlu0 %1947 }
 0x33e   :  { %v6815_v11 = vsel %vm2043_vm1, %v2027_v8, %v1948_v10  ;;  %v2030_v0 = vsel %vm233_vm0, %v918_v34, %v1826_v23  ;;  %v922_v23 = vmax.f32 %v864_v50, 0.0  ;;  %v869_v10 = vadd.f32 %v6663_v14, %v6515_v33 }
 0x33f   :  { %8551 = vst [vmem:[#allocation33_spill] sm:$0xff] %v6815_v11  ;;  %5484 = vmatprep.mubr.msk.f32.mxu0 %vm2088_vm2, %v6815_v11 }
 0x341   :  { %v1950_v30 = vpop.permute.xlu1 %1949  ;;  %v1828_v48 = vpop.permute.xlu0 %1827 }
 0x342   :  { %v6825_v57 = vsel %vm2043_vm1, %v2028_v24, %v1950_v30  ;;  %v2031_v20 = vsel %vm233_vm0, %v919_v1, %v1828_v48  ;;  %v923_v48 = vmax.f32 %v869_v10, 0.0  ;;  %v8567_v10 = vld [vmem:[#allocation15_spill] sm:$0xff] }
 0x343   :  { %8552 = vst [vmem:[#allocation34_spill] sm:$0xff] %v6825_v57  ;;  %5485 = vmatmul.mubr.msk.f32.gmra.mxu0 %vm2088_vm2, %v6825_v57 }
 0x345   :  { %v1830_v59 = vpop.permute.xlu1 %1829  ;;  %v1952_v16 = vpop.permute.xlu0 %1951 }
 0x346   :  { %v6832_v17 = vsel %vm2043_vm1, %v2029_v15, %v1952_v16  ;;  %v2032_v6 = vsel %vm233_vm0, %v920_v4, %v1830_v59  ;;  %v924_v15 = vmax.f32 %v872_v58, 0.0  ;;  %v877_v59 = vadd.f32 %v6663_v14, %v6521_v39  ;;  %v8560_v16 = vld [vmem:[#allocation10_spill] sm:$0xff] }
 0x347   :  { %8553 = vst [vmem:[#allocation35_spill] sm:$0xff] %v6832_v17  ;;  %5487 = vmatprep.mubr.msk.f32.mxu0 %vm2088_vm2, %v6832_v17  ;;  %v4662_v34 = vadd.f32 %v8560_v16, %v6523_v43 }
 0x349   :  { %v1954_v37 = vpop.permute.xlu1 %1953  ;;  %v1832_v40 = vpop.permute.xlu0 %1831  ;;  %v880_v1 = vadd.f32 %v6663_v14, %v4662_v34 }
 0x34a   :  { %v6842_v41 = vsel %vm2043_vm1, %v2030_v0, %v1954_v37  ;;  %v2033_v27 = vsel %vm233_vm0, %v921_v55, %v1832_v40  ;;  %v925_v40 = vmax.f32 %v877_v59, 0.0 }
 0x34b   :  { %8554 = vst [vmem:[#allocation36_spill] sm:$0xff] %v6842_v41  ;;  %5488 = vmatmul.mubr.msk.f32.gmra.mxu0 %vm2088_vm2, %v6842_v41 }
 0x34d   :  { %v1834_v61 = vpop.permute.xlu1 %1833  ;;  %v1956_v21 = vpop.permute.xlu0 %1955 }
 0x34e   :  { %v6849_v22 = vsel %vm2043_vm1, %v2031_v20, %v1956_v21  ;;  %v2034_v44 = vsel %vm233_vm0, %v922_v23, %v1834_v61  ;;  %v926_v61 = vmax.f32 %v880_v1, 0.0  ;;  %v8563_v21 = vld [vmem:[#allocation11_spill] sm:$0xff] }
 0x34f   :  { %8555 = vst [vmem:[#allocation37_spill] sm:$0xff] %v6849_v22  ;;  %5490 = vmatprep.mubr.msk.f32.mxu0 %vm2088_vm2, %v6849_v22  ;;  %v885_v4 = vadd.f32 %v6663_v14, %v8563_v21 }
 0x351   :  { %v1958_v19 = vpop.permute.xlu1 %1957  ;;  %v1836_v25 = vpop.permute.xlu0 %1835 }
 0x352   :  { %v6859_v52 = vsel %vm2043_vm1, %v2032_v6, %v1958_v19  ;;  %v2035_v33 = vsel %vm233_vm0, %v923_v48, %v1836_v25  ;;  %v4668_v6 = vadd.f32 %v8565_v38, %v8564_v18 }
 0x353   :  { %8556 = vst [vmem:[#allocation38_spill] sm:$0xff] %v6859_v52  ;;  %5491 = vmatmul.mubr.msk.f32.gmra.mxu0 %vm2088_vm2, %v6859_v52 }
 0x355   :  { %v1838_v8 = vpop.permute.xlu1 %1837  ;;  %v1960_v28 = vpop.permute.xlu0 %1959 }
 0x356   :  { %v6866_v29 = vsel %vm2043_vm1, %v2033_v27, %v1960_v28  ;;  %v2036_v9 = vsel %vm233_vm0, %v924_v15, %v1838_v8  ;;  %v927_v27 = vmax.f32 %v885_v4, 0.0  ;;  %v888_v8 = vadd.f32 %v6663_v14, %v4668_v6  ;;  %v8566_v28 = vld [vmem:[#allocation14_spill] sm:$0xff] }
 0x357   :  { %8557 = vst [vmem:[#allocation39_spill] sm:$0xff] %v6866_v29  ;;  %5493 = vmatprep.mubr.msk.f32.mxu0 %vm2088_vm2, %v6866_v29  ;;  %v893_v23 = vadd.f32 %v6663_v14, %v8566_v28 }
 0x359   :  { %v1962_v3 = vpop.permute.xlu1 %1961  ;;  %v1840_v24 = vpop.permute.xlu0 %1839 }
 0x35a   :  { %v6876_v30 = vsel %vm2043_vm1, %v2034_v44, %v1962_v3  ;;  %v2037_v39 = vsel %vm233_vm0, %v925_v40, %v1840_v24  ;;  %v4674_v44 = vadd.f32 %v8568_v45, %v8567_v10 }
 0x35b   :  { %8558 = vst [vmem:[#allocation40_spill] sm:$0xff] %v6876_v30  ;;  %5494 = vmatmul.mubr.msk.f32.gmra.mxu0 %vm2088_vm2, %v6876_v30 }
 0x35d   :  { %v1842_v31 = vpop.permute.xlu1 %1841  ;;  %v1964_v35 = vpop.permute.xlu0 %1963 }
 0x35e   :  { %v6883_v36 = vsel %vm2043_vm1, %v2035_v33, %v1964_v35  ;;  %v2038_v19 = vsel %vm233_vm0, %v926_v61, %v1842_v31  ;;  %v928_v33 = vmax.f32 %v888_v8, 0.0  ;;  %v929_v31 = vmax.f32 %v893_v23, 0.0 }
 0x35f   :  { %8559 = vst [vmem:[#allocation41_spill] sm:$0xff] %v6883_v36  ;;  %5496 = vmatprep.mubr.msk.f32.mxu0 %vm2088_vm2, %v6883_v36  ;;  %v896_v35 = vadd.f32 %v6663_v14, %v4674_v44 }
 0x361   :  { %v1966_v12 = vpop.permute.xlu1 %1965  ;;  %v1844_v0 = vpop.permute.xlu0 %1843 }
 0x362   :  { %v6893_v37 = vsel %vm2043_vm1, %v2036_v9, %v1966_v12  ;;  %v2039_v3 = vsel %vm233_vm0, %v927_v27, %v1844_v0  ;;  %v930_v0 = vmax.f32 %v896_v35, 0.0 }
 0x363   :  { %8561 = vst [vmem:[#allocation10_spill] sm:$0xff] %v6893_v37  ;;  %5497 = vmatmul.mubr.msk.f32.gmra.mxu0 %vm2088_vm2, %v6893_v37 }
 0x365   :  { %v1846_v2 = vpop.permute.xlu1 %1845  ;;  %v1968_v43 = vpop.permute.xlu0 %1967 }
 0x366   :  { %v6900_v20 = vsel %vm2043_vm1, %v2037_v39, %v1968_v43  ;;  %v2040_v15 = vsel %vm233_vm0, %v928_v33, %v1846_v2  ;;  %v5759_v39 = vld [vmem:[%s8527_s20 + $0x4] ss:$8 sps:$4 sm:$0xff]  }
 0x367   :  { %8562 = vst [vmem:[#allocation42_spill] sm:$0xff] %v6900_v20  ;;  %5499 = vmatprep.mubr.msk.f32.mxu0 %vm2088_vm2, %v6900_v20 }
 0x369   :  { %v1970_v25 = vpop.permute.xlu1 %1969  ;;  %v1848_v55 = vpop.permute.xlu0 %1847 }
 0x36a   :  { %v6910_v50 = vsel %vm2043_vm1, %v2038_v19, %v1970_v25  ;;  %v2041_v59 = vsel %vm233_vm0, %v929_v31, %v1848_v55 }
 0x36b   :  { %5500 = vmatmul.mubr.msk.f32.gmra.mxu0 %vm2088_vm2, %v6910_v50 }
 0x36d   :  { %v1850_v24 = vpop.permute.xlu1 %1849  ;;  %v1972_v48 = vpop.permute.xlu0 %1971 }
 0x36e   :  { %v6921_v58 = vsel %vm2043_vm1, %v2039_v3, %v1972_v48  ;;  %v2042_v14 = vsel %vm233_vm0, %v930_v0, %v1850_v24 }
 0x36f   :  { %5502 = vmatprep.mubr.msk.f32.mxu0 %vm2088_vm2, %v6921_v58 }
 0x371   :  { %v1974_v16 = vpop.permute.xlu1 %1973  ;;  %v1976_v34 = vpop.permute.xlu0 %1975 }
 0x372   :  { %v6929_v9 = vsel %vm2043_vm1, %v2040_v15, %v1974_v16  ;;  %v6932_v12 = vsel %vm2043_vm1, %v2041_v59, %v1976_v34 }
 0x373   :  { %5503 = vmatmul.mubr.msk.f32.gmra.mxu0 %vm2088_vm2, %v6929_v9 }
 0x374   :  { %5505 = vmatprep.mubr.msk.f32.mxu0 %vm2088_vm2, %v6932_v12 }
 0x375   :  { %v1978_v40 = vpop.permute.xlu1 %1977 }
 0x376   :  { %v6940_v1 = vsel %vm2043_vm1, %v2042_v14, %v1978_v40 }
 0x377   :  { %5506 = vmatmul.mubr.msk.f32.gmra.mxu0 %vm2088_vm2, %v6940_v1 }
 0x378   :  { %2465 = vmatprep.mubr.bf16.mxu0 %v5759_v39 }
 0x3c3   :  { %v5462_v2 = vpop.f32.mrf.mxu0 }
 0x3c5   :  { %v2251_v43 = vpop.f32.mrf.mxu0 }
 0x3c6   :  { %v6947_v61 = vpack.c.bf16 %v5462_v2, %v2251_v43 }
 0x3cb   :  { %v5465_v21 = vpop.f32.mrf.mxu0 }
 0x3cd   :  { %v2261_v4 = vpop.f32.mrf.mxu0 }
 0x3ce   :  { %v2412_v34 = vpack.c.bf16 %v5465_v21, %v2261_v4 }
 0x3d3   :  { %v5468_v18 = vpop.f32.mrf.mxu0 }
 0x3d5   :  { %v2271_v38 = vpop.f32.mrf.mxu0 }
 0x3d6   :  { %v2413_v59 = vpack.c.bf16 %v5468_v18, %v2271_v38 }
 0x3db   :  { %v5471_v6 = vpop.f32.mrf.mxu0 }
 0x3dd   :  { %v2281_v19 = vpop.f32.mrf.mxu0 }
 0x3de   :  { %v6949_v25 = vpack.c.bf16 %v5471_v6, %v2281_v19 }
 0x3e0   :  { %2648 = vrot.lane.b32.xlu1 %v6949_v25, %s5924_s23 }
 0x3e3   :  { %v5474_v55 = vpop.f32.mrf.mxu0 }
 0x3e5   :  { %v2291_v27 = vpop.f32.mrf.mxu0 }
 0x3e6   :  { %v6953_v8 = vpack.c.bf16 %v5474_v55, %v2291_v27 }
 0x3e8   :  { %2650 = vrot.lane.b32.xlu1 %v6953_v8, %s5924_s23 }
 0x3eb   :  { %v5477_v28 = vpop.f32.mrf.mxu0 }
 0x3ec   :  { %2894 = vrot.lane.b32.xlu1 %v6953_v8, %s5925_s21 }
 0x3ed   :  { %v2301_v23 = vpop.f32.mrf.mxu0 }
 0x3ee   :  { %v2416_v10 = vpack.c.bf16 %v5477_v28, %v2301_v23 }
 0x3f0   :  { %2652 = vrot.lane.b32.xlu1 %v2416_v10, %s5924_s23 }
 0x3f3   :  { %v5480_v45 = vpop.f32.mrf.mxu0 }
 0x3f4   :  { %2896 = vrot.lane.b32.xlu1 %v2416_v10, %s5925_s21 }
 0x3f5   :  { %v2311_v44 = vpop.f32.mrf.mxu0 }
 0x3f6   :  { %v2417_v3 = vpack.c.bf16 %v5480_v45, %v2311_v44 }
 0x3f8   :  { %2654 = vrot.lane.b32.xlu1 %v2417_v3, %s5924_s23 }
 0x3fb   :  { %v5483_v24 = vpop.f32.mrf.mxu0 }
 0x3fc   :  { %2898 = vrot.lane.b32.xlu1 %v2417_v3, %s5925_s21 }
 0x3fd   :  { %v2321_v48 = vpop.f32.mrf.mxu0 }
 0x3fe   :  { %v2418_v33 = vpack.c.bf16 %v5483_v24, %v2321_v48 }
 0x400   :  { %2656 = vrot.lane.b32.xlu1 %v2418_v33, %s5924_s23 }
 0x403   :  { %v5486_v31 = vpop.f32.mrf.mxu0 }
 0x404   :  { %2900 = vrot.lane.b32.xlu1 %v2418_v33, %s5925_s21 }
 0x405   :  { %v2331_v35 = vpop.f32.mrf.mxu0 }
 0x406   :  { %v6965_v15 = vpack.c.bf16 %v5486_v31, %v2331_v35  ;;  %v5766_v31 = vld [vmem:[%s8527_s20 + $0x30] ss:$8 sps:$4 sm:$0xff]   ;;  %v5767_v35 = vld [vmem:[%s8527_s20 + $0x44] ss:$8 sps:$4 sm:$0xff]  }
 0x408   :  { %2892 = vrot.lane.b32.xlu1 %v6949_v25, %s5925_s21 }
 0x40b   :  { %v5489_v16 = vpop.f32.mrf.mxu0 }
 0x40c   :  { %2646 = vrot.lane.b32.xlu1 %v2413_v59, %s5924_s23 }
 0x40d   :  { %v2341_v0 = vpop.f32.mrf.mxu0 }
 0x40e   :  { %v2420_v48 = vpack.c.bf16 %v5489_v16, %v2341_v0  ;;  %v5769_v16 = vld [vmem:[%s8527_s20 + $0x54] ss:$8 sps:$4 sm:$0xff]   ;;  %v5770_v0 = vld [vmem:[%s8527_s20 + $0x50] ss:$8 sps:$4 sm:$0xff]  }
 0x410   :  { %2890 = vrot.lane.b32.xlu1 %v2413_v59, %s5925_s21 }
 0x413   :  { %v5492_v14 = vpop.f32.mrf.mxu0 }
 0x414   :  { %2644 = vrot.lane.b32.xlu1 %v2412_v34, %s5924_s23 }
 0x415   :  { %v2351_v40 = vpop.f32.mrf.mxu0 }
 0x416   :  { %v2421_v24 = vpack.c.bf16 %v5492_v14, %v2351_v40  ;;  %v5771_v14 = vld [vmem:[%s8527_s20 + $0x64] ss:$8 sps:$4 sm:$0xff]  }
 0x418   :  { %2888 = vrot.lane.b32.xlu1 %v2412_v34, %s5925_s21 }
 0x41b   :  { %v5495_v39 = vpop.f32.mrf.mxu0 }
 0x41c   :  { %2642 = vrot.lane.b32.xlu1 %v6947_v61, %s5924_s23 }
 0x41d   :  { %v2361_v2 = vpop.f32.mrf.mxu0 }
 0x41e   :  { %v2422_v43 = vpack.c.bf16 %v5495_v39, %v2361_v2  ;;  %v5772_v2 = vld [vmem:[%s8527_s20 + $0x60] ss:$8 sps:$4 sm:$0xff]  }
 0x420   :  { %2886 = vrot.lane.b32.xlu1 %v6947_v61, %s5925_s21  ;;  %2664 = vrot.lane.b32.xlu0 %v2422_v43, %s5924_s23 }
 0x423   :  { %v5498_v18 = vpop.f32.mrf.mxu0 }
 0x425   :  { %v2371_v21 = vpop.f32.mrf.mxu0 }
 0x426   :  { %v2423_v4 = vpack.c.bf16 %v5498_v18, %v2371_v21  ;;  %v5774_v21 = vld [vmem:[%s8527_s20 + $0x70] ss:$8 sps:$4 sm:$0xff]  }
 0x428   :  { %2666 = vrot.lane.b32.xlu0 %v2423_v4, %s5924_s23 }
 0x42b   :  { %v5501_v38 = vpop.f32.mrf.mxu0 }
 0x42c   :  { %2910 = vrot.lane.b32.xlu0 %v2423_v4, %s5925_s21 }
 0x42d   :  { %v2381_v6 = vpop.f32.mrf.mxu0 }
 0x42e   :  { %v2424_v19 = vpack.c.bf16 %v5501_v38, %v2381_v6 }
 0x430   :  { %2668 = vrot.lane.b32.xlu0 %v2424_v19, %s5924_s23 }
 0x433   :  { %v5504_v55 = vpop.f32.mrf.mxu0 }
 0x434   :  { %2912 = vrot.lane.b32.xlu0 %v2424_v19, %s5925_s21 }
 0x435   :  { %v2391_v27 = vpop.f32.mrf.mxu0 }
 0x436   :  { %v2425_v28 = vpack.c.bf16 %v5504_v55, %v2391_v27  ;;  %v5776_v55 = vld [vmem:[%s8527_s20 + $0x80] ss:$8 sps:$4 sm:$0xff]  }
 0x437   :  { %v5507_v23 = vpop.f32.mrf.mxu0  ;;  %v4520_v27 = vld [vmem:[%s8479_s8] ss:$0 sm:$0xff] }
 0x438   :  { %2670 = vrot.lane.b32.xlu0 %v2425_v28, %s5924_s23  ;;  %2934 = vrot.lane.b32.xlu1 %v4520_v27, %s5925_s21 }
 0x439   :  { %v2401_v45 = vpop.f32.mrf.mxu0 }
 0x43a   :  { %v2426_v44 = vpack.c.bf16 %v5507_v23, %v2401_v45 }
 0x43c   :  { %2914 = vrot.lane.b32.xlu0 %v2425_v28, %s5925_s21  ;;  %4943 = vmatprep.subr.bf16.mxu0 %v2426_v44 }
 0x43d   :  { %4944 = vmatpush3.bf16.msra.mxu0 %v2418_v33  ;;  %v5765_v33 = vld [vmem:[%s8527_s20 + $0x34] ss:$8 sps:$4 sm:$0xff]  }
 0x43e   :  { %4945 = vmatprep.subr.bf16.mxu0 %v2425_v28  ;;  %v5777_v28 = vld [vmem:[%s8527_s20 + $0x94] ss:$8 sps:$4 sm:$0xff]  }
 0x440   :  { %2672 = vrot.lane.b32.xlu0 %v2426_v44, %s5924_s23 }
 0x441   :  { %4946 = vmatpush3.bf16.msra.mxu0 %v2417_v3  ;;  %v5764_v3 = vld [vmem:[%s8527_s20 + $0x20] ss:$8 sps:$4 sm:$0xff]  }
 0x442   :  { %4947 = vmatprep.subr.bf16.mxu0 %v2424_v19 }
 0x444   :  { %2916 = vrot.lane.b32.xlu0 %v2426_v44, %s5925_s21 }
 0x445   :  { %4948 = vmatpush3.bf16.msra.mxu0 %v2416_v10  ;;  %v5763_v10 = vld [vmem:[%s8527_s20 + $0x24] ss:$8 sps:$4 sm:$0xff]  }
 0x446   :  { %4949 = vmatprep.subr.bf16.mxu0 %v2423_v4  ;;  %v5775_v4 = vld [vmem:[%s8527_s20 + $0x84] ss:$8 sps:$4 sm:$0xff]  }
 0x448   :  { %2908 = vrot.lane.b32.xlu0 %v2422_v43, %s5925_s21 }
 0x449   :  { %4950 = vmatpush3.bf16.msra.mxu0 %v6953_v8  ;;  %v5761_v8 = vld [vmem:[%s8527_s20 + $0x14] ss:$8 sps:$4 sm:$0xff]  }
 0x44a   :  { %4951 = vmatprep.subr.bf16.mxu0 %v2422_v43  ;;  %v5773_v43 = vld [vmem:[%s8527_s20 + $0x74] ss:$8 sps:$4 sm:$0xff]  }
 0x44c   :  { %2662 = vrot.lane.b32.xlu0 %v2421_v24, %s5924_s23 }
 0x44d   :  { %4952 = vmatpush3.bf16.msra.mxu0 %v6949_v25  ;;  %v5760_v25 = vld [vmem:[%s8527_s20] ss:$8 sps:$4 sm:$0xff]  }
 0x44e   :  { %4953 = vmatprep.subr.bf16.mxu0 %v2421_v24 }
 0x450   :  { %2906 = vrot.lane.b32.xlu0 %v2421_v24, %s5925_s21 }
 0x451   :  { %4954 = vmatpush3.bf16.msra.mxu0 %v2413_v59  ;;  %v5768_v59 = vld [vmem:[%s8527_s20 + $0x40] ss:$8 sps:$4 sm:$0xff]  }
 0x452   :  { %4955 = vmatprep.subr.bf16.mxu0 %v2420_v48 }
 0x454   :  { %2660 = vrot.lane.b32.xlu0 %v2420_v48, %s5924_s23 }
 0x455   :  { %4956 = vmatpush3.bf16.msra.mxu0 %v2412_v34 }
 0x456   :  { %4957 = vmatprep.subr.bf16.mxu0 %v6965_v15 }
 0x458   :  { %2904 = vrot.lane.b32.xlu0 %v2420_v48, %s5925_s21  ;;  %v5778_v48 = vld [vmem:[%s8527_s20 + $0x90] ss:$8 sps:$4 sm:$0xff]  }
 0x459   :  { %4958 = vmatpush3.bf16.msra.mxu0 %v6947_v61  ;;  %v5762_v61 = vld [vmem:[%s8527_s20 + $0x10] ss:$8 sps:$4 sm:$0xff]  }
 0x45c   :  { %2658 = vrot.lane.b32.xlu0 %v6965_v15, %s5924_s23  ;;  %2466 = vmatmul.mubr.bf16.vlgmr.msra.gmra.mxu0 %v5760_v25  ;;  %v5779_v25 = vld [vmem:[%s8527_s20 + $0xa4] ss:$8 sps:$4 sm:$0xff]  }
 0x45d   :  { %2473 = vmatprep.mubr.bf16.mxu0 %v5761_v8 }
 0x460   :  { %2902 = vrot.lane.b32.xlu0 %v6965_v15, %s5925_s21  ;;  %v7023_v15 = vpop.permute.xlu1 %2648 }
 0x464   :  { %2474 = vmatmul.mubr.bf16.gmra.mxu0 %v5762_v61  ;;  %v7031_v34 = vpop.permute.xlu1 %2650  ;;  %2690 = vrot.lane.b32.xlu0 %v4520_v27, %s5924_s23  ;;  %v5785_v27 = vld [vmem:[%s8527_s20 + $0xd4] ss:$8 sps:$4 sm:$0xff]  }
 0x465   :  { %2481 = vmatprep.mubr.bf16.mxu0 %v5763_v10 }
 0x468   :  { %v7039_v40 = vpop.permute.xlu1 %2894 }
 0x46c   :  { %2482 = vmatmul.mubr.bf16.gmra.mxu0 %v5764_v3  ;;  %v2653_v39 = vpop.permute.xlu1 %2652  ;;  %v5780_v3 = vld [vmem:[%s8527_s20 + $0xa0] ss:$8 sps:$4 sm:$0xff]  }
 0x46d   :  { %2489 = vmatprep.mubr.bf16.mxu0 %v5765_v33  ;;  %v5781_v33 = vld [vmem:[%s8527_s20 + $0xb4] ss:$8 sps:$4 sm:$0xff]  }
 0x470   :  { %v2897_v18 = vpop.permute.xlu1 %2896 }
 0x474   :  { %2490 = vmatmul.mubr.bf16.gmra.mxu0 %v5766_v31  ;;  %v2655_v6 = vpop.permute.xlu1 %2654 }
 0x475   :  { %2497 = vmatprep.mubr.bf16.mxu0 %v5767_v35 }
 0x478   :  { %v2899_v23 = vpop.permute.xlu1 %2898 }
 0x47c   :  { %2498 = vmatmul.mubr.bf16.gmra.mxu0 %v5768_v59  ;;  %v2657_v24 = vpop.permute.xlu1 %2656 }
 0x47d   :  { %2505 = vmatprep.mubr.bf16.mxu0 %v5769_v16  ;;  %v5782_v16 = vld [vmem:[%s8527_s20 + $0xb0] ss:$8 sps:$4 sm:$0xff]  }
 0x480   :  { %v2901_v61 = vpop.permute.xlu1 %2900 }
 0x484   :  { %2506 = vmatmul.mubr.bf16.gmra.mxu0 %v5770_v0  ;;  %v2893_v35 = vpop.permute.xlu1 %2892  ;;  %v5783_v0 = vld [vmem:[%s8527_s20 + $0xc4] ss:$8 sps:$4 sm:$0xff]  }
 0x485   :  { %2513 = vmatprep.mubr.bf16.mxu0 %v5771_v14 }
 0x488   :  { %v2647_v14 = vpop.permute.xlu1 %2646 }
 0x48c   :  { %2514 = vmatmul.mubr.bf16.gmra.mxu0 %v5772_v2 }
 0x48d   :  { %2521 = vmatprep.mubr.bf16.mxu0 %v5773_v43 }
 0x492   :  { %v2665_v38 = vpop.permute.xlu0 %2664 }
 0x494   :  { %2522 = vmatmul.mubr.bf16.gmra.mxu0 %v5774_v21  ;;  %v2891_v21 = vpop.permute.xlu1 %2890 }
 0x495   :  { %2529 = vmatprep.mubr.bf16.mxu0 %v5775_v4  ;;  %v5784_v4 = vld [vmem:[%s8527_s20 + $0xc0] ss:$8 sps:$4 sm:$0xff]  }
 0x49a   :  { %v2667_v19 = vpop.permute.xlu0 %2666 }
 0x49c   :  { %2530 = vmatmul.mubr.bf16.gmra.mxu0 %v5776_v55 }
 0x49d   :  { %2537 = vmatprep.mubr.bf16.mxu0 %v5777_v28 }
 0x49e   :  { %v2911_v45 = vpop.permute.xlu0 %2910 }
 0x4a2   :  { %v2669_v44 = vpop.permute.xlu0 %2668 }
 0x4a4   :  { %2538 = vmatmul.mubr.bf16.gmra.mxu0 %v5778_v48 }
 0x4a5   :  { %2545 = vmatprep.mubr.bf16.mxu0 %v5779_v25  ;;  %v5791_v25 = vld [vmem:[%s8527_s20 + $0xf0] ss:$8 sps:$4 sm:$0xff]  }
 0x4a6   :  { %v2913_v8 = vpop.permute.xlu0 %2912 }
 0x4aa   :  { %v2671_v10 = vpop.permute.xlu0 %2670 }
 0x4ac   :  { %2546 = vmatmul.mubr.bf16.gmra.mxu0 %v5780_v3  ;;  %v5795_v3 = vld [vmem:[#allocation5] ss:$8 sps:$4 sm:$0xff]  }
 0x4ad   :  { %2553 = vmatprep.mubr.bf16.mxu0 %v5781_v33  ;;  %v5796_v33 = vld [vmem:[%s8474_s3 + $0x24] ss:$8 sps:$4 sm:$0xff]  }
 0x4ae   :  { %v2915_v31 = vpop.permute.xlu0 %2914 }
 0x4b2   :  { %v2673_v59 = vpop.permute.xlu0 %2672 }
 0x4b3   :  { %5055 = vmatprep.subr.bf16.mxu1 %v2673_v59  ;;  %v5804_v59 = vld [vmem:[%s8474_s3 + $0x44] ss:$8 sps:$4 sm:$0xff]  }
 0x4b4   :  { %2554 = vmatmul.mubr.bf16.gmra.mxu0 %v5782_v16  ;;  %5056 = vmatpush3.bf16.msra.mxu1 %v2657_v24  ;;  %v5790_v24 = vld [vmem:[%s8474_s3] ss:$8 sps:$4 sm:$0xff]  }
 0x4b5   :  { %5057 = vmatprep.subr.bf16.mxu1 %v2671_v10  ;;  %2561 = vmatprep.mubr.bf16.mxu0 %v5783_v0  ;;  %v5794_v10 = vld [vmem:[%s8474_s3 + $0x10] ss:$8 sps:$4 sm:$0xff]   ;;  %v5806_v0 = vld [vmem:[%s8474_s3 + $0x40] ss:$8 sps:$4 sm:$0xff]  }
 0x4b6   :  { %v2917_v2 = vpop.permute.xlu0 %2916  ;;  %v5805_v16 = vld [vmem:[#allocation5 + $0x34] ss:$8 sps:$4 sm:$0xff]  }
 0x4b7   :  { %5167 = vmatprep.subr.bf16.mxu0 %v2917_v2  ;;  %v5808_v2 = vld [vmem:[%s8474_s3 + $0x54] ss:$8 sps:$4 sm:$0xff]  }
 0x4b8   :  { %5058 = vmatpush3.bf16.msra.mxu1 %v2655_v6  ;;  %5168 = vmatpush3.bf16.msra.mxu0 %v2901_v61  ;;  %v2645_v6 = vpop.permute.xlu1 %2644  ;;  %v5793_v61 = vld [vmem:[#allocation5 + $0x4] ss:$8 sps:$4 sm:$0xff]  }
 0x4b9   :  { %5059 = vmatprep.subr.bf16.mxu1 %v2669_v44  ;;  %5169 = vmatprep.subr.bf16.mxu0 %v2915_v31  ;;  %v5797_v31 = vld [vmem:[#allocation5 + $0x14] ss:$8 sps:$4 sm:$0xff]  }
 0x4ba   :  { %v2909_v43 = vpop.permute.xlu0 %2908 }
 0x4bc   :  { %2562 = vmatmul.mubr.bf16.gmra.mxu0 %v5784_v4  ;;  %5060 = vmatpush3.bf16.msra.mxu1 %v2653_v39  ;;  %v5786_v39 = vld [vmem:[%s8527_s20 + $0xd0] ss:$8 sps:$4 sm:$0xff]   ;;  %v5811_v4 = vld [vmem:[#allocation5 + $0x40] ss:$8 sps:$4 sm:$0xff]  }
 0x4bd   :  { %5170 = vmatpush3.bf16.msra.mxu0 %v2899_v23  ;;  %5061 = vmatprep.subr.bf16.mxu1 %v2667_v19 }
 0x4be   :  { %5171 = vmatprep.subr.bf16.mxu0 %v2913_v8  ;;  %v2663_v55 = vpop.permute.xlu0 %2662  ;;  %2569 = vmatprep.mubr.bf16.mxu0 %v5785_v27  ;;  %v5792_v8 = vld [vmem:[%s8474_s3 + $0x14] ss:$8 sps:$4 sm:$0xff]  }
 0x4bf   :  { %v5813_v27 = vld [vmem:[#allocation5 + $0x54] ss:$8 sps:$4 sm:$0xff]  }
 0x4c0   :  { %5062 = vmatpush3.bf16.msra.mxu1 %v7031_v34  ;;  %v5787_v34 = vld [vmem:[%s8527_s20 + $0xe4] ss:$8 sps:$4 sm:$0xff]  }
 0x4c1   :  { %5172 = vmatpush3.bf16.msra.mxu0 %v2897_v18  ;;  %5063 = vmatprep.subr.bf16.mxu1 %v2665_v38  ;;  %v2889_v18 = vpop.permute.xlu1 %2888 }
 0x4c2   :  { %5173 = vmatprep.subr.bf16.mxu0 %v2911_v45  ;;  %v2907_v28 = vpop.permute.xlu0 %2906 }
 0x4c4   :  { %2570 = vmatmul.mubr.bf16.gmra.mxu0 %v5786_v39  ;;  %5064 = vmatpush3.bf16.msra.mxu1 %v7023_v15  ;;  %v5788_v15 = vld [vmem:[%s8527_s20 + $0xe0] ss:$8 sps:$4 sm:$0xff]   ;;  %v5816_v39 = vld [vmem:[%s8474_s3 + $0x74] ss:$8 sps:$4 sm:$0xff]  }
 0x4c5   :  { %5174 = vmatpush3.bf16.msra.mxu0 %v7039_v40  ;;  %5065 = vmatprep.subr.bf16.mxu1 %v2663_v55  ;;  %v5789_v40 = vld [vmem:[%s8527_s20 + $0xf4] ss:$8 sps:$4 sm:$0xff]   ;;  %v2643_v23 = vpop.permute.xlu1 %2642  ;;  %v5812_v55 = vld [vmem:[%s8474_s3 + $0x64] ss:$8 sps:$4 sm:$0xff]  }
 0x4c6   :  { %5175 = vmatprep.subr.bf16.mxu0 %v2909_v43  ;;  %v2661_v19 = vpop.permute.xlu0 %2660  ;;  %2577 = vmatprep.mubr.bf16.mxu0 %v5787_v34  ;;  %v5809_v43 = vld [vmem:[#allocation5 + $0x44] ss:$8 sps:$4 sm:$0xff]  }
 0x4c7   :  { %v5818_v34 = vld [vmem:[%s8474_s3 + $0x70] ss:$8 sps:$4 sm:$0xff]  }
 0x4c8   :  { %5066 = vmatpush3.bf16.msra.mxu1 %v2647_v14  ;;  %v5807_v14 = vld [vmem:[#allocation5 + $0x30] ss:$8 sps:$4 sm:$0xff]  }
 0x4c9   :  { %5176 = vmatpush3.bf16.msra.mxu0 %v2893_v35  ;;  %5067 = vmatprep.subr.bf16.mxu1 %v2661_v19  ;;  %v2887_v48 = vpop.permute.xlu1 %2886  ;;  %v5799_v35 = vld [vmem:[#allocation5 + $0x10] ss:$8 sps:$4 sm:$0xff]   ;;  %v5817_v19 = vld [vmem:[#allocation5 + $0x64] ss:$8 sps:$4 sm:$0xff]  }
 0x4ca   :  { %5177 = vmatprep.subr.bf16.mxu0 %v2907_v28  ;;  %v2905_v38 = vpop.permute.xlu0 %2904  ;;  %v5815_v28 = vld [vmem:[#allocation5 + $0x50] ss:$8 sps:$4 sm:$0xff]  }
 0x4cc   :  { %2578 = vmatmul.mubr.bf16.gmra.mxu0 %v5788_v15  ;;  %5068 = vmatpush3.bf16.msra.mxu1 %v2645_v6  ;;  %v5814_v6 = vld [vmem:[%s8474_s3 + $0x60] ss:$8 sps:$4 sm:$0xff]  }
 0x4cd   :  { %5178 = vmatpush3.bf16.msra.mxu0 %v2891_v21  ;;  %2585 = vmatprep.mubr.bf16.mxu0 %v5789_v40  ;;  %v5810_v21 = vld [vmem:[%s8474_s3 + $0x50] ss:$8 sps:$4 sm:$0xff]   ;;  %v5822_v40 = vld [vmem:[%s8474_s3 + $0x80] ss:$8 sps:$4 sm:$0xff]  }
 0x4ce   :  { %5179 = vmatprep.subr.bf16.mxu0 %v2905_v38  ;;  %v2659_v45 = vpop.permute.xlu0 %2658  ;;  %v5820_v38 = vld [vmem:[%s8474_s3 + $0x84] ss:$8 sps:$4 sm:$0xff]   ;;  %v5821_v15 = vld [vmem:[#allocation5 + $0x74] ss:$8 sps:$4 sm:$0xff]  }
 0x4cf   :  { %5069 = vmatprep.subr.bf16.mxu1 %v2659_v45  ;;  %v5824_v45 = vld [vmem:[%s8474_s3 + $0x94] ss:$8 sps:$4 sm:$0xff]  }
 0x4d0   :  { %5070 = vmatpush3.bf16.msra.mxu1 %v2643_v23  ;;  %v5823_v23 = vld [vmem:[#allocation5 + $0x70] ss:$8 sps:$4 sm:$0xff]  }
 0x4d1   :  { %5180 = vmatpush3.bf16.msra.mxu0 %v2889_v18  ;;  %v5819_v18 = vld [vmem:[#allocation5 + $0x60] ss:$8 sps:$4 sm:$0xff]  }
 0x4d2   :  { %v2903_v44 = vpop.permute.xlu0 %2902 }
 0x4d3   :  { %2726 = vmatmul.mubr.bf16.vlgmr.msra.gmra.mxu1 %v5790_v24  ;;  %5181 = vmatprep.subr.bf16.mxu0 %v2903_v44  ;;  %v5825_v44 = vld [vmem:[#allocation5 + $0x84] ss:$8 sps:$4 sm:$0xff]  }
 0x4d4   :  { %2586 = vmatmul.mubr.bf16.gmra.mxu0 %v5791_v25  ;;  %2733 = vmatprep.mubr.bf16.mxu1 %v5792_v8  ;;  %v5826_v24 = vld [vmem:[%s8474_s3 + $0x90] ss:$8 sps:$4 sm:$0xff]   ;;  %v5827_v25 = vld [vmem:[#allocation5 + $0x80] ss:$8 sps:$4 sm:$0xff]  }
 0x4d5   :  { %5182 = vmatpush3.bf16.msra.mxu0 %v2887_v48  ;;  %2969 = vmatprep.mubr.bf16.mxu0 %v5793_v61  ;;  %v5828_v8 = vld [vmem:[%s8474_s3 + $0xa4] ss:$8 sps:$4 sm:$0xff]   ;;  %v5829_v61 = vld [vmem:[#allocation5 + $0x94] ss:$8 sps:$4 sm:$0xff]  }
 0x4d6   :  { %5279 = vmatprep.subr.mxu0 %v6940_v1  ;;  %v5798_v1 = vld [vmem:[%s8474_s3 + $0x20] ss:$8 sps:$4 sm:$0xff]  }
 0x4db   :  { %2734 = vmatmul.mubr.bf16.gmra.mxu1 %v5794_v10 }
 0x4dc   :  { %2970 = vmatmul.mubr.bf16.vlgmr.msra.gmra.mxu0 %v5795_v3  ;;  %2741 = vmatprep.mubr.bf16.mxu1 %v5796_v33 }
 0x4dd   :  { %5280 = vmatpush3.msra.mxu0 %v6808_v49  ;;  %2977 = vmatprep.mubr.bf16.mxu0 %v5797_v31 }
 0x4de   :  { %5281 = vmatprep.subr.mxu0 %v6932_v12  ;;  %v5803_v12 = vld [vmem:[#allocation5 + $0x20] ss:$8 sps:$4 sm:$0xff]  }
 0x4df   :  { %5282 = vmatpush3.msra.mxu0 %v6798_v5 }
 0x4e0   :  { %5283 = vmatprep.subr.mxu0 %v6929_v9  ;;  %v5800_v9 = vld [vmem:[%s8474_s3 + $0x34] ss:$8 sps:$4 sm:$0xff]  }
 0x4e1   :  { %5284 = vmatpush3.msra.mxu0 %v6791_v13 }
 0x4e2   :  { %5285 = vmatprep.subr.mxu0 %v6921_v58  ;;  %v5801_v58 = vld [vmem:[#allocation5 + $0x24] ss:$8 sps:$4 sm:$0xff]  }
 0x4e3   :  { %5286 = vmatpush3.msra.mxu0 %v6781_v60  ;;  %2742 = vmatmul.mubr.bf16.gmra.mxu1 %v5798_v1 }
 0x4e4   :  { %5287 = vmatprep.subr.mxu0 %v6910_v50  ;;  %2978 = vmatmul.mubr.bf16.gmra.mxu0 %v5799_v35  ;;  %v5802_v50 = vld [vmem:[%s8474_s3 + $0x30] ss:$8 sps:$4 sm:$0xff]   ;;  %v5830_v35 = vld [vmem:[%s8474_s3 + $0xa0] ss:$8 sps:$4 sm:$0xff]  }
 0x4e5   :  { %5288 = vmatpush3.msra.mxu0 %v6774_v7  ;;  %2749 = vmatprep.mubr.bf16.mxu1 %v5800_v9 }
 0x4e6   :  { %5289 = vmatprep.subr.mxu0 %v6900_v20  ;;  %2985 = vmatprep.mubr.bf16.mxu0 %v5801_v58  ;;  %v5831_v58 = vld [vmem:[#allocation5 + $0x90] ss:$8 sps:$4 sm:$0xff]  }
 0x4e7   :  { %5290 = vmatpush3.msra.mxu0 %v6764_v51  ;;  %v7309_v51 = vpop.permute.xlu0 %2690 }
 0x4e8   :  { %5291 = vmatprep.subr.mxu0 %v6893_v37 }
 0x4e9   :  { %5292 = vmatpush3.msra.mxu0 %v6757_v47 }
 0x4ea   :  { %5293 = vmatprep.subr.mxu0 %v6883_v36 }
 0x4eb   :  { %5294 = vmatpush3.msra.mxu0 %v6747_v42  ;;  %2750 = vmatmul.mubr.bf16.gmra.mxu1 %v5802_v50  ;;  %v5832_v50 = vld [vmem:[%s8474_s3 + $0xb4] ss:$8 sps:$4 sm:$0xff]  }
 0x4ec   :  { %5295 = vmatprep.subr.mxu0 %v6876_v30  ;;  %2986 = vmatmul.mubr.bf16.gmra.mxu0 %v5803_v12  ;;  %v5833_v12 = vld [vmem:[#allocation5 + $0xa4] ss:$8 sps:$4 sm:$0xff]  }
 0x4ed   :  { %5296 = vmatpush3.msra.mxu0 %v6740_v26  ;;  %2757 = vmatprep.mubr.bf16.mxu1 %v5804_v59 }
 0x4ee   :  { %5297 = vmatprep.subr.mxu0 %v6866_v29  ;;  %2993 = vmatprep.mubr.bf16.mxu0 %v5805_v16 }
 0x4ef   :  { %5298 = vmatpush3.msra.mxu0 %v6730_v54 }
 0x4f0   :  { %5299 = vmatprep.subr.mxu0 %v6859_v52 }
 0x4f1   :  { %5300 = vmatpush3.msra.mxu0 %v6722_v32 }
 0x4f2   :  { %5301 = vmatprep.subr.mxu0 %v6849_v22 }
 0x4f3   :  { %5302 = vmatpush3.msra.mxu0 %v6714_v63  ;;  %2758 = vmatmul.mubr.bf16.gmra.mxu1 %v5806_v0 }
 0x4f4   :  { %5303 = vmatprep.subr.mxu0 %v6842_v41  ;;  %2994 = vmatmul.mubr.bf16.gmra.mxu0 %v5807_v14 }
 0x4f5   :  { %5304 = vmatpush3.msra.mxu0 %v6706_v62  ;;  %2765 = vmatprep.mubr.bf16.mxu1 %v5808_v2 }
 0x4f6   :  { %5305 = vmatprep.subr.mxu0 %v6832_v17  ;;  %3001 = vmatprep.mubr.bf16.mxu0 %v5809_v43  ;;  %v5834_v43 = vld [vmem:[%s8474_s3 + $0xb0] ss:$8 sps:$4 sm:$0xff]  }
 0x4f7   :  { %5306 = vmatpush3.msra.mxu0 %v6698_v53 }
 0x4f8   :  { %5307 = vmatprep.subr.mxu0 %v6825_v57 }
 0x4f9   :  { %5308 = vmatpush3.msra.mxu0 %v6689_v46 }
 0x4fa   :  { %5309 = vmatprep.subr.mxu0 %v6815_v11 }
 0x4fb   :  { %5310 = vmatpush3.msra.mxu0 %v6679_v56  ;;  %2766 = vmatmul.mubr.bf16.gmra.mxu1 %v5810_v21 }
 0x4fc   :  { %3002 = vmatmul.mubr.bf16.gmra.mxu0 %v5811_v4  ;;  %2773 = vmatprep.mubr.bf16.mxu1 %v5812_v55  ;;  %v5835_v4 = vld [vmem:[#allocation5 + $0xa0] ss:$8 sps:$4 sm:$0xff]  }
 0x4fd   :  { %3009 = vmatprep.mubr.bf16.mxu0 %v5813_v27  ;;  %v5836_v55 = vld [vmem:[%s8474_s3 + $0xc4] ss:$8 sps:$4 sm:$0xff]   ;;  %v5837_v27 = vld [vmem:[#allocation5 + $0xb4] ss:$8 sps:$4 sm:$0xff]  }
 0x503   :  { %2774 = vmatmul.mubr.bf16.gmra.mxu1 %v5814_v6 }
 0x504   :  { %3010 = vmatmul.mubr.bf16.gmra.mxu0 %v5815_v28  ;;  %2781 = vmatprep.mubr.bf16.mxu1 %v5816_v39 }
 0x505   :  { %3017 = vmatprep.mubr.bf16.mxu0 %v5817_v19 }
 0x50b   :  { %2782 = vmatmul.mubr.bf16.gmra.mxu1 %v5818_v34 }
 0x50c   :  { %3018 = vmatmul.mubr.bf16.gmra.mxu0 %v5819_v18  ;;  %2789 = vmatprep.mubr.bf16.mxu1 %v5820_v38  ;;  %v5838_v18 = vld [vmem:[%s8474_s3 + $0xc0] ss:$8 sps:$4 sm:$0xff]  }
 0x50d   :  { %3025 = vmatprep.mubr.bf16.mxu0 %v5821_v15  ;;  %v5839_v15 = vld [vmem:[#allocation5 + $0xb0] ss:$8 sps:$4 sm:$0xff]  }
 0x513   :  { %2790 = vmatmul.mubr.bf16.gmra.mxu1 %v5822_v40  ;;  %v5840_v40 = vld [vmem:[%s8474_s3 + $0xd4] ss:$8 sps:$4 sm:$0xff]  }
 0x514   :  { %3026 = vmatmul.mubr.bf16.gmra.mxu0 %v5823_v23  ;;  %2797 = vmatprep.mubr.bf16.mxu1 %v5824_v45  ;;  %v5841_v23 = vld [vmem:[#allocation5 + $0xc4] ss:$8 sps:$4 sm:$0xff]  }
 0x515   :  { %3033 = vmatprep.mubr.bf16.mxu0 %v5825_v44 }
 0x51b   :  { %2798 = vmatmul.mubr.bf16.gmra.mxu1 %v5826_v24 }
 0x51c   :  { %v4959_v48 = vpop.f32.mrf.mxu0  ;;  %3034 = vmatmul.mubr.bf16.gmra.mxu0 %v5827_v25  ;;  %2805 = vmatprep.mubr.bf16.mxu1 %v5828_v8  ;;  %v5842_v8 = vld [vmem:[%s8474_s3 + $0xd0] ss:$8 sps:$4 sm:$0xff]  }
 0x51d   :  { %3041 = vmatprep.mubr.bf16.mxu0 %v5829_v61 }
 0x51e   :  { %v4960_v10 = vpop.f32.mrf.mxu0 }
 0x51f   :  { %v7198_v3 = vadd.f32 %v4960_v10, %v4959_v48  ;;  %v5843_v10 = vld [vmem:[#allocation5 + $0xc0] ss:$8 sps:$4 sm:$0xff]  }
 0x520   :  { %v4962_v33 = vpop.f32.mrf.mxu0 }
 0x521   :  { %8569 = vst [vmem:[#allocation11_spill] sm:$0xff] %v7198_v3 }
 0x522   :  { %v4963_v31 = vpop.f32.mrf.mxu0 }
 0x523   :  { %v7200_v1 = vadd.f32 %v4963_v31, %v4962_v33  ;;  %2806 = vmatmul.mubr.bf16.gmra.mxu1 %v5830_v35  ;;  %v5844_v33 = vld [vmem:[%s8474_s3 + $0xe4] ss:$8 sps:$4 sm:$0xff]   ;;  %v5845_v31 = vld [vmem:[#allocation5 + $0xd4] ss:$8 sps:$4 sm:$0xff]  }
 0x524   :  { %v4965_v9 = vpop.f32.mrf.mxu0  ;;  %3042 = vmatmul.mubr.bf16.gmra.mxu0 %v5831_v58  ;;  %2813 = vmatprep.mubr.bf16.mxu1 %v5832_v50 }
 0x525   :  { %3049 = vmatprep.mubr.bf16.mxu0 %v5833_v12  ;;  %v5846_v12 = vld [vmem:[%s8474_s3 + $0xe0] ss:$8 sps:$4 sm:$0xff]  }
 0x526   :  { %v4966_v59 = vpop.f32.mrf.mxu0 }
 0x527   :  { %v7208_v16 = vadd.f32 %v4966_v59, %v4965_v9 }
 0x528   :  { %v4968_v0 = vpop.f32.mrf.mxu0 }
 0x529   :  { %8570 = vst [vmem:[#allocation12_spill] sm:$0xff] %v7208_v16 }
 0x52a   :  { %v4969_v14 = vpop.f32.mrf.mxu0 }
 0x52b   :  { %v7210_v2 = vadd.f32 %v4969_v14, %v4968_v0  ;;  %2814 = vmatmul.mubr.bf16.gmra.mxu1 %v5834_v43  ;;  %v5847_v0 = vld [vmem:[#allocation5 + $0xd0] ss:$8 sps:$4 sm:$0xff]   ;;  %v5849_v43 = vld [vmem:[#allocation5 + $0xe4] ss:$8 sps:$4 sm:$0xff]  }
 0x52c   :  { %v4971_v21 = vpop.f32.mrf.mxu0  ;;  %3050 = vmatmul.mubr.bf16.gmra.mxu0 %v5835_v4  ;;  %2821 = vmatprep.mubr.bf16.mxu1 %v5836_v55  ;;  %v5848_v14 = vld [vmem:[%s8474_s3 + $0xf4] ss:$8 sps:$4 sm:$0xff]  }
 0x52d   :  { %8571 = vst [vmem:[#allocation13_spill] sm:$0xff] %v7210_v2  ;;  %3057 = vmatprep.mubr.bf16.mxu0 %v5837_v27 }
 0x52e   :  { %v4972_v6 = vpop.f32.mrf.mxu0 }
 0x52f   :  { %v7218_v28 = vadd.f32 %v4972_v6, %v4971_v21 }
 0x530   :  { %v4974_v39 = vpop.f32.mrf.mxu0 }
 0x531   :  { %8572 = vst [vmem:[#allocation14_spill] sm:$0xff] %v7218_v28 }
 0x532   :  { %v4975_v19 = vpop.f32.mrf.mxu0 }
 0x533   :  { %v7220_v34 = vadd.f32 %v4975_v19, %v4974_v39  ;;  %2822 = vmatmul.mubr.bf16.gmra.mxu1 %v5838_v18  ;;  %v5850_v39 = vld [vmem:[%s8474_s3 + $0xf0] ss:$8 sps:$4 sm:$0xff]   ;;  %v5851_v18 = vld [vmem:[#allocation5 + $0xe0] ss:$8 sps:$4 sm:$0xff]  }
 0x534   :  { %v4977_v38 = vpop.f32.mrf.mxu0  ;;  %3058 = vmatmul.mubr.bf16.gmra.mxu0 %v5839_v15  ;;  %2829 = vmatprep.mubr.bf16.mxu1 %v5840_v40 }
 0x535   :  { %3065 = vmatprep.mubr.bf16.mxu0 %v5841_v23 }
 0x536   :  { %v4978_v45 = vpop.f32.mrf.mxu0 }
 0x537   :  { %v7228_v44 = vadd.f32 %v4978_v45, %v4977_v38  ;;  %v5852_v38 = vld [vmem:[#allocation5 + $0xf4] ss:$8 sps:$4 sm:$0xff]  }
 0x538   :  { %v4980_v24 = vpop.f32.mrf.mxu0 }
 0x53a   :  { %v4981_v48 = vpop.f32.mrf.mxu0 }
 0x53b   :  { %v7230_v25 = vadd.f32 %v4981_v48, %v4980_v24  ;;  %2830 = vmatmul.mubr.bf16.gmra.mxu1 %v5842_v8  ;;  %v5853_v8 = vld [vmem:[#allocation5 + $0xf0] ss:$8 sps:$4 sm:$0xff]  }
 0x53c   :  { %v7235_v61 = vpop.f32.mrf.mxu0  ;;  %3066 = vmatmul.mubr.bf16.gmra.mxu0 %v5843_v10  ;;  %2837 = vmatprep.mubr.bf16.mxu1 %v5844_v33 }
 0x53d   :  { %3073 = vmatprep.mubr.bf16.mxu0 %v5845_v31 }
 0x53e   :  { %v7240_v35 = vpop.f32.mrf.mxu0 }
 0x540   :  { %v4986_v9 = vpop.f32.mrf.mxu0 }
 0x542   :  { %v4987_v58 = vpop.f32.mrf.mxu0 }
 0x543   :  { %v7242_v50 = vadd.f32 %v4987_v58, %v4986_v9  ;;  %2838 = vmatmul.mubr.bf16.gmra.mxu1 %v5846_v12 }
 0x544   :  { %v4989_v59 = vpop.f32.mrf.mxu0  ;;  %3074 = vmatmul.mubr.bf16.gmra.mxu0 %v5847_v0  ;;  %2845 = vmatprep.mubr.bf16.mxu1 %v5848_v14 }
 0x545   :  { %3081 = vmatprep.mubr.bf16.mxu0 %v5849_v43 }
 0x546   :  { %v4990_v21 = vpop.f32.mrf.mxu0 }
 0x547   :  { %v7250_v4 = vadd.f32 %v4990_v21, %v4989_v59 }
 0x548   :  { %v4992_v55 = vpop.f32.mrf.mxu0 }
 0x54a   :  { %v4993_v27 = vpop.f32.mrf.mxu0 }
 0x54b   :  { %v7252_v6 = vadd.f32 %v4993_v27, %v4992_v55  ;;  %2846 = vmatmul.mubr.bf16.gmra.mxu1 %v5850_v39 }
 0x54c   :  { %v4995_v19 = vpop.f32.mrf.mxu0  ;;  %3082 = vmatmul.mubr.bf16.gmra.mxu0 %v5851_v18 }
 0x54d   :  { %3089 = vmatprep.mubr.bf16.mxu0 %v5852_v38 }
 0x54e   :  { %v4996_v15 = vpop.f32.mrf.mxu0 }
 0x54f   :  { %v7257_v40 = vadd.f32 %v4996_v15, %v4995_v19 }
 0x550   :  { %v4998_v23 = vpop.f32.mrf.mxu0 }
 0x552   :  { %v4999_v45 = vpop.f32.mrf.mxu0 }
 0x553   :  { %v7259_v24 = vadd.f32 %v4999_v45, %v4998_v23 }
 0x554   :  { %v5001_v48 = vpop.f32.mrf.mxu0  ;;  %3090 = vmatmul.mubr.bf16.gmra.mxu0 %v5853_v8 }
 0x556   :  { %v5002_v10 = vpop.f32.mrf.mxu0 }
 0x557   :  { %v7261_v33 = vadd.f32 %v5002_v10, %v5001_v48 }
 0x558   :  { %v5004_v31 = vpop.f32.mrf.mxu0 }
 0x55a   :  { %v5005_v9 = vpop.f32.mrf.mxu0 }
 0x55b   :  { %v7263_v58 = vadd.f32 %v5005_v9, %v5004_v31 }
 0x55c   :  { %v5007_v12 = vpop.f32.mrf.mxu0 }
 0x55e   :  { %v5008_v59 = vpop.f32.mrf.mxu0 }
 0x55f   :  { %v7265_v0 = vadd.f32 %v5008_v59, %v5007_v12 }
 0x560   :  { %v5010_v14 = vpop.f32.mrf.mxu0 }
 0x561   :  { %8573 = vst [vmem:[#allocation15_spill] sm:$0xff] %v7265_v0 }
 0x562   :  { %v5011_v43 = vpop.f32.mrf.mxu0 }
 0x563   :  { %v7267_v21 = vadd.f32 %v5011_v43, %v5010_v14 }
 0x564   :  { %v5013_v55 = vpop.f32.mrf.mxu0 }
 0x565   :  { %8574 = vst [vmem:[#allocation16_spill] sm:$0xff] %v7267_v21 }
 0x566   :  { %v5014_v27 = vpop.f32.mrf.mxu0 }
 0x567   :  { %v7269_v39 = vadd.f32 %v5014_v27, %v5013_v55 }
 0x568   :  { %v5016_v19 = vpop.f32.mrf.mxu0 }
 0x569   :  { %8575 = vst [vmem:[#allocation43_spill] sm:$0xff] %v7269_v39 }
 0x56a   :  { %v5017_v18 = vpop.f32.mrf.mxu0 }
 0x56b   :  { %v7271_v38 = vadd.f32 %v5017_v18, %v5016_v19 }
 0x56c   :  { %v5019_v15 = vpop.f32.mrf.mxu0 }
 0x56d   :  { %8576 = vst [vmem:[#allocation44_spill] sm:$0xff] %v7271_v38 }
 0x56e   :  { %v5020_v23 = vpop.f32.mrf.mxu0 }
 0x56f   :  { %v7273_v45 = vadd.f32 %v5020_v23, %v5019_v15 }
 0x570   :  { %v5022_v48 = vpop.f32.mrf.mxu0 }
 0x571   :  { %8577 = vst [vmem:[#allocation45_spill] sm:$0xff] %v7273_v45 }
 0x572   :  { %v5023_v8 = vpop.f32.mrf.mxu0 }
 0x573   :  { %v7275_v10 = vadd.f32 %v5023_v8, %v5022_v48 }
 0x574   :  { %v5025_v31 = vpop.f32.mrf.mxu0 }
 0x576   :  { %v5026_v9 = vpop.f32.mrf.mxu0 }
 0x577   :  { %v7277_v12 = vadd.f32 %v5026_v9, %v5025_v31 }
 0x578   :  { %v5028_v59 = vpop.f32.mrf.mxu0 }
 0x57a   :  { %v5029_v14 = vpop.f32.mrf.mxu0 }
 0x57b   :  { %v7279_v43 = vadd.f32 %v5029_v14, %v5028_v59 }
 0x57c   :  { %v5031_v55 = vpop.f32.mrf.mxu0 }
 0x57e   :  { %v5032_v27 = vpop.f32.mrf.mxu0 }
 0x57f   :  { %v7281_v19 = vadd.f32 %v5032_v27, %v5031_v55 }
 0x580   :  { %v5034_v18 = vpop.f32.mrf.mxu0 }
 0x582   :  { %v5035_v37 = vpop.f32.mrf.mxu0 }
 0x583   :  { %v7283_v15 = vadd.f32 %v5035_v37, %v5034_v18 }
 0x584   :  { %v5037_v23 = vpop.f32.mrf.mxu0 }
 0x586   :  { %v5038_v20 = vpop.f32.mrf.mxu0 }
 0x587   :  { %v7285_v48 = vadd.f32 %v5038_v20, %v5037_v23 }
 0x588   :  { %v5040_v8 = vpop.f32.mrf.mxu0 }
 0x58a   :  { %v5041_v36 = vpop.f32.mrf.mxu0 }
 0x58b   :  { %v7287_v31 = vadd.f32 %v5041_v36, %v5040_v8 }
 0x58c   :  { %v5043_v9 = vpop.f32.mrf.mxu0 }
 0x58e   :  { %v5044_v29 = vpop.f32.mrf.mxu0 }
 0x58f   :  { %v7289_v59 = vadd.f32 %v5044_v29, %v5043_v9 }
 0x590   :  { %v5046_v14 = vpop.f32.mrf.mxu0 }
 0x592   :  { %v5047_v30 = vpop.f32.mrf.mxu0 }
 0x593   :  { %v7291_v55 = vadd.f32 %v5047_v30, %v5046_v14  ;;  %v5071_v27 = vpop.f32.mrf.mxu1 }
 0x594   :  { %v5049_v22 = vpop.f32.mrf.mxu0 }
 0x595   :  { %v5072_v37 = vpop.f32.mrf.mxu1 }
 0x596   :  { %v7293_v18 = vadd.f32 %v5072_v37, %v5071_v27  ;;  %v5050_v52 = vpop.f32.mrf.mxu0 }
 0x597   :  { %v7295_v20 = vadd.f32 %v5050_v52, %v5049_v22  ;;  %v5074_v23 = vpop.f32.mrf.mxu1 }
 0x598   :  { %v5052_v17 = vpop.f32.mrf.mxu0 }
 0x599   :  { %v5075_v36 = vpop.f32.mrf.mxu1 }
 0x59a   :  { %v7297_v8 = vadd.f32 %v5075_v36, %v5074_v23  ;;  %v5053_v41 = vpop.f32.mrf.mxu0 }
 0x59b   :  { %v7299_v29 = vadd.f32 %v5053_v41, %v5052_v17  ;;  %v5077_v9 = vpop.f32.mrf.mxu1 }
 0x59c   :  { %v5183_v11 = vpop.f32.mrf.mxu0 }
 0x59d   :  { %v5078_v30 = vpop.f32.mrf.mxu1 }
 0x59e   :  { %v7301_v14 = vadd.f32 %v5078_v30, %v5077_v9  ;;  %v5184_v57 = vpop.f32.mrf.mxu0 }
 0x59f   :  { %v7303_v5 = vadd.f32 %v5184_v57, %v5183_v11  ;;  %v5080_v27 = vpop.f32.mrf.mxu1 }
 0x5a0   :  { %v5186_v37 = vpop.f32.mrf.mxu0 }
 0x5a1   :  { %v5081_v22 = vpop.f32.mrf.mxu1 }
 0x5a2   :  { %v7305_v52 = vadd.f32 %v5081_v22, %v5080_v27  ;;  %v5187_v49 = vpop.f32.mrf.mxu0 }
 0x5a3   :  { %v7307_v60 = vadd.f32 %v5187_v49, %v5186_v37  ;;  %v5083_v23 = vpop.f32.mrf.mxu1 }
 0x5a4   :  { %v5189_v36 = vpop.f32.mrf.mxu0 }
 0x5a5   :  { %v5084_v17 = vpop.f32.mrf.mxu1 }
 0x5a6   :  { %v5085_v41 = vadd.f32 %v5084_v17, %v5083_v23  ;;  %v5190_v13 = vpop.f32.mrf.mxu0 }
 0x5a7   :  { %v7311_v9 = vadd.f32 %v5190_v13, %v5189_v36  ;;  %v5086_v30 = vpop.f32.mrf.mxu1 }
 0x5a8   :  { %v2744_v11 = vadd.f32 %v5085_v41, %v7309_v51  ;;  %v5192_v57 = vpop.f32.mrf.mxu0 }
 0x5a9   :  { %v5087_v7 = vpop.f32.mrf.mxu1 }
 0x5aa   :  { %v2858_v42 = vmax.f32 %v2744_v11, 0.0  ;;  %v5088_v27 = vadd.f32 %v5087_v7, %v5086_v30  ;;  %v5193_v22 = vpop.f32.mrf.mxu0 }
 0x5ab   :  { %v7314_v47 = vadd.f32 %v5193_v22, %v5192_v57  ;;  %v5089_v49 = vpop.f32.mrf.mxu1 }
 0x5ac   :  { %v2747_v37 = vadd.f32 %v5088_v27, %v7309_v51  ;;  %3170 = vrot.lane.b32.xlu1 %v2858_v42, %s5926_s14  ;;  %v5195_v23 = vpop.f32.mrf.mxu0  ;;  %v7322_v42 = vpop.permute.xlu1 %2934 }
 0x5ad   :  { %v5090_v17 = vpop.f32.mrf.mxu1 }
 0x5ae   :  { %v2859_v54 = vmax.f32 %v2747_v37, 0.0  ;;  %v5091_v13 = vadd.f32 %v5090_v17, %v5089_v49  ;;  %v5196_v36 = vpop.f32.mrf.mxu0 }
 0x5af   :  { %v7318_v26 = vadd.f32 %v5196_v36, %v5195_v23  ;;  %v5092_v41 = vpop.f32.mrf.mxu1 }
 0x5b0   :  { %v2752_v63 = vadd.f32 %v5091_v13, %v7309_v51  ;;  %3172 = vrot.lane.b32.xlu1 %v2859_v54, %s5926_s14  ;;  %v5198_v7 = vpop.f32.mrf.mxu0 }
 0x5b1   :  { %v5093_v30 = vpop.f32.mrf.mxu1 }
 0x5b2   :  { %v2860_v11 = vmax.f32 %v2752_v63, 0.0  ;;  %v5094_v57 = vadd.f32 %v5093_v30, %v5092_v41  ;;  %v5199_v22 = vpop.f32.mrf.mxu0 }
 0x5b3   :  { %v5200_v27 = vadd.f32 %v5199_v22, %v5198_v7  ;;  %v5095_v32 = vpop.f32.mrf.mxu1 }
 0x5b4   :  { %v2755_v37 = vadd.f32 %v5094_v57, %v7309_v51  ;;  %3174 = vrot.lane.b32.xlu1 %v2860_v11, %s5926_s14  ;;  %v5201_v49 = vpop.f32.mrf.mxu0 }
 0x5b5   :  { %v2991_v23 = vadd.f32 %v5200_v27, %v7322_v42  ;;  %v5096_v17 = vpop.f32.mrf.mxu1 }
 0x5b6   :  { %v2861_v13 = vmax.f32 %v2755_v37, 0.0  ;;  %v5097_v36 = vadd.f32 %v5096_v17, %v5095_v32  ;;  %v5202_v54 = vpop.f32.mrf.mxu0 }
 0x5b7   :  { %v3103_v53 = vmax.f32 %v2991_v23, 0.0  ;;  %v5203_v62 = vadd.f32 %v5202_v54, %v5201_v49  ;;  %v5098_v63 = vpop.f32.mrf.mxu1 }
 0x5b8   :  { %v2760_v41 = vadd.f32 %v5097_v36, %v7309_v51  ;;  %3176 = vrot.lane.b32.xlu1 %v2861_v13, %s5926_s14  ;;  %v5204_v7 = vpop.f32.mrf.mxu0 }
 0x5b9   :  { %v2996_v30 = vadd.f32 %v5203_v62, %v7322_v42  ;;  %v5099_v57 = vpop.f32.mrf.mxu1  ;;  %3300 = vrot.lane.b32.xlu0 %v3103_v53, %s5925_s21 }
 0x5ba   :  { %v2862_v11 = vmax.f32 %v2760_v41, 0.0  ;;  %v5100_v22 = vadd.f32 %v5099_v57, %v5098_v63  ;;  %v5205_v27 = vpop.f32.mrf.mxu0 }
 0x5bb   :  { %v3104_v56 = vmax.f32 %v2996_v30, 0.0  ;;  %v5206_v37 = vadd.f32 %v5205_v27, %v5204_v7  ;;  %v5101_v32 = vpop.f32.mrf.mxu1 }
 0x5bc   :  { %v2763_v23 = vadd.f32 %v5100_v22, %v7309_v51  ;;  %3178 = vrot.lane.b32.xlu1 %v2862_v11, %s5926_s14  ;;  %v5207_v49 = vpop.f32.mrf.mxu0 }
 0x5bd   :  { %v2999_v17 = vadd.f32 %v5206_v37, %v7322_v42  ;;  %v5102_v13 = vpop.f32.mrf.mxu1  ;;  %3302 = vrot.lane.b32.xlu0 %v3104_v56, %s5925_s21 }
 0x5be   :  { %v2863_v62 = vmax.f32 %v2763_v23, 0.0  ;;  %v5103_v36 = vadd.f32 %v5102_v13, %v5101_v32  ;;  %v5208_v54 = vpop.f32.mrf.mxu0 }
 0x5bf   :  { %v3105_v53 = vmax.f32 %v2999_v17, 0.0  ;;  %v5209_v41 = vadd.f32 %v5208_v54, %v5207_v49  ;;  %v5104_v63 = vpop.f32.mrf.mxu1 }
 0x5c0   :  { %v2768_v30 = vadd.f32 %v5103_v36, %v7309_v51  ;;  %3180 = vrot.lane.b32.xlu1 %v2863_v62, %s5926_s14  ;;  %v5210_v7 = vpop.f32.mrf.mxu0 }
 0x5c1   :  { %v3004_v57 = vadd.f32 %v5209_v41, %v7322_v42  ;;  %v5105_v11 = vpop.f32.mrf.mxu1  ;;  %3304 = vrot.lane.b32.xlu0 %v3105_v53, %s5925_s21 }
 0x5c2   :  { %v2864_v22 = vmax.f32 %v2768_v30, 0.0  ;;  %v5106_v27 = vadd.f32 %v5105_v11, %v5104_v63  ;;  %v5211_v37 = vpop.f32.mrf.mxu0 }
 0x5c3   :  { %v3106_v56 = vmax.f32 %v3004_v57, 0.0  ;;  %v5212_v23 = vadd.f32 %v5211_v37, %v5210_v7  ;;  %v5107_v32 = vpop.f32.mrf.mxu1 }
 0x5c4   :  { %v2771_v17 = vadd.f32 %v5106_v27, %v7309_v51  ;;  %3182 = vrot.lane.b32.xlu1 %v2864_v22, %s5926_s14  ;;  %v5213_v49 = vpop.f32.mrf.mxu0 }
 0x5c5   :  { %v3007_v13 = vadd.f32 %v5212_v23, %v7322_v42  ;;  %v5108_v62 = vpop.f32.mrf.mxu1  ;;  %3306 = vrot.lane.b32.xlu0 %v3106_v56, %s5925_s21 }
 0x5c6   :  { %v2865_v36 = vmax.f32 %v2771_v17, 0.0  ;;  %v5109_v54 = vadd.f32 %v5108_v62, %v5107_v32  ;;  %v5214_v41 = vpop.f32.mrf.mxu0 }
 0x5c7   :  { %v3107_v53 = vmax.f32 %v3007_v13, 0.0  ;;  %v5215_v30 = vadd.f32 %v5214_v41, %v5213_v49  ;;  %v5110_v63 = vpop.f32.mrf.mxu1 }
 0x5c8   :  { %v2776_v57 = vadd.f32 %v5109_v54, %v7309_v51  ;;  %3184 = vrot.lane.b32.xlu1 %v2865_v36, %s5926_s14  ;;  %v5216_v7 = vpop.f32.mrf.mxu0 }
 0x5c9   :  { %v3012_v11 = vadd.f32 %v5215_v30, %v7322_v42  ;;  %v5111_v22 = vpop.f32.mrf.mxu1  ;;  %3308 = vrot.lane.b32.xlu0 %v3107_v53, %s5925_s21 }
 0x5ca   :  { %v2866_v27 = vmax.f32 %v2776_v57, 0.0  ;;  %v5112_v37 = vadd.f32 %v5111_v22, %v5110_v63  ;;  %v5217_v23 = vpop.f32.mrf.mxu0 }
 0x5cb   :  { %v3108_v56 = vmax.f32 %v3012_v11, 0.0  ;;  %v5218_v17 = vadd.f32 %v5217_v23, %v5216_v7  ;;  %v5113_v32 = vpop.f32.mrf.mxu1 }
 0x5cc   :  { %v2779_v13 = vadd.f32 %v5112_v37, %v7309_v51  ;;  %3186 = vrot.lane.b32.xlu1 %v2866_v27, %s5926_s14  ;;  %v5219_v49 = vpop.f32.mrf.mxu0 }
 0x5cd   :  { %v3015_v62 = vadd.f32 %v5218_v17, %v7322_v42  ;;  %v5114_v36 = vpop.f32.mrf.mxu1  ;;  %3310 = vrot.lane.b32.xlu0 %v3108_v56, %s5925_s21 }
 0x5ce   :  { %v2867_v54 = vmax.f32 %v2779_v13, 0.0  ;;  %v5115_v41 = vadd.f32 %v5114_v36, %v5113_v32  ;;  %v5220_v30 = vpop.f32.mrf.mxu0 }
 0x5cf   :  { %v3109_v53 = vmax.f32 %v3015_v62, 0.0  ;;  %v5221_v57 = vadd.f32 %v5220_v30, %v5219_v49  ;;  %v5116_v63 = vpop.f32.mrf.mxu1 }
 0x5d0   :  { %v2784_v11 = vadd.f32 %v5115_v41, %v7309_v51  ;;  %3188 = vrot.lane.b32.xlu1 %v2867_v54, %s5926_s14  ;;  %v5222_v7 = vpop.f32.mrf.mxu0 }
 0x5d1   :  { %v3020_v22 = vadd.f32 %v5221_v57, %v7322_v42  ;;  %v5117_v27 = vpop.f32.mrf.mxu1  ;;  %3312 = vrot.lane.b32.xlu0 %v3109_v53, %s5925_s21 }
 0x5d2   :  { %v2868_v37 = vmax.f32 %v2784_v11, 0.0  ;;  %v5118_v23 = vadd.f32 %v5117_v27, %v5116_v63  ;;  %v5223_v17 = vpop.f32.mrf.mxu0 }
 0x5d3   :  { %v3110_v56 = vmax.f32 %v3020_v22, 0.0  ;;  %v5224_v13 = vadd.f32 %v5223_v17, %v5222_v7  ;;  %v5119_v32 = vpop.f32.mrf.mxu1 }
 0x5d4   :  { %v2787_v62 = vadd.f32 %v5118_v23, %v7309_v51  ;;  %3190 = vrot.lane.b32.xlu1 %v2868_v37, %s5926_s14  ;;  %v5225_v49 = vpop.f32.mrf.mxu0 }
 0x5d5   :  { %v3023_v36 = vadd.f32 %v5224_v13, %v7322_v42  ;;  %v5120_v54 = vpop.f32.mrf.mxu1  ;;  %3314 = vrot.lane.b32.xlu0 %v3110_v56, %s5925_s21 }
 0x5d6   :  { %v2869_v41 = vmax.f32 %v2787_v62, 0.0  ;;  %v7359_v30 = vadd.f32 %v5120_v54, %v5119_v32  ;;  %v5226_v53 = vpop.f32.mrf.mxu0 }
 0x5d7   :  { %v3111_v57 = vmax.f32 %v3023_v36, 0.0  ;;  %v5227_v63 = vadd.f32 %v5226_v53, %v5225_v49  ;;  %v5122_v11 = vpop.f32.mrf.mxu1 }
 0x5d8   :  { %3192 = vrot.lane.b32.xlu1 %v2869_v41, %s5926_s14  ;;  %v5228_v7 = vpop.f32.mrf.mxu0 }
 0x5d9   :  { %v3028_v22 = vadd.f32 %v5227_v63, %v7322_v42  ;;  %v5123_v27 = vpop.f32.mrf.mxu1  ;;  %3316 = vrot.lane.b32.xlu0 %v3111_v57, %s5925_s21 }
 0x5da   :  { %v7364_v37 = vadd.f32 %v5123_v27, %v5122_v11  ;;  %v5229_v23 = vpop.f32.mrf.mxu0 }
 0x5db   :  { %v3112_v17 = vmax.f32 %v3028_v22, 0.0  ;;  %v5230_v56 = vadd.f32 %v5229_v23, %v5228_v7  ;;  %v7366_v13 = vpop.f32.mrf.mxu1 }
 0x5dc   :  { %v5231_v32 = vpop.f32.mrf.mxu0 }
 0x5dd   :  { %v3031_v62 = vadd.f32 %v5230_v56, %v7322_v42  ;;  %v7369_v49 = vpop.f32.mrf.mxu1  ;;  %3318 = vrot.lane.b32.xlu0 %v3112_v17, %s5925_s21 }
 0x5de   :  { %v5232_v36 = vpop.f32.mrf.mxu0 }
 0x5df   :  { %v3113_v54 = vmax.f32 %v3031_v62, 0.0  ;;  %v7372_v41 = vadd.f32 %v5232_v36, %v5231_v32  ;;  %v5128_v53 = vpop.f32.mrf.mxu1 }
 0x5e0   :  { %v5234_v57 = vpop.f32.mrf.mxu0 }
 0x5e1   :  { %v5129_v63 = vpop.f32.mrf.mxu1  ;;  %3320 = vrot.lane.b32.xlu0 %v3113_v54, %s5925_s21 }
 0x5e2   :  { %v5130_v11 = vadd.f32 %v5129_v63, %v5128_v53  ;;  %v5235_v7 = vpop.f32.mrf.mxu0 }
 0x5e3   :  { %v7375_v22 = vadd.f32 %v5235_v7, %v5234_v57  ;;  %v5131_v27 = vpop.f32.mrf.mxu1 }
 0x5e4   :  { %v2803_v23 = vadd.f32 %v5130_v11, %v7309_v51  ;;  %v5237_v56 = vpop.f32.mrf.mxu0 }
 0x5e5   :  { %v5132_v46 = vpop.f32.mrf.mxu1 }
 0x5e6   :  { %v2873_v3 = vmax.f32 %v2803_v23, 0.0  ;;  %v5133_v17 = vadd.f32 %v5132_v46, %v5131_v27  ;;  %v5238_v0 = vpop.f32.mrf.mxu0 }
 0x5e7   :  { %v7378_v62 = vadd.f32 %v5238_v0, %v5237_v56  ;;  %v5134_v32 = vpop.f32.mrf.mxu1 }
 0x5e8   :  { %v2808_v36 = vadd.f32 %v5133_v17, %v7309_v51  ;;  %3200 = vrot.lane.b32.xlu1 %v2873_v3, %s5926_s14  ;;  %v7382_v54 = vpop.f32.mrf.mxu0 }
 0x5e9   :  { %v5135_v53 = vpop.f32.mrf.mxu1 }
 0x5ea   :  { %v2874_v57 = vmax.f32 %v2808_v36, 0.0  ;;  %v5136_v63 = vadd.f32 %v5135_v53, %v5134_v32  ;;  %v7384_v7 = vpop.f32.mrf.mxu0 }
 0x5eb   :  { %v5137_v11 = vpop.f32.mrf.mxu1 }
 0x5ec   :  { %v2811_v21 = vadd.f32 %v5136_v63, %v7309_v51  ;;  %3202 = vrot.lane.b32.xlu1 %v2874_v57, %s5926_s14  ;;  %v5243_v46 = vpop.f32.mrf.mxu0 }
 0x5ed   :  { %v5138_v0 = vpop.f32.mrf.mxu1 }
 0x5ee   :  { %v2875_v27 = vmax.f32 %v2811_v21, 0.0  ;;  %v5139_v23 = vadd.f32 %v5138_v0, %v5137_v11  ;;  %v5244_v56 = vpop.f32.mrf.mxu0 }
 0x5ef   :  { %v5245_v17 = vadd.f32 %v5244_v56, %v5243_v46  ;;  %v5140_v16 = vpop.f32.mrf.mxu1 }
 0x5f0   :  { %v2816_v3 = vadd.f32 %v5139_v23, %v7309_v51  ;;  %3204 = vrot.lane.b32.xlu1 %v2875_v27, %s5926_s14  ;;  %v5246_v36 = vpop.f32.mrf.mxu0 }
 0x5f1   :  { %v3052_v32 = vadd.f32 %v5245_v17, %v7322_v42  ;;  %v5141_v53 = vpop.f32.mrf.mxu1 }
 0x5f2   :  { %v2876_v39 = vmax.f32 %v2816_v3, 0.0  ;;  %v5142_v2 = vadd.f32 %v5141_v53, %v5140_v16  ;;  %v5247_v63 = vpop.f32.mrf.mxu0 }
 0x5f3   :  { %v3118_v38 = vmax.f32 %v3052_v32, 0.0  ;;  %v5248_v57 = vadd.f32 %v5247_v63, %v5246_v36  ;;  %v5143_v28 = vpop.f32.mrf.mxu1 }
 0x5f4   :  { %v2819_v21 = vadd.f32 %v5142_v2, %v7309_v51  ;;  %3206 = vrot.lane.b32.xlu1 %v2876_v39, %s5926_s14  ;;  %v5249_v11 = vpop.f32.mrf.mxu0 }
 0x5f5   :  { %v3055_v46 = vadd.f32 %v5248_v57, %v7322_v42  ;;  %v5144_v0 = vpop.f32.mrf.mxu1  ;;  %3330 = vrot.lane.b32.xlu0 %v3118_v38, %s5925_s21 }
 0x5f6   :  { %v2877_v27 = vmax.f32 %v2819_v21, 0.0  ;;  %v5145_v23 = vadd.f32 %v5144_v0, %v5143_v28  ;;  %v5250_v56 = vpop.f32.mrf.mxu0 }
 0x5f7   :  { %v3119_v17 = vmax.f32 %v3055_v46, 0.0  ;;  %v5251_v3 = vadd.f32 %v5250_v56, %v5249_v11  ;;  %v5146_v16 = vpop.f32.mrf.mxu1 }
 0x5f8   :  { %v2824_v32 = vadd.f32 %v5145_v23, %v7309_v51  ;;  %3208 = vrot.lane.b32.xlu1 %v2877_v27, %s5926_s14  ;;  %v5252_v36 = vpop.f32.mrf.mxu0 }
 0x5f9   :  { %v3060_v2 = vadd.f32 %v5251_v3, %v7322_v42  ;;  %v5147_v39 = vpop.f32.mrf.mxu1  ;;  %3332 = vrot.lane.b32.xlu0 %v3119_v17, %s5925_s21 }
 0x5fa   :  { %v2878_v53 = vmax.f32 %v2824_v32, 0.0  ;;  %v5148_v63 = vadd.f32 %v5147_v39, %v5146_v16  ;;  %v5253_v57 = vpop.f32.mrf.mxu0 }
 0x5fb   :  { %v3120_v38 = vmax.f32 %v3060_v2, 0.0  ;;  %v5254_v21 = vadd.f32 %v5253_v57, %v5252_v36  ;;  %v5149_v28 = vpop.f32.mrf.mxu1 }
 0x5fc   :  { %v2827_v46 = vadd.f32 %v5148_v63, %v7309_v51  ;;  %3210 = vrot.lane.b32.xlu1 %v2878_v53, %s5926_s14  ;;  %v5255_v11 = vpop.f32.mrf.mxu0 }
 0x5fd   :  { %v3063_v0 = vadd.f32 %v5254_v21, %v7322_v42  ;;  %v5150_v27 = vpop.f32.mrf.mxu1  ;;  %3334 = vrot.lane.b32.xlu0 %v3120_v38, %s5925_s21 }
 0x5fe   :  { %v2879_v23 = vmax.f32 %v2827_v46, 0.0  ;;  %v5151_v56 = vadd.f32 %v5150_v27, %v5149_v28  ;;  %v5256_v3 = vpop.f32.mrf.mxu0 }
 0x5ff   :  { %v3121_v17 = vmax.f32 %v3063_v0, 0.0  ;;  %v5257_v32 = vadd.f32 %v5256_v3, %v5255_v11  ;;  %v5152_v16 = vpop.f32.mrf.mxu1 }
 0x600   :  { %v2832_v2 = vadd.f32 %v5151_v56, %v7309_v51  ;;  %3212 = vrot.lane.b32.xlu1 %v2879_v23, %s5926_s14  ;;  %v5258_v36 = vpop.f32.mrf.mxu0 }
 0x601   :  { %v3068_v39 = vadd.f32 %v5257_v32, %v7322_v42  ;;  %v5153_v53 = vpop.f32.mrf.mxu1  ;;  %3336 = vrot.lane.b32.xlu0 %v3121_v17, %s5925_s21 }
 0x602   :  { %v2880_v63 = vmax.f32 %v2832_v2, 0.0  ;;  %v5154_v57 = vadd.f32 %v5153_v53, %v5152_v16  ;;  %v5259_v21 = vpop.f32.mrf.mxu0 }
 0x603   :  { %v3122_v38 = vmax.f32 %v3068_v39, 0.0  ;;  %v5260_v46 = vadd.f32 %v5259_v21, %v5258_v36  ;;  %v5155_v28 = vpop.f32.mrf.mxu1 }
 0x604   :  { %v2835_v0 = vadd.f32 %v5154_v57, %v7309_v51  ;;  %3214 = vrot.lane.b32.xlu1 %v2880_v63, %s5926_s14  ;;  %v5261_v11 = vpop.f32.mrf.mxu0 }
 0x605   :  { %v3071_v27 = vadd.f32 %v5260_v46, %v7322_v42  ;;  %v5156_v23 = vpop.f32.mrf.mxu1  ;;  %3338 = vrot.lane.b32.xlu0 %v3122_v38, %s5925_s21 }
 0x606   :  { %v2881_v56 = vmax.f32 %v2835_v0, 0.0  ;;  %v5157_v3 = vadd.f32 %v5156_v23, %v5155_v28  ;;  %v5262_v32 = vpop.f32.mrf.mxu0 }
 0x607   :  { %v3123_v17 = vmax.f32 %v3071_v27, 0.0  ;;  %v5263_v2 = vadd.f32 %v5262_v32, %v5261_v11  ;;  %v5158_v16 = vpop.f32.mrf.mxu1 }
 0x608   :  { %v2840_v39 = vadd.f32 %v5157_v3, %v7309_v51  ;;  %3216 = vrot.lane.b32.xlu1 %v2881_v56, %s5926_s14  ;;  %v5264_v36 = vpop.f32.mrf.mxu0 }
 0x609   :  { %v3076_v53 = vadd.f32 %v5263_v2, %v7322_v42  ;;  %v5159_v63 = vpop.f32.mrf.mxu1  ;;  %3340 = vrot.lane.b32.xlu0 %v3123_v17, %s5925_s21 }
 0x60a   :  { %v2882_v57 = vmax.f32 %v2840_v39, 0.0  ;;  %v5160_v21 = vadd.f32 %v5159_v63, %v5158_v16  ;;  %v5265_v46 = vpop.f32.mrf.mxu0 }
 0x60b   :  { %v3124_v38 = vmax.f32 %v3076_v53, 0.0  ;;  %v5266_v0 = vadd.f32 %v5265_v46, %v5264_v36  ;;  %v5161_v28 = vpop.f32.mrf.mxu1  ;;  %v2739_v53 = vadd.f32 %v7305_v52, %v7309_v51 }
 0x60c   :  { %v2843_v27 = vadd.f32 %v5160_v21, %v7309_v51  ;;  %3218 = vrot.lane.b32.xlu1 %v2882_v57, %s5926_s14  ;;  %v5267_v11 = vpop.f32.mrf.mxu0  ;;  %v5127_v57 = vadd.f32 %v7369_v49, %v7366_v13  ;;  %v2736_v49 = vadd.f32 %v7301_v14, %v7309_v51  ;;  %v2731_v14 = vadd.f32 %v7297_v8, %v7309_v51 }
 0x60d   :  { %v3079_v23 = vadd.f32 %v5266_v0, %v7322_v42  ;;  %v5162_v56 = vpop.f32.mrf.mxu1  ;;  %3342 = vrot.lane.b32.xlu0 %v3124_v38, %s5925_s21  ;;  %v5242_v8 = vadd.f32 %v7384_v7, %v7382_v54  ;;  %v2983_v54 = vadd.f32 %v7314_v47, %v7322_v42 }
 0x60e   :  { %v2883_v3 = vmax.f32 %v2843_v27, 0.0  ;;  %v5163_v32 = vadd.f32 %v5162_v56, %v5161_v28  ;;  %v5268_v2 = vpop.f32.mrf.mxu0  ;;  %v2800_v56 = vadd.f32 %v5127_v57, %v7309_v51 }
 0x60f   :  { %v3125_v17 = vmax.f32 %v3079_v23, 0.0  ;;  %v5164_v39 = vpop.f32.mrf.mxu1  ;;  %v5269_v46 = vadd.f32 %v5268_v2, %v5267_v11  ;;  %v2857_v23 = vmax.f32 %v2739_v53, 0.0 }
 0x610   :  { %v2848_v16 = vadd.f32 %v5163_v32, %v7309_v51  ;;  %3220 = vrot.lane.b32.xlu1 %v2883_v3, %s5926_s14  ;;  %v5270_v36 = vpop.f32.mrf.mxu0  ;;  %v2872_v11 = vmax.f32 %v2800_v56, 0.0  ;;  %v2988_v56 = vadd.f32 %v7318_v26, %v7322_v42  ;;  %v2728_v26 = vadd.f32 %v7293_v18, %v7309_v51 }
 0x611   :  { %v5165_v63 = vpop.f32.mrf.mxu1  ;;  %3344 = vrot.lane.b32.xlu0 %v3125_v17, %s5925_s21  ;;  %v3084_v52 = vadd.f32 %v5269_v46, %v7322_v42  ;;  %v3044_v18 = vadd.f32 %v7378_v62, %v7322_v42 }
 0x612   :  { %v2884_v21 = vmax.f32 %v2848_v16, 0.0  ;;  %v5166_v38 = vadd.f32 %v5165_v63, %v5164_v39  ;;  %v5271_v0 = vpop.f32.mrf.mxu0  ;;  %v2795_v63 = vadd.f32 %v7364_v37, %v7309_v51  ;;  %v2855_v37 = vmax.f32 %v2731_v14, 0.0 }
 0x613   :  { %v5272_v32 = vadd.f32 %v5271_v0, %v5270_v36  ;;  %v3126_v2 = vmax.f32 %v3084_v52, 0.0  ;;  %v2856_v36 = vmax.f32 %v2736_v49, 0.0  ;;  %v2792_v52 = vadd.f32 %v7359_v30, %v7309_v51 }
 0x614   :  { %v2851_v28 = vadd.f32 %v5166_v38, %v7309_v51  ;;  %3222 = vrot.lane.b32.xlu1 %v2884_v21, %s5926_s14  ;;  %v5273_v27 = vpop.f32.mrf.mxu0  ;;  %v2871_v0 = vmax.f32 %v2795_v63, 0.0  ;;  %v3047_v49 = vadd.f32 %v5242_v8, %v7322_v42  ;;  %v3101_v51 = vmax.f32 %v2983_v54, 0.0 }
 0x615   :  { %v3087_v39 = vadd.f32 %v5272_v32, %v7322_v42 }
 0x616   :  { %v2885_v3 = vmax.f32 %v2851_v28, 0.0  ;;  %v5274_v17 = vpop.f32.mrf.mxu0  ;;  %v3117_v7 = vmax.f32 %v3047_v49, 0.0 }
 0x617   :  { %v5275_v16 = vadd.f32 %v5274_v17, %v5273_v27  ;;  %v3127_v57 = vmax.f32 %v3087_v39, 0.0  ;;  %v3102_v17 = vmax.f32 %v2988_v56, 0.0  ;;  %v2854_v39 = vmax.f32 %v2728_v26, 0.0 }
 0x618   :  { %3168 = vrot.lane.b32.xlu1 %v2857_v23, %s5926_s14  ;;  %v5276_v13 = vpop.f32.mrf.mxu0  ;;  %3224 = vrot.lane.b32.xlu0 %v2885_v3, %s5926_s14 }
 0x619   :  { %v3092_v21 = vadd.f32 %v5275_v16, %v7322_v42  ;;  %v2972_v16 = vadd.f32 %v7303_v5, %v7322_v42  ;;  %v2980_v5 = vadd.f32 %v7311_v9, %v7322_v42 }
 0x61a   :  { %v5277_v53 = vpop.f32.mrf.mxu0 }
 0x61b   :  { %v5278_v46 = vadd.f32 %v5277_v53, %v5276_v13  ;;  %v3128_v28 = vmax.f32 %v3092_v21, 0.0  ;;  %v2870_v13 = vmax.f32 %v2792_v52, 0.0  ;;  %v3098_v47 = vmax.f32 %v2972_v16, 0.0 }
 0x61c   :  { %3198 = vrot.lane.b32.xlu1 %v2872_v11, %s5926_s14  ;;  %3346 = vrot.lane.b32.xlu0 %v3126_v2, %s5925_s21  ;;  %v3452_v21 = vlaneseq }
 0x61d   :  { %v3095_v27 = vadd.f32 %v5278_v46, %v7322_v42 }
 0x61e   :  { %v7440_v38 = vpop.permute.xlu1 %3170  ;;  %v3453_v14 = vshrl.u32 %v3452_v21, 7 }
 0x61f   :  { %8578 = vst [vmem:[#allocation46_spill] sm:$0xff] %v7440_v38  ;;  %v3129_v3 = vmax.f32 %v3095_v27, 0.0 }
 0x620   :  { %3166 = vrot.lane.b32.xlu1 %v2856_v36, %s5926_s14  ;;  %3348 = vrot.lane.b32.xlu0 %v3127_v57, %s5925_s21  ;;  %v3116_v57 = vmax.f32 %v3044_v18, 0.0  ;;  %v3458_v27 = vsub.s32 1, %v3453_v14  ;;  %v7497_v56 = vsub.s32 0, %v3453_v14 }
 0x622   :  { %v7447_v23 = vpop.permute.xlu1 %3172  ;;  %8586 = vst [vmem:[#allocation54_spill] sm:$0xff] %v7497_v56 }
 0x623   :  { %8579 = vst [vmem:[#allocation47_spill] sm:$0xff] %v7447_v23 }
 0x624   :  { %3196 = vrot.lane.b32.xlu1 %v2871_v0, %s5926_s14  ;;  %3350 = vrot.lane.b32.xlu0 %v3128_v28, %s5925_s21  ;;  %v3100_v0 = vmax.f32 %v2980_v5, 0.0  ;;  %v3039_v28 = vadd.f32 %v7375_v22, %v7322_v42  ;;  %v3036_v22 = vadd.f32 %v7372_v41, %v7322_v42 }
 0x626   :  { %v7457_v32 = vpop.permute.xlu1 %3174  ;;  %v3115_v8 = vmax.f32 %v3039_v28, 0.0 }
 0x627   :  { %8580 = vst [vmem:[#allocation48_spill] sm:$0xff] %v7457_v32 }
 0x628   :  { %3164 = vrot.lane.b32.xlu1 %v2855_v37, %s5926_s14  ;;  %3352 = vrot.lane.b32.xlu0 %v3129_v3, %s5925_s21  ;;  %v3450_v37 = vld [vmem:[#allocation3] sm:$0x3] }
 0x629   :  { %v3459_v9 = vrot.slane %v3450_v37, %v3458_v27  ;;  %v7501_v52 = vrot.slane %v3450_v37, %v7497_v56 }
 0x62a   :  { %v7462_v11 = vpop.permute.xlu1 %3176 }
 0x62b   :  { %8581 = vst [vmem:[#allocation49_spill] sm:$0xff] %v7462_v11  ;;  %v7466_v30 = vpop.permute.xlu0 %3300  ;;  %8587 = vst [vmem:[#allocation55_spill] sm:$0xff] %v7501_v52  ;;  %3596 = vmatprep.mubr.f32.mxu1 %v3459_v9  ;;  %3526 = vmatprep.mubr.f32.mxu0 %v3459_v9 }
 0x62c   :  { %8582 = vst [vmem:[#allocation50_spill] sm:$0xff] %v7466_v30  ;;  %3194 = vrot.lane.b32.xlu1 %v2870_v13, %s5926_s14  ;;  %3298 = vrot.lane.b32.xlu0 %v3102_v17, %s5925_s21  ;;  %v2975_v17 = vadd.f32 %v7307_v60, %v7322_v42 }
 0x62d   :  { %3527 = vmatmul.mubr.f32.vlgmr.msra.gmra.mxu0 %v7501_v52 }
 0x62e   :  { %v7472_v2 = vpop.permute.xlu1 %3178  ;;  %v3099_v49 = vmax.f32 %v2975_v17, 0.0 }
 0x62f   :  { %v7476_v53 = vpop.permute.xlu0 %3302 }
 0x630   :  { %8583 = vst [vmem:[#allocation51_spill] sm:$0xff] %v7476_v53  ;;  %3162 = vrot.lane.b32.xlu1 %v2854_v39, %s5926_s14  ;;  %3328 = vrot.lane.b32.xlu0 %v3117_v7, %s5925_s21  ;;  %v3114_v7 = vmax.f32 %v3036_v22, 0.0  ;;  %v7566_v53 = vld [vmem:[%s8479_s8] ss:$0 sm:$0xff] }
 0x631   :  { %v2527_v32 = vadd.f32 %v7566_v53, %v7263_v58  ;;  %v2583_v11 = vadd.f32 %v7566_v53, %v7291_v55  ;;  %v2519_v58 = vadd.f32 %v7566_v53, %v7259_v24  ;;  %v2516_v55 = vadd.f32 %v7566_v53, %v7257_v40 }
 0x632   :  { %v7482_v36 = vpop.permute.xlu1 %3180  ;;  %v2511_v40 = vadd.f32 %v7566_v53, %v7252_v6  ;;  %v2508_v6 = vadd.f32 %v7566_v53, %v7250_v4  ;;  %v2503_v4 = vadd.f32 %v7566_v53, %v7242_v50 }
 0x633   :  { %v7484_v63 = vpop.permute.xlu0 %3304 }
 0x634   :  { %8584 = vst [vmem:[#allocation52_spill] sm:$0xff] %v7484_v63  ;;  %3296 = vrot.lane.b32.xlu0 %v3101_v51, %s5925_s21  ;;  %3290 = vrot.lane.b32.xlu1 %v3098_v47, %s5925_s21  ;;  %v2588_v63 = vadd.f32 %v7566_v53, %v7295_v20  ;;  %v2580_v20 = vadd.f32 %v7566_v53, %v7289_v59 }
 0x636   :  { %v7490_v46 = vpop.permute.xlu1 %3182  ;;  %v2624_v45 = vmax.f32 %v2588_v63, 0.0 }
 0x637   :  { %v7493_v62 = vpop.permute.xlu0 %3306 }
 0x638   :  { %3326 = vrot.lane.b32.xlu0 %v3116_v57, %s5925_s21  ;;  %8585 = vst [vmem:[#allocation53_spill] sm:$0xff] %v7493_v62  ;;  %v7582_v62 = vadd.f32 %v7566_v53, %v7200_v1 }
 0x63a   :  { %v7503_v3 = vpop.permute.xlu1 %3184  ;;  %8600 = vst [vmem:[#allocation68_spill] sm:$0xff] %v7582_v62 }
 0x63b   :  { %v7507_v13 = vpop.permute.xlu0 %3308 }
 0x63c   :  { %3294 = vrot.lane.b32.xlu0 %v3100_v0, %s5925_s21 }
 0x63e   :  { %v7513_v26 = vpop.permute.xlu1 %3186 }
 0x63f   :  { %v7516_v54 = vpop.permute.xlu0 %3310 }
 0x640   :  { %3324 = vrot.lane.b32.xlu0 %v3115_v8, %s5925_s21 }
 0x642   :  { %v7519_v60 = vpop.permute.xlu1 %3188 }
 0x643   :  { %v7521_v39 = vpop.permute.xlu0 %3312 }
 0x644   :  { %3292 = vrot.lane.b32.xlu0 %v3099_v49, %s5925_s21 }
 0x646   :  { %v3191_v16 = vpop.permute.xlu1 %3190 }
 0x647   :  { %v7523_v51 = vpop.permute.xlu0 %3314 }
 0x648   :  { %3322 = vrot.lane.b32.xlu0 %v3114_v7, %s5925_s21 }
 0x64a   :  { %v3193_v18 = vpop.permute.xlu1 %3192 }
 0x64b   :  { %v7525_v47 = vpop.permute.xlu0 %3316 }
 0x64f   :  { %v3319_v41 = vpop.permute.xlu0 %3318 }
 0x653   :  { %v3321_v21 = vpop.permute.xlu0 %3320 }
 0x65a   :  { %v7527_v42 = vpop.permute.xlu1 %3200 }
 0x65b   :  { %8588 = vst [vmem:[#allocation56_spill] sm:$0xff] %v7527_v42 }
 0x65e   :  { %v7529_v5 = vpop.permute.xlu1 %3202 }
 0x65f   :  { %8589 = vst [vmem:[#allocation57_spill] sm:$0xff] %v7529_v5 }
 0x662   :  { %v7531_v57 = vpop.permute.xlu1 %3204 }
 0x663   :  { %8590 = vst [vmem:[#allocation58_spill] sm:$0xff] %v7531_v57 }
 0x666   :  { %v7533_v14 = vpop.permute.xlu1 %3206 }
 0x667   :  { %8591 = vst [vmem:[#allocation59_spill] sm:$0xff] %v7533_v14  ;;  %v7535_v0 = vpop.permute.xlu0 %3330 }
 0x668   :  { %8592 = vst [vmem:[#allocation60_spill] sm:$0xff] %v7535_v0 }
 0x66a   :  { %v7537_v28 = vpop.permute.xlu1 %3208 }
 0x66b   :  { %8593 = vst [vmem:[#allocation61_spill] sm:$0xff] %v7537_v28  ;;  %v7539_v27 = vpop.permute.xlu0 %3332 }
 0x66c   :  { %8594 = vst [vmem:[#allocation62_spill] sm:$0xff] %v7539_v27 }
 0x66e   :  { %v7541_v37 = vpop.permute.xlu1 %3210 }
 0x66f   :  { %v7543_v9 = vpop.permute.xlu0 %3334 }
 0x670   :  { %8595 = vst [vmem:[#allocation63_spill] sm:$0xff] %v7543_v9  ;;  %v2591_v9 = vadd.f32 %v7566_v53, %v7299_v29  ;;  %v2609_v29 = vmax.f32 %v2527_v32, 0.0 }
 0x672   :  { %v7545_v8 = vpop.permute.xlu1 %3212  ;;  %v2625_v28 = vmax.f32 %v2591_v9, 0.0  ;;  %v3401_v1 = vsel %vm233_vm0, %v2609_v29, %v3193_v18 }
 0x673   :  { %v7547_v17 = vpop.permute.xlu0 %3336  ;;  %v7600_v59 = vsel %vm2043_vm1, %v3401_v1, %v3321_v21 }
 0x674   :  { %8596 = vst [vmem:[#allocation64_spill] sm:$0xff] %v7547_v17 }
 0x676   :  { %v7549_v22 = vpop.permute.xlu1 %3214 }
 0x677   :  { %v7551_v49 = vpop.permute.xlu0 %3338 }
 0x678   :  { %8597 = vst [vmem:[#allocation65_spill] sm:$0xff] %v7551_v49 }
 0x67a   :  { %v7553_v7 = vpop.permute.xlu1 %3216 }
 0x67b   :  { %v7555_v56 = vpop.permute.xlu0 %3340 }
 0x67e   :  { %v3219_v52 = vpop.permute.xlu1 %3218 }
 0x67f   :  { %v7557_v42 = vpop.permute.xlu0 %3342 }
 0x682   :  { %v3221_v0 = vpop.permute.xlu1 %3220 }
 0x683   :  { %v7559_v38 = vpop.permute.xlu0 %3344 }
 0x686   :  { %v3223_v5 = vpop.permute.xlu1 %3222 }
 0x687   :  { %v3416_v32 = vsel %vm233_vm0, %v2624_v45, %v3223_v5 }
 0x68a   :  { %v3225_v30 = vpop.permute.xlu0 %3224  ;;  %v7561_v23 = vpop.permute.xlu1 %3168 }
 0x68b   :  { %8598 = vst [vmem:[#allocation66_spill] sm:$0xff] %v7561_v23  ;;  %v2524_v23 = vadd.f32 %v7566_v53, %v7261_v33  ;;  %v3417_v33 = vsel %vm233_vm0, %v2625_v28, %v3225_v30 }
 0x68d   :  { %v2608_v9 = vmax.f32 %v2524_v23, 0.0  ;;  %v2607_v23 = vmax.f32 %v2519_v58, 0.0 }
 0x68e   :  { %v3347_v27 = vpop.permute.xlu0 %3346  ;;  %v7572_v14 = vpop.permute.xlu1 %3198 }
 0x68f   :  { %8599 = vst [vmem:[#allocation67_spill] sm:$0xff] %v7572_v14  ;;  %v4985_v14 = vadd.f32 %v7240_v35, %v7235_v61  ;;  %v2575_v61 = vadd.f32 %v7566_v53, %v7287_v31  ;;  %v2623_v35 = vmax.f32 %v2583_v11, 0.0  ;;  %v3400_v30 = vsel %vm233_vm0, %v2608_v9, %v3191_v16 }
 0x690   :  { %v2572_v31 = vadd.f32 %v7566_v53, %v7285_v48  ;;  %v2622_v11 = vmax.f32 %v2580_v20, 0.0  ;;  %v7611_v18 = vsel %vm2043_vm1, %v3400_v30, %v3319_v41  ;;  %v2606_v16 = vmax.f32 %v2516_v55, 0.0 }
 0x691   :  { %v3415_v45 = vsel %vm233_vm0, %v2623_v35, %v3221_v0  ;;  %v3399_v21 = vsel %vm233_vm0, %v2607_v23, %v7519_v60  ;;  %v2567_v41 = vadd.f32 %v7566_v53, %v7283_v15  ;;  %v2621_v28 = vmax.f32 %v2575_v61, 0.0 }
 0x692   :  { %v3349_v57 = vpop.permute.xlu0 %3348  ;;  %v7594_v62 = vpop.permute.xlu1 %3166  ;;  %v7626_v0 = vsel %vm2043_vm1, %v3399_v21, %v7525_v47  ;;  %v3398_v60 = vsel %vm233_vm0, %v2606_v16, %v7513_v26  ;;  %v2564_v47 = vadd.f32 %v7566_v53, %v7281_v19  ;;  %v2500_v26 = vadd.f32 %v7566_v53, %v4985_v14  ;;  %v8606_v16 = vld [vmem:[#allocation49_spill] sm:$0xff] }
 0x693   :  { %v3447_v48 = vsel %vm2043_vm1, %v3415_v45, %v3349_v57  ;;  %v2620_v57 = vmax.f32 %v2572_v31, 0.0  ;;  %v3413_v50 = vsel %vm233_vm0, %v2621_v28, %v7553_v7  ;;  %v2604_v20 = vmax.f32 %v2508_v6, 0.0  ;;  %v8604_v31 = vld [vmem:[#allocation61_spill] sm:$0xff]  ;;  %v8608_v28 = vld [vmem:[#allocation44_spill] sm:$0xff] }
 0x694   :  { %v3445_v19 = vsel %vm2043_vm1, %v3413_v50, %v7559_v38  ;;  %v2603_v55 = vmax.f32 %v2503_v4, 0.0  ;;  %v2556_v38 = vadd.f32 %v7566_v53, %v7277_v12 }
 0x695   :  { %v3412_v14 = vsel %vm233_vm0, %v2620_v57, %v7549_v22  ;;  %v3396_v9 = vsel %vm233_vm0, %v2604_v20, %v7490_v46  ;;  %v2492_v46 = vadd.f32 %v7566_v53, %v7228_v44  ;;  %v8611_v57 = vld [vmem:[#allocation13_spill] sm:$0xff]  ;;  %v8612_v20 = vld [vmem:[#allocation48_spill] sm:$0xff] }
 0x696   :  { %v3351_v17 = vpop.permute.xlu0 %3350  ;;  %v7633_v58 = vpop.permute.xlu1 %3196  ;;  %v7674_v22 = vsel %vm2043_vm1, %v3396_v9, %v7516_v54  ;;  %v2616_v30 = vmax.f32 %v2556_v38, 0.0  ;;  %v2479_v50 = vadd.f32 %v7566_v53, %v8611_v57  ;;  %v8615_v9 = vld [vmem:[#allocation51_spill] sm:$0xff]  ;;  %v8627_v57 = vld [vmem:[#allocation66_spill] sm:$0xff] }
 0x697   :  { %v3448_v63 = vsel %vm2043_vm1, %v3416_v32, %v3351_v17  ;;  %v3414_v17 = vsel %vm233_vm0, %v2622_v11, %v3219_v52  ;;  %v7641_v52 = vsel %vm2043_vm1, %v3398_v60, %v7523_v51  ;;  %v2559_v51 = vadd.f32 %v7566_v53, %v7279_v43 }
 0x698   :  { %v3446_v15 = vsel %vm2043_vm1, %v3414_v17, %v3347_v27  ;;  %v7668_v43 = vsel %vm2043_vm1, %v3412_v14, %v7557_v42  ;;  %v2602_v42 = vmax.f32 %v2500_v26, 0.0  ;;  %v2600_v6 = vmax.f32 %v2492_v46, 0.0  ;;  %v8614_v14 = vld [vmem:[#allocation43_spill] sm:$0xff] }
 0x699   :  { %v2617_v61 = vmax.f32 %v2559_v51, 0.0  ;;  %v2543_v17 = vadd.f32 %v7566_v53, %v8608_v28  ;;  %v8613_v51 = vld [vmem:[#allocation63_spill] sm:$0xff] }
 0x69a   :  { %v3353_v49 = vpop.permute.xlu0 %3352  ;;  %v7685_v12 = vpop.permute.xlu1 %3164 }
 0x69b   :  { %v3449_v24 = vsel %vm2043_vm1, %v3417_v33, %v3353_v49  ;;  %v2605_v49 = vmax.f32 %v2511_v40, 0.0  ;;  %v2619_v33 = vmax.f32 %v2567_v41, 0.0 }
 0x69c   :  { %5314 = vmatprep.subr.mxu1 %v3449_v24  ;;  %v3395_v24 = vsel %vm233_vm0, %v2603_v55, %v7482_v36  ;;  %v2487_v36 = vadd.f32 %v7566_v53, %v7220_v34  ;;  %v3409_v34 = vsel %vm233_vm0, %v2617_v61, %v8604_v31  ;;  %v8618_v61 = vld [vmem:[#allocation47_spill] sm:$0xff] }
 0x69d   :  { %5315 = vmatpush3.msra.mxu1 %v7600_v59  ;;  %v3397_v27 = vsel %vm233_vm0, %v2605_v49, %v7503_v3  ;;  %v2495_v3 = vadd.f32 %v7566_v53, %v7230_v25  ;;  %v3411_v25 = vsel %vm233_vm0, %v2619_v33, %v7545_v8  ;;  %v2551_v8 = vadd.f32 %v7566_v53, %v7275_v10  ;;  %v8601_v10 = vld [vmem:[#allocation65_spill] sm:$0xff]  ;;  %v8609_v49 = vld [vmem:[#allocation52_spill] sm:$0xff] }
 0x69e   :  { %v7614_v5 = vpop.permute.xlu0 %3298  ;;  %5316 = vmatprep.subr.mxu1 %v3448_v63  ;;  %v7657_v7 = vsel %vm2043_vm1, %v3397_v27, %v7521_v39  ;;  %v2618_v39 = vmax.f32 %v2564_v47, 0.0  ;;  %v7690_v54 = vsel %vm2043_vm1, %v3411_v25, %v7555_v56  ;;  %v7696_v35 = vsel %vm2043_vm1, %v3395_v24, %v7507_v13  ;;  %v8602_v13 = vld [vmem:[#allocation45_spill] sm:$0xff] }
 0x69f   :  { %5317 = vmatpush3.msra.mxu1 %v7611_v18  ;;  %v2601_v32 = vmax.f32 %v2495_v3, 0.0  ;;  %v3394_v56 = vsel %vm233_vm0, %v2602_v42, %v7472_v2  ;;  %v2548_v23 = vadd.f32 %v7566_v53, %v8602_v13  ;;  %v8605_v2 = vld [vmem:[#allocation14_spill] sm:$0xff]  ;;  %v2615_v4 = vmax.f32 %v2551_v8, 0.0  ;;  %v8617_v42 = vld [vmem:[#allocation12_spill] sm:$0xff] }
 0x6a0   :  { %5318 = vmatprep.subr.mxu1 %v3447_v48  ;;  %v3410_v44 = vsel %vm233_vm0, %v2618_v39, %v7541_v37  ;;  %v8603_v37 = vld [vmem:[#allocation53_spill] sm:$0xff]  ;;  %v2484_v45 = vadd.f32 %v7566_v53, %v8605_v2  ;;  %v8607_v48 = vld [vmem:[#allocation64_spill] sm:$0xff]  ;;  %v2599_v26 = vmax.f32 %v2487_v36, 0.0  ;;  %v3392_v27 = vsel %vm233_vm0, %v2600_v6, %v8612_v20  ;;  %v8616_v39 = vld [vmem:[#allocation58_spill] sm:$0xff] }
 0x6a1   :  { %5319 = vmatpush3.msra.mxu1 %v7626_v0  ;;  %v7708_v40 = vsel %vm2043_vm1, %v3410_v44, %v8601_v10  ;;  %v7714_v63 = vsel %vm2043_vm1, %v3394_v56, %v8603_v37  ;;  %v3393_v21 = vsel %vm233_vm0, %v2601_v32, %v8606_v16  ;;  %v7726_v41 = vsel %vm2043_vm1, %v3409_v34, %v8607_v48  ;;  %v8619_v36 = vld [vmem:[#allocation62_spill] sm:$0xff]  ;;  %v8620_v56 = vld [vmem:[#allocation16_spill] sm:$0xff]  ;;  %v8622_v37 = vld [vmem:[#allocation57_spill] sm:$0xff] }
 0x6a2   :  { %v7645_v29 = vpop.permute.xlu0 %3328  ;;  %5320 = vmatprep.subr.mxu1 %v3446_v15  ;;  %v7732_v60 = vsel %vm2043_vm1, %v3393_v21, %v8609_v49  ;;  %v8610_v15 = vld [vmem:[#allocation59_spill] sm:$0xff]  ;;  %v2540_v3 = vadd.f32 %v7566_v53, %v8614_v14  ;;  %v2614_v55 = vmax.f32 %v2548_v23, 0.0  ;;  %v7750_v38 = vsel %vm2043_vm1, %v3392_v27, %v8615_v9  ;;  %v8621_v23 = vld [vmem:[#allocation50_spill] sm:$0xff]  ;;  %v8624_v6 = vld [vmem:[#allocation60_spill] sm:$0xff] }
 0x6a3   :  { %5321 = vmatpush3.msra.mxu1 %v7641_v52  ;;  %v3408_v47 = vsel %vm233_vm0, %v2616_v30, %v8610_v15  ;;  %v3407_v25 = vsel %vm233_vm0, %v2615_v4, %v8616_v39  ;;  %v2476_v24 = vadd.f32 %v7566_v53, %v8617_v42  ;;  %v2598_v8 = vmax.f32 %v2484_v45, 0.0  ;;  %v8623_v2 = vld [vmem:[#allocation46_spill] sm:$0xff]  ;;  %v8625_v48 = vld [vmem:[#allocation56_spill] sm:$0xff]  ;;  %v8628_v27 = vld [vmem:[#allocation15_spill] sm:$0xff] }
 0x6a4   :  { %5322 = vmatprep.subr.mxu1 %v3445_v19  ;;  %v3195_v19 = vpop.permute.xlu1 %3194  ;;  %v7744_v33 = vsel %vm2043_vm1, %v3408_v47, %v8613_v51  ;;  %v3391_v44 = vsel %vm233_vm0, %v2599_v26, %v8618_v61  ;;  %v7762_v32 = vsel %vm2043_vm1, %v3407_v25, %v8619_v36  ;;  %v2535_v10 = vadd.f32 %v7566_v53, %v8620_v56  ;;  %v8626_v49 = vld [vmem:[#allocation68_spill] sm:$0xff]  ;;  %v8629_v14 = vld [vmem:[#allocation67_spill] sm:$0xff] }
 0x6a5   :  { %5323 = vmatpush3.msra.mxu1 %v7657_v7  ;;  %v2613_v13 = vmax.f32 %v2543_v17, 0.0  ;;  %v7768_v30 = vsel %vm2043_vm1, %v3391_v44, %v8621_v23  ;;  %v3406_v31 = vsel %vm233_vm0, %v2614_v55, %v8622_v37  ;;  %v2597_v34 = vmax.f32 %v2479_v50, 0.0  ;;  %v8630_v9 = vld [vmem:[#allocation11_spill] sm:$0xff] }
 0x6a6   :  { %v7678_v1 = vpop.permute.xlu0 %3296  ;;  %5324 = vmatprep.subr.mxu1 %v7668_v43  ;;  %v3390_v45 = vsel %vm233_vm0, %v2598_v8, %v8623_v2  ;;  %v7778_v16 = vsel %vm2043_vm1, %v3406_v31, %v8624_v6  ;;  %v2612_v21 = vmax.f32 %v2540_v3, 0.0  ;;  %v2595_v15 = vmax.f32 %v8626_v49, 0.0  ;;  %v3624_v23 = vld [vmem:[%s8487_s16 + $0x50] sm:$0xff]  ;;  %v3623_v37 = vld [vmem:[%s8487_s16 + $0x48] sm:$0xff]  ;;  %v3622_v31 = vld [vmem:[%s8487_s16 + $0x40] sm:$0xff] }
 0x6a7   :  { %5325 = vmatpush3.msra.mxu1 %v7674_v22  ;;  %v3405_v28 = vsel %vm233_vm0, %v2613_v13, %v8625_v48  ;;  %v7784_v17 = vsel %vm2043_vm1, %v3390_v45, %v7614_v5  ;;  %v2596_v47 = vmax.f32 %v2476_v24, 0.0  ;;  %v3389_v50 = vsel %vm233_vm0, %v2597_v34, %v8627_v57  ;;  %v8631_v13 = vld [vmem:[#allocation55_spill] sm:$0xff]  ;;  %v3621_v34 = vld [vmem:[%s8487_s16 + $0x38] sm:$0xff]  ;;  %v3618_v6 = vld [vmem:[%s8487_s16 + $0x20] sm:$0xff] }
 0x6a8   :  { %5326 = vmatprep.subr.mxu1 %v7690_v54  ;;  %v3163_v26 = vpop.permute.xlu1 %3162  ;;  %v7793_v20 = vsel %vm2043_vm1, %v3405_v28, %v7645_v29  ;;  %v2532_v5 = vadd.f32 %v7566_v53, %v8628_v27  ;;  %v2611_v51 = vmax.f32 %v2535_v10, 0.0  ;;  %v3404_v3 = vsel %vm233_vm0, %v2612_v21, %v8629_v14  ;;  %v3625_v10 = vld [vmem:[%s8487_s16 + $0x58] sm:$0xff]  ;;  %v3620_v2 = vld [vmem:[%s8487_s16 + $0x30] sm:$0xff]  ;;  %v3619_v45 = vld [vmem:[%s8487_s16 + $0x28] sm:$0xff] }
 0x6a9   :  { %5327 = vmatpush3.msra.mxu1 %v7696_v35  ;;  %v7801_v55 = vsel %vm2043_vm1, %v3389_v50, %v7678_v1  ;;  %v2468_v39 = vadd.f32 %v7566_v53, %v8630_v9  ;;  %v3388_v29 = vsel %vm233_vm0, %v2596_v47, %v7594_v62  ;;  %v3387_v1 = vsel %vm233_vm0, %v2595_v15, %v7685_v12  ;;  %v3617_v21 = vld [vmem:[%s8487_s16 + $0x18] sm:$0xff]  ;;  %v3616_v48 = vld [vmem:[%s8487_s16 + $0x10] sm:$0xff]  ;;  %v3615_v28 = vld [vmem:[%s8487_s16 + $0x8] sm:$0xff] }
 0x6aa   :  { %v3327_v11 = vpop.permute.xlu0 %3326  ;;  %5328 = vmatprep.subr.mxu1 %v7708_v40  ;;  %v3403_v42 = vsel %vm233_vm0, %v2611_v51, %v7633_v58  ;;  %v3613_v57 = vld [vmem:[%s8486_s15 + $0x58] sm:$0xff]  ;;  %v3612_v50 = vld [vmem:[%s8486_s15 + $0x50] sm:$0xff]  ;;  %v3610_v27 = vld [vmem:[%s8486_s15 + $0x40] sm:$0xff] }
 0x6ab   :  { %5329 = vmatpush3.msra.mxu1 %v7714_v63  ;;  %v7810_v25 = vsel %vm2043_vm1, %v3404_v3, %v3327_v11  ;;  %v2610_v11 = vmax.f32 %v2532_v5, 0.0  ;;  %v2594_v58 = vmax.f32 %v2468_v39, 0.0  ;;  %v3609_v5 = vld [vmem:[%s8486_s15 + $0x38] sm:$0xff]  ;;  %v3608_v51 = vld [vmem:[%s8486_s15 + $0x30] sm:$0xff]  ;;  %v3607_v14 = vld [vmem:[%s8486_s15 + $0x28] sm:$0xff] }
 0x6ac   :  { %5330 = vmatprep.subr.mxu1 %v7726_v41  ;;  %v3291_v61 = vpop.permute.xlu1 %3290  ;;  %v3606_v3 = vld [vmem:[%s8486_s15 + $0x20] sm:$0xff]  ;;  %v3605_v9 = vld [vmem:[%s8486_s15 + $0x18] sm:$0xff] }
 0x6ad   :  { %5331 = vmatpush3.msra.mxu1 %v7732_v60  ;;  %v3402_v12 = vsel %vm233_vm0, %v2610_v11, %v3195_v19  ;;  %v3386_v44 = vsel %vm233_vm0, %v2594_v58, %v3163_v26  ;;  %v5927_v19 = vmov 0.0   ;;  %v3611_v26 = vld [vmem:[%s8486_s15 + $0x48] sm:$0xff]  ;;  %v5929_v58 = vmov 1  }
 0x6ae   :  { %v3295_v46 = vpop.permute.xlu0 %3294  ;;  %5332 = vmatprep.subr.mxu1 %v7744_v33  ;;  %v7835_v56 = vsel %vm2043_vm1, %v3386_v44, %v3291_v61  ;;  %5598 = vset.pattern.permute.xlu1 %v5929_v58  ;;  %v5930_v61 = vmov 0  }
 0x6af   :  { %5333 = vmatpush3.msra.mxu1 %v7750_v38  ;;  %v7817_v24 = vsel %vm2043_vm1, %v3388_v29, %v3295_v46  ;;  %v3604_v29 = vld [vmem:[%s8486_s15 + $0x10] sm:$0xff]  ;;  %5597 = vset.pattern.permute.xlu0 %v5930_v61 }
 0x6b0   :  { %5334 = vmatprep.subr.mxu1 %v7762_v32 }
 0x6b1   :  { %5335 = vmatpush3.msra.mxu1 %v7768_v30 }
 0x6b2   :  { %v3325_v4 = vpop.permute.xlu0 %3324  ;;  %5336 = vmatprep.subr.mxu1 %v7778_v16 }
 0x6b3   :  { %5337 = vmatpush3.msra.mxu1 %v7784_v17  ;;  %v7825_v62 = vsel %vm2043_vm1, %v3403_v42, %v3325_v4  ;;  %v3614_v4 = vld [vmem:[%s8487_s16] sm:$0xff]  ;;  %v3603_v42 = vld [vmem:[%s8486_s15 + $0x8] sm:$0xff] }
 0x6b4   :  { %5338 = vmatprep.subr.mxu1 %v7793_v20 }
 0x6b5   :  { %5339 = vmatpush3.msra.mxu1 %v7801_v55 }
 0x6b6   :  { %v3293_v8 = vpop.permute.xlu0 %3292  ;;  %5340 = vmatprep.subr.mxu1 %v7810_v25 }
 0x6b7   :  { %v7821_v53 = vsel %vm2043_vm1, %v3387_v1, %v3293_v8  ;;  %5341 = vmatpush3.msra.mxu1 %v7817_v24  ;;  %v3602_v8 = vld [vmem:[%s8486_s15] sm:$0xff] }
 0x6b8   :  { %5342 = vmatprep.subr.mxu1 %v7825_v62 }
 0x6b9   :  { %5343 = vmatpush3.msra.mxu1 %v7821_v53 }
 0x6ba   :  { %v3323_v46 = vpop.permute.xlu0 %3322 }
 0x6bb   :  { %v7832_v36 = vsel %vm2043_vm1, %v3402_v12, %v3323_v46 }
 0x6bc   :  { %5344 = vmatprep.subr.mxu1 %v7832_v36 }
 0x6bd   :  { %5345 = vmatpush3.msra.mxu1 %v7835_v56 }
 0x6be   :  { %3597 = vmatmul.mubr.f32.vlgmr.msra.gmra.mxu1 %v8631_v13  ;;  %5508 = vmatprep.subr.mxu1 %v5927_v19 }
 0x6bf   :  { %5509 = vmatpush3.msra.mxu1 %v3625_v10  ;;  %5532 = vmatprep.mubr.msk.f32.mxu1 %vm5928_vm3, %v5927_v19 }
 0x6c0   :  { %5510 = vmatprep.subr.mxu1 %v5927_v19 }
 0x6c1   :  { %5511 = vmatpush3.msra.mxu1 %v3624_v23 }
 0x6c2   :  { %5512 = vmatprep.subr.mxu1 %v5927_v19 }
 0x6c3   :  { %5513 = vmatpush3.msra.mxu1 %v3623_v37  ;;  %v5931_v37 = vmov 2  }
 0x6c4   :  { %5514 = vmatprep.subr.mxu1 %v5927_v19 }
 0x6c5   :  { %5515 = vmatpush3.msra.mxu1 %v3622_v31  ;;  %v5932_v31 = vmov 3  }
 0x6c6   :  { %5516 = vmatprep.subr.mxu1 %v5927_v19 }
 0x6c7   :  { %5517 = vmatpush3.msra.mxu1 %v3621_v34  ;;  %v3827_v34 = vld [vmem:[%s8482_s11 + $0x18] sm:$0x3f] }
 0x6c8   :  { %5518 = vmatprep.subr.mxu1 %v5927_v19 }
 0x6c9   :  { %5519 = vmatpush3.msra.mxu1 %v3620_v2  ;;  %v5933_v2 = vmov 4  }
 0x6ca   :  { %5520 = vmatprep.subr.mxu1 %v5927_v19 }
 0x6cb   :  { %5521 = vmatpush3.msra.mxu1 %v3619_v45  ;;  %v3826_v45 = vld [vmem:[%s8482_s11 + $0x10] sm:$0xff] }
 0x6cc   :  { %5522 = vmatprep.subr.mxu1 %v5927_v19 }
 0x6cd   :  { %5523 = vmatpush3.msra.mxu1 %v3618_v6  ;;  %v3825_v6 = vld [vmem:[%s8482_s11 + $0x8] sm:$0xff] }
 0x6ce   :  { %5524 = vmatprep.subr.mxu1 %v5927_v19 }
 0x6cf   :  { %5525 = vmatpush3.msra.mxu1 %v3617_v21  ;;  %v5934_v21 = vmov 5  }
 0x6d0   :  { %5526 = vmatprep.subr.mxu1 %v5927_v19 }
 0x6d1   :  { %5527 = vmatpush3.msra.mxu1 %v3616_v48  ;;  %v3824_v48 = vld [vmem:[%s8482_s11] sm:$0xff] }
 0x6d2   :  { %5528 = vmatprep.subr.mxu1 %v5927_v19 }
 0x6d3   :  { %5529 = vmatpush3.msra.mxu1 %v3615_v28  ;;  %v3773_v28 = vld [vmem:[%s8480_s9] sm:$0x3f] }
 0x6d4   :  { %5530 = vmatprep.subr.mxu1 %v5927_v19 }
 0x6d5   :  { %5531 = vmatpush3.msra.mxu1 %v3614_v4  ;;  %v3787_v4 = vrot.slane %v3773_v28, 1 }
 0x6d6   :  { %5535 = vmatprep.subr.mxu1 %v5927_v19 }
 0x6ed   :  { %v5311_v39 = vpop.f32.mrf.mxu0 }
 0x6ef   :  { %v5312_v1 = vpop.f32.mrf.mxu0 }
 0x6f0   :  { %v5313_v11 = vadd.f32 %v5312_v1, %v5311_v39  ;;  %v3811_v39 = vrot.slane %v3773_v28, 4 }
 0x77e   :  { %v5346_v49 = vpop.f32.mrf.mxu1 }
 0x780   :  { %v5347_v15 = vpop.f32.mrf.mxu1 }
 0x781   :  { %v5348_v47 = vadd.f32 %v5347_v15, %v5346_v49  ;;  %v3774_v15 = vld [vmem:[%s8481_s10] sm:$0x1] }
 0x783   :  { %5533 = vmatmul.mubr.msk.f32.vlgmr.msra.gmra.mxu1 %vm2088_vm2, %v5348_v47 }
 0x784   :  { %5536 = vmatpush3.msra.mxu1 %v3613_v57  ;;  %5559 = vmatprep.mubr.msk.f32.mxu1 %vm5928_vm3, %v5927_v19 }
 0x785   :  { %5537 = vmatprep.subr.mxu1 %v5927_v19 }
 0x786   :  { %5538 = vmatpush3.msra.mxu1 %v3612_v50  ;;  %v3795_v50 = vrot.slane %v3773_v28, 2 }
 0x787   :  { %5539 = vmatprep.subr.mxu1 %v5927_v19 }
 0x788   :  { %5540 = vmatpush3.msra.mxu1 %v3611_v26 }
 0x789   :  { %5541 = vmatprep.subr.mxu1 %v5927_v19 }
 0x78a   :  { %5542 = vmatpush3.msra.mxu1 %v3610_v27 }
 0x78b   :  { %5543 = vmatprep.subr.mxu1 %v5927_v19 }
 0x78c   :  { %5544 = vmatpush3.msra.mxu1 %v3609_v5 }
 0x78d   :  { %5545 = vmatprep.subr.mxu1 %v5927_v19 }
 0x78e   :  { %5546 = vmatpush3.msra.mxu1 %v3608_v51 }
 0x78f   :  { %5547 = vmatprep.subr.mxu1 %v5927_v19 }
 0x790   :  { %5548 = vmatpush3.msra.mxu1 %v3607_v14  ;;  %v3803_v14 = vrot.slane %v3773_v28, 3 }
 0x791   :  { %5549 = vmatprep.subr.mxu1 %v5927_v19 }
 0x792   :  { %5550 = vmatpush3.msra.mxu1 %v3606_v3 }
 0x793   :  { %5551 = vmatprep.subr.mxu1 %v5927_v19 }
 0x794   :  { %5552 = vmatpush3.msra.mxu1 %v3605_v9 }
 0x795   :  { %5553 = vmatprep.subr.mxu1 %v5927_v19 }
 0x796   :  { %5554 = vmatpush3.msra.mxu1 %v3604_v29 }
 0x797   :  { %5555 = vmatprep.subr.mxu1 %v5927_v19 }
 0x798   :  { %5556 = vmatpush3.msra.mxu1 %v3603_v42 }
 0x799   :  { %5557 = vmatprep.subr.mxu1 %v5927_v19 }
 0x79a   :  { %5558 = vmatpush3.msra.mxu1 %v3602_v8 }
 0x79b   :  { %5560 = vmatmul.mubr.msk.f32.vlgmr.msra.gmra.mxu1 %vm2088_vm2, %v5313_v11  ;;  %5562 = vmatprep.subr.mxu1 %v5927_v19  ;;  %v3819_v11 = vrot.slane %v3773_v28, 5 }
 0x79c   :  { %5570 = vmatprep.mubr.msk.f32.mxu1 %vm5928_vm3, %v5927_v19  ;;  %5563 = vmatpush3.msk.msra.mxu1 %vm3833_vm4, %v3827_v34 }
 0x79d   :  { %5564 = vmatprep.subr.mxu1 %v5927_v19 }
 0x79e   :  { %5565 = vmatpush3.msra.mxu1 %v3826_v45 }
 0x79f   :  { %5566 = vmatprep.subr.mxu1 %v5927_v19 }
 0x7a0   :  { %5567 = vmatpush3.msra.mxu1 %v3825_v6 }
 0x7a1   :  { %5568 = vmatprep.subr.mxu1 %v5927_v19 }
 0x7a2   :  { %5569 = vmatpush3.msra.mxu1 %v3824_v48 }
 0x843   :  { %v3695_v12 = vpop.f32.mrf.mxu1 }
 0x845   :  { %v5534_v46 = vpop.f32.mrf.mxu1 }
 0x85b   :  { %v3768_v44 = vpop.f32.mrf.mxu1 }
 0x85c   :  { %v3769_v10 = vadd.f32 %v3768_v44, %v3695_v12 }
 0x85d   :  { %v5561_v13 = vpop.f32.mrf.mxu1 }
 0x85e   :  { %v3772_v23 = vmul.f32 0.00014534884, %v3769_v10 }
 0x860   :  { %3783 = vperm.xlu1 %5598, %v3772_v23   ;;  %3777 = vperm.xlu0 %5597, %v3772_v23  }
 0x864   :  { %5599 = vset.pattern.permute.xlu1 %v5931_v37  ;;  %5600 = vset.pattern.permute.xlu0 %v5932_v31 }
 0x865   :  { %3792 = vperm.xlu1 %5599, %v3772_v23   ;;  %3800 = vperm.xlu0 %5600, %v3772_v23  }
 0x869   :  { %5601 = vset.pattern.permute.xlu1 %v5933_v2  ;;  %5603 = vset.pattern.permute.xlu0 %v5930_v61 }
 0x86a   :  { %3808 = vperm.xlu1 %5601, %v3772_v23  }
 0x86e   :  { %5602 = vset.pattern.permute.xlu1 %v5934_v21 }
 0x86f   :  { %3816 = vperm.xlu1 %5602, %v3772_v23   ;;  %v4526_v23 = vld [vmem:[#allocation2] ss:$0 sm:$0xff] }
 0x870   :  { %4295 = vperm.xlu0 %5603, %v4526_v23   ;;  %v8634_v23 = vld [vmem:[#allocation17_spill] sm:$0xff] }
 0x873   :  { %5604 = vset.pattern.permute.xlu1 %v5931_v37  ;;  %v3828_v37 = vld [vmem:[%s8483_s12] sm:$0x1] }
 0x8db   :  { %v3784_v49 = vpop.permute.xlu1 %3783  ;;  %v3778_v47 = vpop.permute.xlu0 %3777 }
 0x8dc   :  { %v3780_v57 = vmul.f32 %v3778_v47, %v3773_v28  ;;  %v3789_v19 = vmul.f32 %v3787_v4, %v3784_v49  ;;  %v3913_v49 = vld [vmem:[%s8484_s13] sm:$0x1] }
 0x8de   :  { %v3781_v26 = vadd.f32 %v3780_v57, %v3774_v15 }
 0x8e0   :  { %v3793_v27 = vpop.permute.xlu1 %3792  ;;  %v3790_v5 = vadd.f32 %v3789_v19, %v3781_v26  ;;  %v3801_v3 = vpop.permute.xlu0 %3800  ;;  %v3915_v19 = vld [vmem:[%s8488_s17] sm:$0x7] }
 0x8e1   :  { %v3797_v51 = vmul.f32 %v3795_v50, %v3793_v27  ;;  %v3805_v42 = vmul.f32 %v3803_v14, %v3801_v3 }
 0x8e3   :  { %v3798_v9 = vadd.f32 %v3797_v51, %v3790_v5 }
 0x8e5   :  { %v3809_v29 = vpop.permute.xlu1 %3808  ;;  %v3806_v8 = vadd.f32 %v3805_v42, %v3798_v9 }
 0x8e6   :  { %v3813_v1 = vmul.f32 %v3811_v39, %v3809_v29 }
 0x8e8   :  { %v3814_v46 = vadd.f32 %v3813_v1, %v3806_v8  ;;  %v8632_v8 = vld [vmem:[#allocation54_spill] sm:$0xff] }
 0x8ea   :  { %v3817_v12 = vpop.permute.xlu1 %3816 }
 0x8eb   :  { %v3821_v44 = vmul.f32 %v3819_v11, %v3817_v12  ;;  %v7981_v57 = vpop.permute.xlu0 %4295 }
 0x8ed   :  { %v3822_v10 = vadd.f32 %v3821_v44, %v3814_v46  ;;  %v8633_v44 = vld [vmem:[#allocation18_spill] sm:$0xff] }
 0x8ef   :  { %v3823_v13 = vmax.f32 %v3822_v10, 0.0 }
 0x8f1   :  { %5571 = vmatmul.mubr.msk.f32.vlgmr.msra.gmra.mxu1 %vm3829_vm5, %v3823_v13 }
 0x9b1   :  { %v3903_v34 = vpop.f32.mrf.mxu1 }
 0x9b2   :  { %v3904_v45 = vadd.f32 %v3903_v34, %v3828_v37 }
 0x9b3   :  { %v5572_v6 = vpop.f32.mrf.mxu1 }
 0x9b4   :  { %v4525_v48 = vmul.f32 -1.442695, %v3904_v45 }
 0x9b6   :  { %5754 = vpow2.f32 %v4525_v48 }
 0x9c3   :  { %v5755_v4 = vpop.eup %5754 }
 0x9c4   :  { %v3910_v28 = vadd.f32 1.0, %v5755_v4 }
 0x9c6   :  { %5756 = vrcp.f32 %v3910_v28 }
 0x9d3   :  { %v5757_v15 = vpop.eup %5756 }
 0x9d4   :  { %v3914_v47 = vmul.f32 %v5757_v15, %v3913_v49 }
 0x9d6   :  { %3923 = vperm.xlu1 %5604, %v3914_v47   ;;  %3918 = vperm.xlu0 %5603, %v3914_v47  }
 0x9da   :  { %5605 = vset.pattern.permute.xlu1 %v5929_v58  ;;  %5606 = vset.pattern.permute.xlu0 %v5932_v31  ;;  %v3927_v58 = vrot.slane %v3915_v19, 1  ;;  %v3935_v31 = vrot.slane %v3915_v19, 2 }
 0x9db   :  { %3940 = vperm.xlu1 %5605, %v3914_v47   ;;  %3945 = vperm.xlu0 %5606, %v3914_v47  }
 0x9df   :  { %5607 = vset.pattern.permute.xlu1 %v5933_v2  ;;  %5609 = vset.pattern.permute.xlu0 %v5930_v61 }
 0x9e0   :  { %3932 = vperm.xlu1 %5607, %v3914_v47  }
 0x9e4   :  { %5608 = vset.pattern.permute.xlu1 %v5934_v21 }
 0x9e5   :  { %3951 = vperm.xlu1 %5608, %v3914_v47  }
 0xa51   :  { %v3924_v50 = vpop.permute.xlu1 %3923  ;;  %v3919_v26 = vpop.permute.xlu0 %3918 }
 0xa52   :  { %v3929_v5 = vmul.f32 %v3927_v58, %v3924_v50  ;;  %v3921_v51 = vmul.f32 %v3919_v26, %v3915_v19  ;;  %v8637_v50 = vld [vmem:[#allocation22_spill] sm:$0xff]  ;;  %v8638_v26 = vld [vmem:[#allocation21_spill] sm:$0xff] }
 0xa54   :  { %v3930_v9 = vadd.f32 %v3929_v5, %v3921_v51  ;;  %v8639_v5 = vld [vmem:[#allocation24_spill] sm:$0xff] }
 0xa56   :  { %v3941_v27 = vpop.permute.xlu1 %3940  ;;  %v3946_v14 = vpop.permute.xlu0 %3945 }
 0xa57   :  { %v3943_v61 = vmul.f32 %v3941_v27, %v3915_v19  ;;  %v3948_v21 = vmul.f32 %v3946_v14, %v3927_v58  ;;  %v8640_v14 = vld [vmem:[#allocation23_spill] sm:$0xff] }
 0xa59   :  { %v3949_v42 = vadd.f32 %v3948_v21, %v3943_v61 }
 0xa5b   :  { %v3933_v2 = vpop.permute.xlu1 %3932 }
 0xa5c   :  { %v3937_v3 = vmul.f32 %v3935_v31, %v3933_v2 }
 0xa5e   :  { %v3938_v39 = vadd.f32 %v3937_v3, %v3930_v9  ;;  %v8641_v9 = vld [vmem:[#allocation26_spill] sm:$0xff] }
 0xa60   :  { %v3952_v29 = vpop.permute.xlu1 %3951  ;;  %v7987_v11 = vrot.slane %v3938_v39, %v8632_v8  ;;  %v8642_v39 = vld [vmem:[#allocation25_spill] sm:$0xff] }
 0xa61   :  { %v3954_v1 = vmul.f32 %v3952_v29, %v3935_v31 }
 0xa62   :  { %v3961_v10 = vmul.f32 %v7987_v11, %v8633_v44  ;;  %v3960_v37 = vmul.f32 %v7987_v11, %v8634_v23  ;;  %v3965_v19 = vmul.f32 %v7987_v11, %v8637_v50  ;;  %v3964_v58 = vmul.f32 %v7987_v11, %v8638_v26  ;;  %v8644_v44 = vld [vmem:[#allocation27_spill] sm:$0xff]  ;;  %v8649_v26 = vld [vmem:[#allocation34_spill] sm:$0xff] }
 0xa63   :  { %v3955_v12 = vadd.f32 %v3954_v1, %v3949_v42  ;;  %v3967_v51 = vmul.f32 %v7987_v11, %v8639_v5  ;;  %v3966_v2 = vmul.f32 %v7987_v11, %v8640_v14  ;;  %v3969_v21 = vmul.f32 %v7987_v11, %v8641_v9  ;;  %v8651_v14 = vld [vmem:[#allocation36_spill] sm:$0xff] }
 0xa64   :  { %v3968_v29 = vmul.f32 %v7987_v11, %v8642_v39  ;;  %v8653_v39 = vld [vmem:[#allocation38_spill] sm:$0xff] }
 0xa65   :  { %v7990_v46 = vrot.slane %v3955_v12, %v8632_v8  ;;  %v8643_v8 = vld [vmem:[#allocation28_spill] sm:$0xff] }
 0xa66   :  { %v3971_v12 = vmul.f32 %v7987_v11, %v8643_v8 }
 0xa67   :  { %v3992_v13 = vmul.f32 %v7990_v46, %v7821_v53  ;;  %v3991_v34 = vmul.f32 %v7990_v46, %v7835_v56  ;;  %v3994_v48 = vmul.f32 %v7990_v46, %v7801_v55  ;;  %v3993_v4 = vmul.f32 %v7990_v46, %v7817_v24  ;;  %v8635_v53 = vld [vmem:[#allocation20_spill] sm:$0xff]  ;;  %v8636_v56 = vld [vmem:[#allocation19_spill] sm:$0xff] }
 0xa68   :  { %v3963_v28 = vmul.f32 %v7987_v11, %v8635_v53  ;;  %v3962_v49 = vmul.f32 %v7987_v11, %v8636_v56  ;;  %v3996_v55 = vmul.f32 %v7990_v46, %v7768_v30  ;;  %v3995_v24 = vmul.f32 %v7990_v46, %v7784_v17  ;;  %v8647_v56 = vld [vmem:[#allocation32_spill] sm:$0xff] }
 0xa69   :  { %v8000_v45 = vadd.f32 %v3992_v13, %v3961_v10  ;;  %v8002_v6 = vadd.f32 %v3991_v34, %v3960_v37  ;;  %v3998_v30 = vmul.f32 %v7990_v46, %v7732_v60  ;;  %v3997_v17 = vmul.f32 %v7990_v46, %v7750_v38  ;;  %v8645_v37 = vld [vmem:[#allocation30_spill] sm:$0xff] }
 0xa6a   :  { %v8016_v15 = vadd.f32 %v3994_v48, %v3963_v28  ;;  %v8018_v47 = vadd.f32 %v3993_v4, %v3962_v49  ;;  %v8032_v27 = vadd.f32 %v3996_v55, %v3965_v19  ;;  %v8034_v31 = vadd.f32 %v3995_v24, %v3964_v58  ;;  %v8646_v48 = vld [vmem:[#allocation29_spill] sm:$0xff]  ;;  %v8648_v55 = vld [vmem:[#allocation31_spill] sm:$0xff] }
 0xa6b   :  { %4074 = vrot.lane.b32.xlu1 %v8000_v45, %s5924_s23  ;;  %4072 = vrot.lane.b32.xlu0 %v8002_v6, %s5924_s23  ;;  %v8048_v3 = vadd.f32 %v3998_v30, %v3967_v51  ;;  %v8050_v61 = vadd.f32 %v3997_v17, %v3966_v2  ;;  %v4000_v60 = vmul.f32 %v7990_v46, %v7696_v35  ;;  %v8650_v30 = vld [vmem:[#allocation33_spill] sm:$0xff] }
 0xa6c   :  { %v3999_v38 = vmul.f32 %v7990_v46, %v7714_v63  ;;  %v4002_v35 = vmul.f32 %v7990_v46, %v7657_v7  ;;  %v4001_v63 = vmul.f32 %v7990_v46, %v7674_v22  ;;  %v3970_v10 = vmul.f32 %v7987_v11, %v8644_v44  ;;  %v8655_v44 = vld [vmem:[#allocation40_spill] sm:$0xff] }
 0xa6d   :  { %v8064_v42 = vadd.f32 %v4000_v60, %v3969_v21  ;;  %v4004_v7 = vmul.f32 %v7990_v46, %v7626_v0  ;;  %v4003_v22 = vmul.f32 %v7990_v46, %v7641_v52  ;;  %v3973_v34 = vmul.f32 %v7987_v11, %v8645_v37  ;;  %v8652_v60 = vld [vmem:[#allocation35_spill] sm:$0xff] }
 0xa6e   :  { %v8066_v1 = vadd.f32 %v3999_v38, %v3968_v29  ;;  %v8080_v13 = vadd.f32 %v4002_v35, %v3971_v12  ;;  %v8082_v23 = vadd.f32 %v4001_v63, %v3970_v10  ;;  %v3972_v4 = vmul.f32 %v7987_v11, %v8646_v48  ;;  %v8654_v35 = vld [vmem:[#allocation37_spill] sm:$0xff] }
 0xa6f   :  { %4078 = vrot.lane.b32.xlu1 %v8016_v15, %s5924_s23  ;;  %4076 = vrot.lane.b32.xlu0 %v8018_v47, %s5924_s23  ;;  %v8096_v53 = vadd.f32 %v4004_v7, %v3973_v34  ;;  %v4006_v0 = vmul.f32 %v7990_v46, %v7600_v59  ;;  %v4005_v52 = vmul.f32 %v7990_v46, %v7611_v18  ;;  %v8656_v7 = vld [vmem:[#allocation39_spill] sm:$0xff]  ;;  %v8657_v48 = vld [vmem:[#allocation41_spill] sm:$0xff] }
 0xa70   :  { %v8098_v28 = vadd.f32 %v4003_v22, %v3972_v4  ;;  %v3975_v49 = vmul.f32 %v7987_v11, %v8647_v56  ;;  %v3974_v24 = vmul.f32 %v7987_v11, %v8648_v55  ;;  %v4008_v59 = vmul.f32 %v7990_v46, %v7825_v62 }
 0xa71   :  { %v4007_v18 = vmul.f32 %v7990_v46, %v7832_v36  ;;  %v3977_v58 = vmul.f32 %v7987_v11, %v8649_v26  ;;  %v3976_v17 = vmul.f32 %v7987_v11, %v8650_v30  ;;  %v4010_v62 = vmul.f32 %v7990_v46, %v7793_v20 }
 0xa72   :  { %v8112_v50 = vadd.f32 %v4006_v0, %v3975_v49  ;;  %v8114_v19 = vadd.f32 %v4005_v52, %v3974_v24  ;;  %v4009_v36 = vmul.f32 %v7990_v46, %v7810_v25  ;;  %v3979_v2 = vmul.f32 %v7987_v11, %v8651_v14  ;;  %v8658_v0 = vld [vmem:[#allocation42_spill] sm:$0xff] }
 0xa73   :  { %4082 = vrot.lane.b32.xlu1 %v8032_v27, %s5924_s23  ;;  %4080 = vrot.lane.b32.xlu0 %v8034_v31, %s5924_s23  ;;  %v8128_v5 = vadd.f32 %v4008_v59, %v3977_v58  ;;  %v8130_v51 = vadd.f32 %v4007_v18, %v3976_v17  ;;  %v3978_v38 = vmul.f32 %v7987_v11, %v8652_v60 }
 0xa74   :  { %v8144_v9 = vadd.f32 %v4010_v62, %v3979_v2  ;;  %v4012_v20 = vmul.f32 %v7990_v46, %v7762_v32  ;;  %v4011_v25 = vmul.f32 %v7990_v46, %v7778_v16  ;;  %v3981_v29 = vmul.f32 %v7987_v11, %v8653_v39 }
 0xa75   :  { %v8146_v21 = vadd.f32 %v4009_v36, %v3978_v38  ;;  %v3980_v63 = vmul.f32 %v7987_v11, %v8654_v35  ;;  %v4014_v32 = vmul.f32 %v7990_v46, %v7726_v41  ;;  %v4013_v16 = vmul.f32 %v7990_v46, %v7744_v33 }
 0xa76   :  { %v8160_v8 = vadd.f32 %v4012_v20, %v3981_v29  ;;  %v3983_v10 = vmul.f32 %v7987_v11, %v8655_v44  ;;  %v3982_v22 = vmul.f32 %v7987_v11, %v8656_v7  ;;  %v4015_v41 = vmul.f32 %v7990_v46, %v7708_v40 }
 0xa77   :  { %4086 = vrot.lane.b32.xlu1 %v8048_v3, %s5924_s23  ;;  %4084 = vrot.lane.b32.xlu0 %v8050_v61, %s5924_s23  ;;  %v8162_v12 = vadd.f32 %v4011_v25, %v3980_v63  ;;  %v4017_v33 = vmul.f32 %v7990_v46, %v7668_v43  ;;  %v3984_v4 = vmul.f32 %v7987_v11, %v8657_v48  ;;  %v8659_v43 = vld [vmem:[#allocation10_spill] sm:$0xff] }
 0xa78   :  { %v8176_v37 = vadd.f32 %v4014_v32, %v3983_v10  ;;  %v8178_v34 = vadd.f32 %v4013_v16, %v3982_v22  ;;  %v3986_v52 = vmul.f32 %v7987_v11, %v8658_v0  ;;  %v4016_v40 = vmul.f32 %v7990_v46, %v7690_v54 }
 0xa79   :  { %v8192_v56 = vadd.f32 %v4015_v41, %v3984_v4  ;;  %v3985_v55 = vmul.f32 %v7987_v11, %v8659_v43 }
 0xa7a   :  { %v8194_v49 = vadd.f32 %v4017_v33, %v3986_v52 }
 0xa7b   :  { %4090 = vrot.lane.b32.xlu1 %v8064_v42, %s5924_s23  ;;  %4088 = vrot.lane.b32.xlu0 %v8066_v1, %s5924_s23  ;;  %v8204_v24 = vadd.f32 %v4016_v40, %v3985_v55 }
 0xa7f   :  { %4094 = vrot.lane.b32.xlu1 %v8080_v13, %s5924_s23  ;;  %4092 = vrot.lane.b32.xlu0 %v8082_v23, %s5924_s23 }
 0xa83   :  { %4098 = vrot.lane.b32.xlu1 %v8096_v53, %s5924_s23  ;;  %4096 = vrot.lane.b32.xlu0 %v8098_v28, %s5924_s23 }
 0xa87   :  { %4102 = vrot.lane.b32.xlu1 %v8112_v50, %s5924_s23  ;;  %4100 = vrot.lane.b32.xlu0 %v8114_v19, %s5924_s23 }
 0xa8b   :  { %4106 = vrot.lane.b32.xlu1 %v8128_v5, %s5924_s23  ;;  %4104 = vrot.lane.b32.xlu0 %v8130_v51, %s5924_s23 }
 0xa8f   :  { %4110 = vrot.lane.b32.xlu1 %v8144_v9, %s5924_s23  ;;  %4108 = vrot.lane.b32.xlu0 %v8146_v21, %s5924_s23 }
 0xa93   :  { %4114 = vrot.lane.b32.xlu1 %v8160_v8, %s5924_s23  ;;  %4112 = vrot.lane.b32.xlu0 %v8162_v12, %s5924_s23 }
 0xa97   :  { %4118 = vrot.lane.b32.xlu1 %v8176_v37, %s5924_s23  ;;  %4116 = vrot.lane.b32.xlu0 %v8178_v34, %s5924_s23 }
 0xa9b   :  { %4120 = vrot.lane.b32.xlu1 %v8192_v56, %s5924_s23  ;;  %4124 = vrot.lane.b32.xlu0 %v8194_v49, %s5924_s23 }
 0xa9f   :  { %4122 = vrot.lane.b32.xlu1 %v8204_v24, %s5924_s23  ;;  %4182 = vrot.lane.b32.xlu0 %v8000_v45, %s5925_s21 }
 0xaa3   :  { %4180 = vrot.lane.b32.xlu1 %v8002_v6, %s5925_s21  ;;  %4186 = vrot.lane.b32.xlu0 %v8016_v15, %s5925_s21 }
 0xaa7   :  { %4184 = vrot.lane.b32.xlu1 %v8018_v47, %s5925_s21  ;;  %4190 = vrot.lane.b32.xlu0 %v8032_v27, %s5925_s21 }
 0xaab   :  { %4188 = vrot.lane.b32.xlu1 %v8034_v31, %s5925_s21  ;;  %4194 = vrot.lane.b32.xlu0 %v8048_v3, %s5925_s21 }
 0xaaf   :  { %4192 = vrot.lane.b32.xlu1 %v8050_v61, %s5925_s21  ;;  %4198 = vrot.lane.b32.xlu0 %v8064_v42, %s5925_s21 }
 0xab3   :  { %4196 = vrot.lane.b32.xlu1 %v8066_v1, %s5925_s21  ;;  %4202 = vrot.lane.b32.xlu0 %v8080_v13, %s5925_s21 }
 0xab7   :  { %4200 = vrot.lane.b32.xlu1 %v8082_v23, %s5925_s21  ;;  %4206 = vrot.lane.b32.xlu0 %v8096_v53, %s5925_s21 }
 0xabb   :  { %4204 = vrot.lane.b32.xlu1 %v8098_v28, %s5925_s21  ;;  %4210 = vrot.lane.b32.xlu0 %v8112_v50, %s5925_s21 }
 0xabf   :  { %4208 = vrot.lane.b32.xlu1 %v8114_v19, %s5925_s21  ;;  %4214 = vrot.lane.b32.xlu0 %v8128_v5, %s5925_s21 }
 0xac3   :  { %4212 = vrot.lane.b32.xlu1 %v8130_v51, %s5925_s21  ;;  %4218 = vrot.lane.b32.xlu0 %v8144_v9, %s5925_s21 }
 0xac7   :  { %4216 = vrot.lane.b32.xlu1 %v8146_v21, %s5925_s21  ;;  %4222 = vrot.lane.b32.xlu0 %v8160_v8, %s5925_s21 }
 0xacb   :  { %4220 = vrot.lane.b32.xlu1 %v8162_v12, %s5925_s21  ;;  %4226 = vrot.lane.b32.xlu0 %v8176_v37, %s5925_s21 }
 0xacf   :  { %4224 = vrot.lane.b32.xlu1 %v8178_v34, %s5925_s21  ;;  %4230 = vrot.lane.b32.xlu0 %v8204_v24, %s5925_s21 }
 0xad3   :  { %4228 = vrot.lane.b32.xlu1 %v8192_v56, %s5925_s21 }
 0xad7   :  { %4232 = vrot.lane.b32.xlu1 %v8194_v49, %s5925_s21 }
 0xadd   :  { %v4075_v54 = vpop.permute.xlu1 %4074  ;;  %v4073_v11 = vpop.permute.xlu0 %4072 }
 0xade   :  { %v4154_v22 = vadd.f32 %v4075_v54, %v8000_v45  ;;  %v4153_v4 = vadd.f32 %v4073_v11, %v8002_v6 }
 0xae1   :  { %v4079_v46 = vpop.permute.xlu1 %4078  ;;  %v4077_v59 = vpop.permute.xlu0 %4076 }
 0xae2   :  { %v4156_v0 = vadd.f32 %v4079_v46, %v8016_v15  ;;  %v4155_v45 = vadd.f32 %v4077_v59, %v8018_v47 }
 0xae5   :  { %v4083_v18 = vpop.permute.xlu1 %4082  ;;  %v4081_v26 = vpop.permute.xlu0 %4080 }
 0xae6   :  { %v4158_v54 = vadd.f32 %v4083_v18, %v8032_v27  ;;  %v4157_v27 = vadd.f32 %v4081_v26, %v8034_v31 }
 0xae9   :  { %v4087_v58 = vpop.permute.xlu1 %4086  ;;  %v4085_v30 = vpop.permute.xlu0 %4084 }
 0xaea   :  { %v4160_v59 = vadd.f32 %v4087_v58, %v8048_v3  ;;  %v4159_v3 = vadd.f32 %v4085_v30, %v8050_v61 }
 0xaed   :  { %v4091_v17 = vpop.permute.xlu1 %4090  ;;  %v4089_v62 = vpop.permute.xlu0 %4088 }
 0xaee   :  { %v4162_v26 = vadd.f32 %v4091_v17, %v8064_v42  ;;  %v4161_v42 = vadd.f32 %v4089_v62, %v8066_v1 }
 0xaf1   :  { %v4095_v36 = vpop.permute.xlu1 %4094  ;;  %v8262_v14 = vpop.permute.xlu0 %4092 }
 0xaf2   :  { %v4164_v30 = vadd.f32 %v4095_v36, %v8080_v13  ;;  %v4163_v13 = vadd.f32 %v8262_v14, %v8082_v23 }
 0xaf5   :  { %v8264_v2 = vpop.permute.xlu1 %4098  ;;  %v8266_v60 = vpop.permute.xlu0 %4096 }
 0xaf6   :  { %v4166_v62 = vadd.f32 %v8264_v2, %v8096_v53  ;;  %v4165_v53 = vadd.f32 %v8266_v60, %v8098_v28 }
 0xaf9   :  { %v8268_v38 = vpop.permute.xlu1 %4102  ;;  %v8270_v20 = vpop.permute.xlu0 %4100 }
 0xafa   :  { %v4168_v2 = vadd.f32 %v8268_v38, %v8112_v50  ;;  %v4167_v50 = vadd.f32 %v8270_v20, %v8114_v19 }
 0xafd   :  { %v8272_v25 = vpop.permute.xlu1 %4106  ;;  %v8274_v39 = vpop.permute.xlu0 %4104 }
 0xafe   :  { %v4170_v38 = vadd.f32 %v8272_v25, %v8128_v5  ;;  %v4169_v5 = vadd.f32 %v8274_v39, %v8130_v51 }
 0xb01   :  { %v8276_v29 = vpop.permute.xlu1 %4110  ;;  %v8278_v35 = vpop.permute.xlu0 %4108 }
 0xb02   :  { %v4172_v25 = vadd.f32 %v8276_v29, %v8144_v9  ;;  %v4171_v9 = vadd.f32 %v8278_v35, %v8146_v21 }
 0xb05   :  { %v8280_v63 = vpop.permute.xlu1 %4114  ;;  %v8282_v32 = vpop.permute.xlu0 %4112 }
 0xb06   :  { %v4174_v29 = vadd.f32 %v8280_v63, %v8160_v8  ;;  %v4173_v8 = vadd.f32 %v8282_v32, %v8162_v12 }
 0xb09   :  { %v8284_v16 = vpop.permute.xlu1 %4118  ;;  %v8286_v44 = vpop.permute.xlu0 %4116 }
 0xb0a   :  { %v4176_v63 = vadd.f32 %v8284_v16, %v8176_v37  ;;  %v4175_v37 = vadd.f32 %v8286_v44, %v8178_v34 }
 0xb0d   :  { %v8288_v10 = vpop.permute.xlu1 %4120  ;;  %v8290_v7 = vpop.permute.xlu0 %4124 }
 0xb0e   :  { %8660 = vst [vmem:[#allocation65_spill] sm:$0xff] %v8290_v7 }
 0xb11   :  { %v8293_v41 = vpop.permute.xlu1 %4122  ;;  %v4183_v33 = vpop.permute.xlu0 %4182 }
 0xb12   :  { %v4262_v48 = vadd.f32 %v4183_v33, %v4154_v22  ;;  %v4178_v16 = vadd.f32 %v8293_v41, %v8204_v24  ;;  %v4177_v24 = vadd.f32 %v8288_v10, %v8192_v56 }
 0xb14   :  { %v4299_v52 = vadd.f32 %v7981_v57, %v4262_v48 }
 0xb15   :  { %v4181_v40 = vpop.permute.xlu1 %4180  ;;  %v4187_v43 = vpop.permute.xlu0 %4186 }
 0xb16   :  { %4326 = vst.msk [vmem:[%s8489_s18 + $0x8] sm:$0xff] %vm233_vm0, %v4299_v52  ;;  %v4261_v55 = vadd.f32 %v4181_v40, %v4153_v4  ;;  %v4264_v7 = vadd.f32 %v4187_v43, %v4156_v0 }
 0xb18   :  { %v4298_v22 = vadd.f32 %v7981_v57, %v4261_v55  ;;  %v4301_v6 = vadd.f32 %v7981_v57, %v4264_v7 }
 0xb19   :  { %v4185_v15 = vpop.permute.xlu1 %4184  ;;  %v4191_v11 = vpop.permute.xlu0 %4190 }
 0xb1a   :  { %4325 = vst.msk [vmem:[%s8489_s18] sm:$0xff] %vm233_vm0, %v4298_v22  ;;  %4328 = vst.msk [vmem:[%s8489_s18 + $0x18] sm:$0xff] %vm233_vm0, %v4301_v6  ;;  %v4263_v46 = vadd.f32 %v4185_v15, %v4155_v45  ;;  %v4266_v47 = vadd.f32 %v4191_v11, %v4158_v54 }
 0xb1c   :  { %v4300_v18 = vadd.f32 %v7981_v57, %v4263_v46  ;;  %v4303_v7 = vadd.f32 %v7981_v57, %v4266_v47 }
 0xb1d   :  { %v4189_v33 = vpop.permute.xlu1 %4188  ;;  %v4195_v48 = vpop.permute.xlu0 %4194 }
 0xb1e   :  { %4327 = vst.msk [vmem:[%s8489_s18 + $0x10] sm:$0xff] %vm233_vm0, %v4300_v18  ;;  %4330 = vst.msk [vmem:[%s8489_s18 + $0x28] sm:$0xff] %vm233_vm0, %v4303_v7  ;;  %v4265_v4 = vadd.f32 %v4189_v33, %v4157_v27  ;;  %v4268_v31 = vadd.f32 %v4195_v48, %v4160_v59 }
 0xb20   :  { %v4302_v58 = vadd.f32 %v7981_v57, %v4265_v4  ;;  %v4305_v0 = vadd.f32 %v7981_v57, %v4268_v31 }
 0xb21   :  { %v4193_v52 = vpop.permute.xlu1 %4192  ;;  %v4199_v40 = vpop.permute.xlu0 %4198 }
 0xb22   :  { %4329 = vst.msk [vmem:[%s8489_s18 + $0x20] sm:$0xff] %vm233_vm0, %v4302_v58  ;;  %4332 = vst.msk [vmem:[%s8489_s18 + $0x38] sm:$0xff] %vm233_vm0, %v4305_v0  ;;  %v4267_v43 = vadd.f32 %v4193_v52, %v4159_v3  ;;  %v4270_v61 = vadd.f32 %v4199_v40, %v4162_v26 }
 0xb24   :  { %v4304_v17 = vadd.f32 %v7981_v57, %v4267_v43  ;;  %v4307_v55 = vadd.f32 %v7981_v57, %v4270_v61 }
 0xb25   :  { %v4197_v45 = vpop.permute.xlu1 %4196  ;;  %v4203_v54 = vpop.permute.xlu0 %4202 }
 0xb26   :  { %4331 = vst.msk [vmem:[%s8489_s18 + $0x30] sm:$0xff] %vm233_vm0, %v4304_v17  ;;  %4334 = vst.msk [vmem:[%s8489_s18 + $0x48] sm:$0xff] %vm233_vm0, %v4307_v55  ;;  %v4269_v22 = vadd.f32 %v4197_v45, %v4161_v42  ;;  %v4272_v1 = vadd.f32 %v4203_v54, %v4164_v30 }
 0xb28   :  { %v4306_v36 = vadd.f32 %v7981_v57, %v4269_v22  ;;  %v4309_v6 = vadd.f32 %v7981_v57, %v4272_v1 }
 0xb29   :  { %v4201_v15 = vpop.permute.xlu1 %4200  ;;  %v4207_v11 = vpop.permute.xlu0 %4206 }
 0xb2a   :  { %4333 = vst.msk [vmem:[%s8489_s18 + $0x40] sm:$0xff] %vm233_vm0, %v4306_v36  ;;  %4336 = vst.msk [vmem:[%s8489_s18 + $0x58] sm:$0xff] %vm233_vm0, %v4309_v6  ;;  %v4271_v23 = vadd.f32 %v4201_v15, %v4163_v13  ;;  %v4274_v14 = vadd.f32 %v4207_v11, %v4166_v62  ;;  %v8661_v62 = vld [vmem:[#allocation65_spill] sm:$0xff] }
 0xb2b   :  { %v4179_v36 = vadd.f32 %v8661_v62, %v8194_v49 }
 0xb2c   :  { %v4308_v46 = vadd.f32 %v7981_v57, %v4271_v23  ;;  %v4311_v47 = vadd.f32 %v7981_v57, %v4274_v14 }
 0xb2d   :  { %v4205_v27 = vpop.permute.xlu1 %4204  ;;  %v4211_v59 = vpop.permute.xlu0 %4210 }
 0xb2e   :  { %4335 = vst.msk [vmem:[%s8489_s18 + $0x50] sm:$0xff] %vm233_vm0, %v4308_v46  ;;  %4338 = vst.msk [vmem:[%s8489_s18 + $0x68] sm:$0xff] %vm233_vm0, %v4311_v47  ;;  %v4273_v28 = vadd.f32 %v4205_v27, %v4165_v53  ;;  %v4276_v60 = vadd.f32 %v4211_v59, %v4168_v2 }
 0xb30   :  { %v4310_v18 = vadd.f32 %v7981_v57, %v4273_v28  ;;  %v4313_v7 = vadd.f32 %v7981_v57, %v4276_v60 }
 0xb31   :  { %v4209_v33 = vpop.permute.xlu1 %4208  ;;  %v4215_v48 = vpop.permute.xlu0 %4214 }
 0xb32   :  { %4337 = vst.msk [vmem:[%s8489_s18 + $0x60] sm:$0xff] %vm233_vm0, %v4310_v18  ;;  %4340 = vst.msk [vmem:[%s8489_s18 + $0x78] sm:$0xff] %vm233_vm0, %v4313_v7  ;;  %v4275_v19 = vadd.f32 %v4209_v33, %v4167_v50  ;;  %v4278_v20 = vadd.f32 %v4215_v48, %v4170_v38 }
 0xb34   :  { %v4312_v4 = vadd.f32 %v7981_v57, %v4275_v19  ;;  %v4315_v31 = vadd.f32 %v7981_v57, %v4278_v20 }
 0xb35   :  { %v4213_v3 = vpop.permute.xlu1 %4212  ;;  %v4219_v26 = vpop.permute.xlu0 %4218 }
 0xb36   :  { %4339 = vst.msk [vmem:[%s8489_s18 + $0x70] sm:$0xff] %vm233_vm0, %v4312_v4  ;;  %4342 = vst.msk [vmem:[%s8489_s18 + $0x88] sm:$0xff] %vm233_vm0, %v4315_v31  ;;  %v4277_v51 = vadd.f32 %v4213_v3, %v4169_v5  ;;  %v4280_v39 = vadd.f32 %v4219_v26, %v4172_v25 }
 0xb38   :  { %v4314_v58 = vadd.f32 %v7981_v57, %v4277_v51  ;;  %v4317_v0 = vadd.f32 %v7981_v57, %v4280_v39 }
 0xb39   :  { %v4217_v52 = vpop.permute.xlu1 %4216  ;;  %v4223_v40 = vpop.permute.xlu0 %4222 }
 0xb3a   :  { %4341 = vst.msk [vmem:[%s8489_s18 + $0x80] sm:$0xff] %vm233_vm0, %v4314_v58  ;;  %4344 = vst.msk [vmem:[%s8489_s18 + $0x98] sm:$0xff] %vm233_vm0, %v4317_v0  ;;  %v4279_v21 = vadd.f32 %v4217_v52, %v4171_v9  ;;  %v4282_v35 = vadd.f32 %v4223_v40, %v4174_v29 }
 0xb3c   :  { %v4316_v43 = vadd.f32 %v7981_v57, %v4279_v21  ;;  %v4319_v61 = vadd.f32 %v7981_v57, %v4282_v35 }
 0xb3d   :  { %v4221_v42 = vpop.permute.xlu1 %4220  ;;  %v4227_v30 = vpop.permute.xlu0 %4226 }
 0xb3e   :  { %4343 = vst.msk [vmem:[%s8489_s18 + $0x90] sm:$0xff] %vm233_vm0, %v4316_v43  ;;  %4346 = vst.msk [vmem:[%s8489_s18 + $0xa8] sm:$0xff] %vm233_vm0, %v4319_v61  ;;  %v4281_v12 = vadd.f32 %v4221_v42, %v4173_v8  ;;  %v4284_v32 = vadd.f32 %v4227_v30, %v4176_v63 }
 0xb40   :  { %v4318_v17 = vadd.f32 %v7981_v57, %v4281_v12  ;;  %v4321_v55 = vadd.f32 %v7981_v57, %v4284_v32 }
 0xb41   :  { %v4225_v45 = vpop.permute.xlu1 %4224  ;;  %v4231_v54 = vpop.permute.xlu0 %4230 }
 0xb42   :  { %4345 = vst.msk [vmem:[%s8489_s18 + $0xa0] sm:$0xff] %vm233_vm0, %v4318_v17  ;;  %4348 = vst.msk [vmem:[%s8489_s18 + $0xb8] sm:$0xff] %vm233_vm0, %v4321_v55  ;;  %v4283_v34 = vadd.f32 %v4225_v45, %v4175_v37  ;;  %v4286_v44 = vadd.f32 %v4231_v54, %v4178_v16 }
 0xb44   :  { %v4320_v41 = vadd.f32 %v7981_v57, %v4283_v34  ;;  %v4323_v22 = vadd.f32 %v7981_v57, %v4286_v44 }
 0xb45   :  { %v4229_v1 = vpop.permute.xlu1 %4228 }
 0xb46   :  { %4347 = vst.msk [vmem:[%s8489_s18 + $0xb0] sm:$0xff] %vm233_vm0, %v4320_v41  ;;  %4350 = vst.msk [vmem:[%s8489_s18 + $0xc8] sm:$0xff] %vm233_vm0, %v4323_v22  ;;  %v4285_v13 = vadd.f32 %v4229_v1, %v4177_v24 }
 0xb48   :  { %v4322_v56 = vadd.f32 %v7981_v57, %v4285_v13 }
 0xb49   :  { %v4233_v10 = vpop.permute.xlu1 %4232 }
 0xb4a   :  { %4349 = vst.msk [vmem:[%s8489_s18 + $0xc0] sm:$0xff] %vm233_vm0, %v4322_v56  ;;  %v4287_v6 = vadd.f32 %v4233_v10, %v4179_v36 }
 0xb4c   :  { %v4324_v15 = vadd.f32 %v7981_v57, %v4287_v6 }
 0xb4e   :  { %4352 = vst.msk [vmem:[%s8489_s18 + $0xd0] sm:$0x7f] %vm4351_vm6, %v4324_v15 }
 0xb4f   :  { %4357 = vsyncpa [#allocation4], 1 }
 0xb50   :  { %4358 = vsyncpa [#allocation6], 1 }

</bundles_post_ra>
